<compile_context>
chip_gen: v6e
topology: v6e:2x2x1
jax: 0.10.0
libtpu: 0.0.40
codegen_flags: <defaults>
</compile_context>

<pallas_src>
import jax
import jax.numpy as jnp
from jax.experimental import pallas as pl
from jax.experimental.pallas import tpu as pltpu

BN_EPS = 1e-5
LANE = 128


# ------------------------------ small helpers -------------------------------

def _round_up(x, m):
    return (x + m - 1) // m * m


def _largest_divisor_leq(n, target):
    t = max(1, min(n, int(target)))
    while n % t:
        t -= 1
    return t


# ------------------------------ Pallas kernels ------------------------------

def _deconv_kernel(x_ref, w_ref, b_ref, o_ref):
    """ConvTranspose2d(k=2, s=2) for a tile of (n,h) rows.

    x_ref: (T, W, Cin)           activation tile (rows over N*H, full W)
    w_ref: (Cin, 4*Cp)           resident weight, columns ordered (i, j, c)
    b_ref: (1, 4*Cp)             resident bias
    o_ref: (T, 2, W, 2*Cp)       interleaved layout: (nh, i, w, (j, c))
    """
    t, w, cin = x_ref.shape
    cp2 = o_ref.shape[-1]                       # 2 * Cp (lane-dense, 128-mult)
    xb = x_ref[...].reshape(t * w, cin)
    y = jnp.dot(xb, w_ref[...], preferred_element_type=jnp.float32) + b_ref[...]
    for i in range(2):                          # static unroll over sub-row i
        o_ref[:, i, :, :] = y[:, i * cp2:(i + 1) * cp2].reshape(t, w, cp2)


def _conv3x3_stats_kernel(x_ref, w_ref, b_ref, y_ref, sum_ref, ssq_ref):
    """3x3 conv (pad=1) on one image + BN statistics accumulation (pass 1).

    x_ref:   (1, H+2, W+2, Cp)   spatially padded image (halo inside block)
    w_ref:   (9, Cp, Cp)         resident taps, (dy*3+dx, cin, cout)
    b_ref:   (1, Cp)             resident bias
    y_ref:   (1, H*W, Cp)        pre-BN conv output for this image
    sum_ref: (1, Cp)             per-channel sum      (accumulated over grid)
    ssq_ref: (1, Cp)             per-channel sum(x^2) (accumulated over grid)
    """
    n = pl.program_id(0)
    _, hp2, wp2, cp = x_ref.shape
    h, w = hp2 - 2, wp2 - 2

    xb = x_ref[0]                               # (h+2, w+2, cp) in VMEM
    acc = jnp.zeros((h * w, cp), jnp.float32)
    for k in range(9):                          # 9 in-VMEM taps, no HBM im2col
        dy, dx = k // 3, k % 3
        patch = xb[dy:dy + h, dx:dx + w, :].reshape(h * w, cp)
        acc = acc + jnp.dot(patch, w_ref[k], preferred_element_type=jnp.float32)
    acc = acc + b_ref[...]
    y_ref[0] = acc

    @pl.when(n == 0)
    def _init():
        sum_ref[...] = jnp.zeros_like(sum_ref)
        ssq_ref[...] = jnp.zeros_like(ssq_ref)

    sum_ref[...] += jnp.sum(acc, axis=0, keepdims=True)
    ssq_ref[...] += jnp.sum(acc * acc, axis=0, keepdims=True)


def _bn_relu_kernel(y_ref, scale_ref, shift_ref, o_ref):
    """Pass 2: y * scale + shift, ReLU.  scale/shift fold mean/var/gamma/beta."""
    o_ref[...] = jnp.maximum(y_ref[...] * scale_ref[...] + shift_ref[...], 0.0)


# ------------------------------ JAX wrappers ---------------------------------

def _deconv2x2(x_nhwc, w_up, b_up, cp):
    """ConvTranspose2d(Cin, Cout, 2, 2); output NHWC with Cout padded to cp."""
    n, h, w, cin = x_nhwc.shape
    cout = w_up.shape[1]

    # (Cin, Cout, 2, 2) -> (Cin, 2, 2, Cp) -> (Cin, 4*Cp), columns (i, j, c)
    wt = jnp.transpose(w_up, (0, 2, 3, 1))
    wt = jnp.pad(wt, ((0, 0), (0, 0), (0, 0), (0, cp - cout))).reshape(cin, 4 * cp)
    bp = jnp.pad(b_up, (0, cp - cout))
    bm = jnp.tile(bp, 4)[None, :]                                  # (1, 4*Cp)

    nh = n * h
    x3 = x_nhwc.reshape(nh, w, cin)
    tile = _largest_divisor_leq(nh, max(1, 512 // w))              # ~512 rows/step

    out = pl.pallas_call(
        _deconv_kernel,
        out_shape=jax.ShapeDtypeStruct((nh, 2, w, 2 * cp), jnp.float32),
        grid_spec=pltpu.PrefetchScalarGridSpec(
            num_scalar_prefetch=0,
            grid=(nh // tile,),
            in_specs=[
                pl.BlockSpec((tile, w, cin), lambda m: (m, 0, 0)),
                pl.BlockSpec((cin, 4 * cp), lambda m: (0, 0)),     # resident
                pl.BlockSpec((1, 4 * cp), lambda m: (0, 0)),       # resident
            ],
            out_specs=pl.BlockSpec((tile, 2, w, 2 * cp), lambda m: (m, 0, 0, 0)),
        ),
        compiler_params=pltpu.CompilerParams(dimension_semantics=("parallel",)),
    )(x3, wt, bm)

    # (nh, i, w, (j, c)) row-major == (n, 2h+i, 2w+j, c): pure view reshape.
    return out.reshape(n, 2 * h, 2 * w, cp)


def _conv3x3_stats(y_nhwc, w_oihw, b, cp):
    """Conv2d(3x3, s=1, p=1) + per-channel sum/sumsq (BN pass 1)."""
    n, h, w, _ = y_nhwc.shape
    cout, cin = w_oihw.shape[0], w_oihw.shape[1]

    # (Cout, Cin, 3, 3) -> (3, 3, Cin, Cout) -> zero-pad channels -> (9, Cp, Cp)
    wt = jnp.transpose(w_oihw, (2, 3, 1, 0))
    wt = jnp.pad(wt, ((0, 0), (0, 0), (0, cp - cin), (0, cp - cout))).reshape(9, cp, cp)
    bp = jnp.pad(b, (0, cp - cout))[None, :]                       # (1, Cp)

    xp = jnp.pad(y_nhwc, ((0, 0), (1, 1), (1, 1), (0, 0)))         # spatial halo
    r = h * w

    # TODO(synk): for very large H*W a single image block can exceed VMEM;
    # that case needs H-tiling with an explicit halo DMA (manual async copy).
    y, s1, s2 = pl.pallas_call(
        _conv3x3_stats_kernel,
        out_shape=(
            jax.ShapeDtypeStruct((n, r, cp), jnp.float32),
            jax.ShapeDtypeStruct((1, cp), jnp.float32),
            jax.ShapeDtypeStruct((1, cp), jnp.float32),
        ),
        grid_spec=pltpu.PrefetchScalarGridSpec(
            num_scalar_prefetch=0,
            grid=(n,),
            in_specs=[
                pl.BlockSpec((1, h + 2, w + 2, cp), lambda i: (i, 0, 0, 0)),
                pl.BlockSpec((9, cp, cp), lambda i: (0, 0, 0)),    # resident
                pl.BlockSpec((1, cp), lambda i: (0, 0)),           # resident
            ],
            out_specs=(
                pl.BlockSpec((1, r, cp), lambda i: (i, 0, 0)),
                pl.BlockSpec((1, cp), lambda i: (0, 0)),           # accumulator
                pl.BlockSpec((1, cp), lambda i: (0, 0)),           # accumulator
            ),
        ),
        # stats accumulate across the batch axis -> sequential ("arbitrary")
        compiler_params=pltpu.CompilerParams(dimension_semantics=("arbitrary",)),
    )(xp, wt, bp)
    return y, s1[0], s2[0]


def _bn_relu(y_flat, scale, shift):
    """Row-tiled normalize + affine + ReLU (BN pass 2)."""
    r, cp = y_flat.shape
    tile = _largest_divisor_leq(r, 1024)
    return pl.pallas_call(
        _bn_relu_kernel,
        out_shape=jax.ShapeDtypeStruct((r, cp), jnp.float32),
        grid_spec=pltpu.PrefetchScalarGridSpec(
            num_scalar_prefetch=0,
            grid=(r // tile,),
            in_specs=[
                pl.BlockSpec((tile, cp), lambda m: (m, 0)),
                pl.BlockSpec((1, cp), lambda m: (0, 0)),           # resident
                pl.BlockSpec((1, cp), lambda m: (0, 0)),           # resident
            ],
            out_specs=pl.BlockSpec((tile, cp), lambda m: (m, 0)),
        ),
        compiler_params=pltpu.CompilerParams(dimension_semantics=("parallel",)),
    )(y_flat, scale[None, :], shift[None, :])


def _conv_bn_relu(y_nhwc, w, b, gamma, beta, cp):
    """Conv2d(3,1,1) + BatchNorm2d (training stats, affine) + ReLU."""
    n, h, w_sp, _ = y_nhwc.shape
    cout = w.shape[0]

    yc, s1, s2 = _conv3x3_stats(y_nhwc, w, b, cp)                  # pass 1
    count = n * h * w_sp
    mean = s1 / count
    var = jnp.maximum(s2 / count - mean * mean, 0.0)               # biased var
    gp = jnp.pad(gamma, (0, cp - cout))                            # pad gamma=0
    btp = jnp.pad(beta, (0, cp - cout))                            #  -> pad ch = 0
    scale = gp * jax.lax.rsqrt(var + BN_EPS)
    shift = btp - mean * scale

    z = _bn_relu(yc.reshape(n * h * w_sp, cp), scale, shift)       # pass 2
    return z.reshape(n, h, w_sp, cp)


def unet_up_noskip_forward(x_nchw, params):
    """Pallas implementation of unetUpNoSKip.forward (is_deconv=True)."""
    cout = params["w_up"].shape[1]
    cp = _round_up(cout, LANE)                                     # lane-dense

    x = jnp.transpose(x_nchw, (0, 2, 3, 1))                        # NCHW -> NHWC
    y = _deconv2x2(x, params["w_up"], params["b_up"], cp)          # self.up
    y = _conv_bn_relu(y, params["w1"], params["b1"],
                      params["g1"], params["beta1"], cp)           # conv1+BN+ReLU
    y = _conv_bn_relu(y, params["w2"], params["b2"],
                      params["g2"], params["beta2"], cp)           # conv2+BN+ReLU
    return jnp.transpose(y[..., :cout], (0, 3, 1, 2))              # NHWC -> NCHW


# ---------------------------- pure-JAX reference -----------------------------

def _reference(x_nchw, params):
    w_up, b_up = params["w_up"], params["b_up"]
    y = jnp.einsum("nchw,cdij->ndhiwj", x_nchw, w_up)
    n, cout, h, _, w, _ = y.shape
    y = y.reshape(n, cout, 2 * h, 2 * w) + b_up[None, :, None, None]

    def conv_bn_relu(x, wgt, b, g, bt):
        o = jax.lax.conv_general_dilated(
            x, wgt, (1, 1), ((1, 1), (1, 1)),
            dimension_numbers=("NCHW", "OIHW", "NCHW"),
        ) + b[None, :, None, None]
        mean = jnp.mean(o, axis=(0, 2, 3), keepdims=True)
        var = jnp.mean(jnp.square(o - mean), axis=(0, 2, 3), keepdims=True)
        o = (o - mean) * jax.lax.rsqrt(var + BN_EPS)
        o = o * g[None, :, None, None] + bt[None, :, None, None]
        return jnp.maximum(o, 0.0)

    y = conv_bn_relu(y, params["w1"], params["b1"], params["g1"], params["beta1"])
    y = conv_bn_relu(y, params["w2"], params["b2"], params["g2"], params["beta2"])
    return y


# ---------------------------------- main -------------------------------------

if __name__ == "__main__":
    in_size, out_size = 8, 4
    N, H, W = 2, 8, 8

    key = jax.random.PRNGKey(0)
    ks = jax.random.split(key, 11)
    params = {
        # ConvTranspose2d weight layout: (in_channels, out_channels, kH, kW)
        "w_up": 0.3 * jax.random.normal(ks[0], (in_size, out_size, 2, 2), jnp.float32),
        "b_up": 0.1 * jax.random.normal(ks[1], (out_size,), jnp.float32),
        # Conv2d weight layout: (out_channels, in_channels, 3, 3)
        "w1": 0.3 * jax.random.normal(ks[2], (out_size, out_size, 3, 3), jnp.float32),
        "b1": 0.1 * jax.random.normal(ks[3], (out_size,), jnp.float32),
        "g1": 1.0 + 0.1 * jax.random.normal(ks[4], (out_size,), jnp.float32),
        "beta1": 0.1 * jax.random.normal(ks[5], (out_size,), jnp.float32),
        "w2": 0.3 * jax.random.normal(ks[6], (out_size, out_size, 3, 3), jnp.float32),
        "b2": 0.1 * jax.random.normal(ks[7], (out_size,), jnp.float32),
        "g2": 1.0 + 0.1 * jax.random.normal(ks[8], (out_size,), jnp.float32),
        "beta2": 0.1 * jax.random.normal(ks[9], (out_size,), jnp.float32),
    }

    x = jax.random.normal(ks[10], (N, in_size, H, W), jnp.float32)

    out = jax.block_until_ready(jax.jit(unet_up_noskip_forward)(x, params))
    ref = jax.block_until_ready(_reference(x, params))

    assert out.shape == (N, out_size, 2 * H, 2 * W), out.shape
    err = float(jnp.max(jnp.abs(out - ref)))
    assert jnp.allclose(out, ref, atol=1e-2, rtol=1e-2), err
    print("KERNEL_OK")
</pallas_src>

<mosaic_0001>
module attributes {stable_mosaic.version = 11 : i64} {
  func.func @_deconv_kernel(%arg0: i32, %arg1: memref<16x8x8xf32, #tpu.memory_space<vmem>>, %arg2: memref<8x512xf32, #tpu.memory_space<vmem>>, %arg3: memref<1x512xf32, #tpu.memory_space<vmem>>, %arg4: memref<16x2x8x256xf32, #tpu.memory_space<vmem>>) attributes {dimension_semantics = [#tpu.dimension_semantics<parallel>], iteration_bounds = array<i64: 1>, scalar_prefetch = 0 : i64, scratch_operands = 0 : i64, tpu.core_type = #tpu.core_type<tc>, window_params = [{transform_indices = @transform_0, window_bounds = array<i64: 16, 8, 8>}, {pipeline_mode = #tpu.pipeline_mode<synchronous>, transform_indices = @transform_1, window_bounds = array<i64: 8, 512>}, {pipeline_mode = #tpu.pipeline_mode<synchronous>, transform_indices = @transform_2, window_bounds = array<i64: 1, 512>}, {transform_indices = @transform_3, window_bounds = array<i64: 16, 2, 8, 256>}]} {
    %c0 = arith.constant 0 : index
    %c0_0 = arith.constant 0 : index
    %c0_1 = arith.constant 0 : index
    %0 = vector.load %arg1[%c0, %c0_0, %c0_1] : memref<16x8x8xf32, #tpu.memory_space<vmem>>, vector<16x8x8xf32>
    %1 = vector.shape_cast %0 : vector<16x8x8xf32> to vector<128x8xf32>
    %c0_2 = arith.constant 0 : index
    %c0_3 = arith.constant 0 : index
    %2 = vector.load %arg2[%c0_2, %c0_3] : memref<8x512xf32, #tpu.memory_space<vmem>>, vector<8x512xf32>
    %cst = arith.constant dense<0.000000e+00> : vector<128x512xf32>
    %3 = tpu.matmul %1, %2, %cst {dimension_numbers = #tpu.dot_dimension_numbers<[1], [0], [0], [1], [0, 0, 1, 1], [], []>} : vector<128x8xf32>, vector<8x512xf32>, vector<128x512xf32> -> vector<128x512xf32>
    %c0_4 = arith.constant 0 : index
    %c0_5 = arith.constant 0 : index
    %4 = vector.load %arg3[%c0_4, %c0_5] : memref<1x512xf32, #tpu.memory_space<vmem>>, vector<1x512xf32>
    %5 = vector.broadcast %4 : vector<1x512xf32> to vector<128x512xf32>
    %6 = arith.addf %3, %5 : vector<128x512xf32>
    %7 = vector.extract_strided_slice %6 {offsets = [0, 0], sizes = [128, 256], strides = [1, 1]} : vector<128x512xf32> to vector<128x256xf32>
    %8 = vector.shape_cast %7 : vector<128x256xf32> to vector<16x8x256xf32>
    %c0_6 = arith.constant 0 : index
    %c0_7 = arith.constant 0 : index
    %c0_8 = arith.constant 0 : index
    %c0_9 = arith.constant 0 : index
    %9 = vector.load %arg4[%c0_6, %c0_7, %c0_8, %c0_9] : memref<16x2x8x256xf32, #tpu.memory_space<vmem>>, vector<16x1x8x256xf32>
    %10 = vector.shape_cast %9 : vector<16x1x8x256xf32> to vector<16x8x256xf32>
    %11 = vector.shape_cast %8 : vector<16x8x256xf32> to vector<16x1x8x256xf32>
    tpu.vector_store %arg4[%c0_6, %c0_7, %c0_8, %c0_9], %11 {strides = array<i32>} : memref<16x2x8x256xf32, #tpu.memory_space<vmem>>, vector<16x1x8x256xf32>,
    %12 = vector.extract_strided_slice %6 {offsets = [0, 256], sizes = [128, 256], strides = [1, 1]} : vector<128x512xf32> to vector<128x256xf32>
    %13 = vector.shape_cast %12 : vector<128x256xf32> to vector<16x8x256xf32>
    %c0_10 = arith.constant 0 : index
    %c1 = arith.constant 1 : index
    %c0_11 = arith.constant 0 : index
    %c0_12 = arith.constant 0 : index
    %14 = vector.load %arg4[%c0_10, %c1, %c0_11, %c0_12] : memref<16x2x8x256xf32, #tpu.memory_space<vmem>>, vector<16x1x8x256xf32>
    %15 = vector.shape_cast %14 : vector<16x1x8x256xf32> to vector<16x8x256xf32>
    %16 = vector.shape_cast %13 : vector<16x8x256xf32> to vector<16x1x8x256xf32>
    tpu.vector_store %arg4[%c0_10, %c1, %c0_11, %c0_12], %16 {strides = array<i32>} : memref<16x2x8x256xf32, #tpu.memory_space<vmem>>, vector<16x1x8x256xf32>,
    return
  }
  func.func @transform_0(%arg0: i32) -> (i32, i32, i32) {
    %c0_i32 = arith.constant 0 : i32
    %c0_i32_0 = arith.constant 0 : i32
    %c0_i32_1 = arith.constant 0 : i32
    return %arg0, %c0_i32, %c0_i32_0 : i32, i32, i32
  }
  func.func @transform_1(%arg0: i32) -> (i32, i32) {
    %c0_i32 = arith.constant 0 : i32
    %c0_i32_0 = arith.constant 0 : i32
    %c0_i32_1 = arith.constant 0 : i32
    return %c0_i32, %c0_i32_0 : i32, i32
  }
  func.func @transform_2(%arg0: i32) -> (i32, i32) {
    %c0_i32 = arith.constant 0 : i32
    %c0_i32_0 = arith.constant 0 : i32
    %c0_i32_1 = arith.constant 0 : i32
    return %c0_i32, %c0_i32_0 : i32, i32
  }
  func.func @transform_3(%arg0: i32) -> (i32, i32, i32, i32) {
    %c0_i32 = arith.constant 0 : i32
    %c0_i32_0 = arith.constant 0 : i32
    %c0_i32_1 = arith.constant 0 : i32
    %c0_i32_2 = arith.constant 0 : i32
    return %arg0, %c0_i32, %c0_i32_0, %c0_i32_1 : i32, i32, i32, i32
  }
}

module attributes {stable_mosaic.version = 11 : i64} {
  func.func @_bn_relu_kernel(%arg0: i32, %arg1: memref<512x128xf32, #tpu.memory_space<vmem>>, %arg2: memref<1x128xf32, #tpu.memory_space<vmem>>, %arg3: memref<1x128xf32, #tpu.memory_space<vmem>>, %arg4: memref<512x128xf32, #tpu.memory_space<vmem>>) attributes {dimension_semantics = [#tpu.dimension_semantics<parallel>], iteration_bounds = array<i64: 1>, scalar_prefetch = 0 : i64, scratch_operands = 0 : i64, tpu.core_type = #tpu.core_type<tc>, window_params = [{transform_indices = @transform_0, window_bounds = array<i64: 512, 128>}, {pipeline_mode = #tpu.pipeline_mode<synchronous>, transform_indices = @transform_1, window_bounds = array<i64: 1, 128>}, {pipeline_mode = #tpu.pipeline_mode<synchronous>, transform_indices = @transform_2, window_bounds = array<i64: 1, 128>}, {transform_indices = @transform_3, window_bounds = array<i64: 512, 128>}]} {
    %c0 = arith.constant 0 : index
    %c0_0 = arith.constant 0 : index
    %0 = vector.load %arg1[%c0, %c0_0] : memref<512x128xf32, #tpu.memory_space<vmem>>, vector<512x128xf32>
    %c0_1 = arith.constant 0 : index
    %c0_2 = arith.constant 0 : index
    %1 = vector.load %arg2[%c0_1, %c0_2] : memref<1x128xf32, #tpu.memory_space<vmem>>, vector<1x128xf32>
    %2 = vector.broadcast %1 : vector<1x128xf32> to vector<512x128xf32>
    %3 = arith.mulf %0, %2 : vector<512x128xf32>
    %c0_3 = arith.constant 0 : index
    %c0_4 = arith.constant 0 : index
    %4 = vector.load %arg3[%c0_3, %c0_4] : memref<1x128xf32, #tpu.memory_space<vmem>>, vector<1x128xf32>
    %5 = vector.broadcast %4 : vector<1x128xf32> to vector<512x128xf32>
    %6 = arith.addf %3, %5 : vector<512x128xf32>
    %cst = arith.constant 0.000000e+00 : f32
    %7 = vector.broadcast %cst : f32 to vector<512x128xf32>
    %8 = arith.maximumf %6, %7 : vector<512x128xf32>
    %c0_5 = arith.constant 0 : index
    %c0_6 = arith.constant 0 : index
    %9 = vector.load %arg4[%c0_5, %c0_6] : memref<512x128xf32, #tpu.memory_space<vmem>>, vector<512x128xf32>
    tpu.vector_store %arg4[%c0_5, %c0_6], %8 {strides = array<i32>} : memref<512x128xf32, #tpu.memory_space<vmem>>, vector<512x128xf32>,
    return
  }
  func.func @transform_0(%arg0: i32) -> (i32, i32) {
    %c0_i32 = arith.constant 0 : i32
    %c0_i32_0 = arith.constant 0 : i32
    return %arg0, %c0_i32 : i32, i32
  }
  func.func @transform_1(%arg0: i32) -> (i32, i32) {
    %c0_i32 = arith.constant 0 : i32
    %c0_i32_0 = arith.constant 0 : i32
    %c0_i32_1 = arith.constant 0 : i32
    return %c0_i32, %c0_i32_0 : i32, i32
  }
  func.func @transform_2(%arg0: i32) -> (i32, i32) {
    %c0_i32 = arith.constant 0 : i32
    %c0_i32_0 = arith.constant 0 : i32
    %c0_i32_1 = arith.constant 0 : i32
    return %c0_i32, %c0_i32_0 : i32, i32
  }
  func.func @transform_3(%arg0: i32) -> (i32, i32) {
    %c0_i32 = arith.constant 0 : i32
    %c0_i32_0 = arith.constant 0 : i32
    return %arg0, %c0_i32 : i32, i32
  }
}

module attributes {stable_mosaic.version = 11 : i64} {
  func.func @_conv3x3_stats_kernel(%arg0: i32, %arg1: memref<1x18x18x128xf32, #tpu.memory_space<vmem>>, %arg2: memref<9x128x128xf32, #tpu.memory_space<vmem>>, %arg3: memref<1x128xf32, #tpu.memory_space<vmem>>, %arg4: memref<1x256x128xf32, #tpu.memory_space<vmem>>, %arg5: memref<1x128xf32, #tpu.memory_space<vmem>>, %arg6: memref<1x128xf32, #tpu.memory_space<vmem>>) attributes {dimension_semantics = [#tpu.dimension_semantics<arbitrary>], iteration_bounds = array<i64: 2>, scalar_prefetch = 0 : i64, scratch_operands = 0 : i64, tpu.core_type = #tpu.core_type<tc>, window_params = [{transform_indices = @transform_0, window_bounds = array<i64: 1, 18, 18, 128>}, {pipeline_mode = #tpu.pipeline_mode<synchronous>, transform_indices = @transform_1, window_bounds = array<i64: 9, 128, 128>}, {pipeline_mode = #tpu.pipeline_mode<synchronous>, transform_indices = @transform_2, window_bounds = array<i64: 1, 128>}, {transform_indices = @transform_3, window_bounds = array<i64: 1, 256, 128>}, {pipeline_mode = #tpu.pipeline_mode<synchronous>, transform_indices = @transform_4, window_bounds = array<i64: 1, 128>}, {pipeline_mode = #tpu.pipeline_mode<synchronous>, transform_indices = @transform_5, window_bounds = array<i64: 1, 128>}]} {
    %c0 = arith.constant 0 : index
    %c0_0 = arith.constant 0 : index
    %c0_1 = arith.constant 0 : index
    %c0_2 = arith.constant 0 : index
    %0 = vector.load %arg1[%c0, %c0_0, %c0_1, %c0_2] : memref<1x18x18x128xf32, #tpu.memory_space<vmem>>, vector<1x18x18x128xf32>
    %1 = vector.shape_cast %0 : vector<1x18x18x128xf32> to vector<18x18x128xf32>
    %cst = arith.constant 0.000000e+00 : f32
    %2 = vector.broadcast %cst : f32 to vector<256x128xf32>
    %3 = vector.extract_strided_slice %1 {offsets = [0, 0, 0], sizes = [16, 16, 128], strides = [1, 1, 1]} : vector<18x18x128xf32> to vector<16x16x128xf32>
    %4 = vector.shape_cast %3 : vector<16x16x128xf32> to vector<256x128xf32>
    %c0_3 = arith.constant 0 : index
    %c0_4 = arith.constant 0 : index
    %c0_5 = arith.constant 0 : index
    %5 = vector.load %arg2[%c0_3, %c0_4, %c0_5] : memref<9x128x128xf32, #tpu.memory_space<vmem>>, vector<1x128x128xf32>
    %6 = vector.shape_cast %5 : vector<1x128x128xf32> to vector<128x128xf32>
    %cst_6 = arith.constant dense<0.000000e+00> : vector<256x128xf32>
    %7 = tpu.matmul %4, %6, %cst_6 {dimension_numbers = #tpu.dot_dimension_numbers<[1], [0], [0], [1], [0, 0, 1, 1], [], []>} : vector<256x128xf32>, vector<128x128xf32>, vector<256x128xf32> -> vector<256x128xf32>
    %8 = arith.addf %2, %7 : vector<256x128xf32>
    %9 = vector.extract_strided_slice %1 {offsets = [0, 1, 0], sizes = [16, 16, 128], strides = [1, 1, 1]} : vector<18x18x128xf32> to vector<16x16x128xf32>
    %10 = vector.shape_cast %9 : vector<16x16x128xf32> to vector<256x128xf32>
    %c1 = arith.constant 1 : index
    %c0_7 = arith.constant 0 : index
    %c0_8 = arith.constant 0 : index
    %11 = vector.load %arg2[%c1, %c0_7, %c0_8] : memref<9x128x128xf32, #tpu.memory_space<vmem>>, vector<1x128x128xf32>
    %12 = vector.shape_cast %11 : vector<1x128x128xf32> to vector<128x128xf32>
    %cst_9 = arith.constant dense<0.000000e+00> : vector<256x128xf32>
    %13 = tpu.matmul %10, %12, %cst_9 {dimension_numbers = #tpu.dot_dimension_numbers<[1], [0], [0], [1], [0, 0, 1, 1], [], []>} : vector<256x128xf32>, vector<128x128xf32>, vector<256x128xf32> -> vector<256x128xf32>
    %14 = arith.addf %8, %13 : vector<256x128xf32>
    %15 = vector.extract_strided_slice %1 {offsets = [0, 2, 0], sizes = [16, 16, 128], strides = [1, 1, 1]} : vector<18x18x128xf32> to vector<16x16x128xf32>
    %16 = vector.shape_cast %15 : vector<16x16x128xf32> to vector<256x128xf32>
    %c2 = arith.constant 2 : index
    %c0_10 = arith.constant 0 : index
    %c0_11 = arith.constant 0 : index
    %17 = vector.load %arg2[%c2, %c0_10, %c0_11] : memref<9x128x128xf32, #tpu.memory_space<vmem>>, vector<1x128x128xf32>
    %18 = vector.shape_cast %17 : vector<1x128x128xf32> to vector<128x128xf32>
    %cst_12 = arith.constant dense<0.000000e+00> : vector<256x128xf32>
    %19 = tpu.matmul %16, %18, %cst_12 {dimension_numbers = #tpu.dot_dimension_numbers<[1], [0], [0], [1], [0, 0, 1, 1], [], []>} : vector<256x128xf32>, vector<128x128xf32>, vector<256x128xf32> -> vector<256x128xf32>
    %20 = arith.addf %14, %19 : vector<256x128xf32>
    %21 = vector.extract_strided_slice %1 {offsets = [1, 0, 0], sizes = [16, 16, 128], strides = [1, 1, 1]} : vector<18x18x128xf32> to vector<16x16x128xf32>
    %22 = vector.shape_cast %21 : vector<16x16x128xf32> to vector<256x128xf32>
    %c3 = arith.constant 3 : index
    %c0_13 = arith.constant 0 : index
    %c0_14 = arith.constant 0 : index
    %23 = vector.load %arg2[%c3, %c0_13, %c0_14] : memref<9x128x128xf32, #tpu.memory_space<vmem>>, vector<1x128x128xf32>
    %24 = vector.shape_cast %23 : vector<1x128x128xf32> to vector<128x128xf32>
    %cst_15 = arith.constant dense<0.000000e+00> : vector<256x128xf32>
    %25 = tpu.matmul %22, %24, %cst_15 {dimension_numbers = #tpu.dot_dimension_numbers<[1], [0], [0], [1], [0, 0, 1, 1], [], []>} : vector<256x128xf32>, vector<128x128xf32>, vector<256x128xf32> -> vector<256x128xf32>
    %26 = arith.addf %20, %25 : vector<256x128xf32>
    %27 = vector.extract_strided_slice %1 {offsets = [1, 1, 0], sizes = [16, 16, 128], strides = [1, 1, 1]} : vector<18x18x128xf32> to vector<16x16x128xf32>
    %28 = vector.shape_cast %27 : vector<16x16x128xf32> to vector<256x128xf32>
    %c4 = arith.constant 4 : index
    %c0_16 = arith.constant 0 : index
    %c0_17 = arith.constant 0 : index
    %29 = vector.load %arg2[%c4, %c0_16, %c0_17] : memref<9x128x128xf32, #tpu.memory_space<vmem>>, vector<1x128x128xf32>
    %30 = vector.shape_cast %29 : vector<1x128x128xf32> to vector<128x128xf32>
    %cst_18 = arith.constant dense<0.000000e+00> : vector<256x128xf32>
    %31 = tpu.matmul %28, %30, %cst_18 {dimension_numbers = #tpu.dot_dimension_numbers<[1], [0], [0], [1], [0, 0, 1, 1], [], []>} : vector<256x128xf32>, vector<128x128xf32>, vector<256x128xf32> -> vector<256x128xf32>
    %32 = arith.addf %26, %31 : vector<256x128xf32>
    %33 = vector.extract_strided_slice %1 {offsets = [1, 2, 0], sizes = [16, 16, 128], strides = [1, 1, 1]} : vector<18x18x128xf32> to vector<16x16x128xf32>
    %34 = vector.shape_cast %33 : vector<16x16x128xf32> to vector<256x128xf32>
    %c5 = arith.constant 5 : index
    %c0_19 = arith.constant 0 : index
    %c0_20 = arith.constant 0 : index
    %35 = vector.load %arg2[%c5, %c0_19, %c0_20] : memref<9x128x128xf32, #tpu.memory_space<vmem>>, vector<1x128x128xf32>
    %36 = vector.shape_cast %35 : vector<1x128x128xf32> to vector<128x128xf32>
    %cst_21 = arith.constant dense<0.000000e+00> : vector<256x128xf32>
    %37 = tpu.matmul %34, %36, %cst_21 {dimension_numbers = #tpu.dot_dimension_numbers<[1], [0], [0], [1], [0, 0, 1, 1], [], []>} : vector<256x128xf32>, vector<128x128xf32>, vector<256x128xf32> -> vector<256x128xf32>
    %38 = arith.addf %32, %37 : vector<256x128xf32>
    %39 = vector.extract_strided_slice %1 {offsets = [2, 0, 0], sizes = [16, 16, 128], strides = [1, 1, 1]} : vector<18x18x128xf32> to vector<16x16x128xf32>
    %40 = vector.shape_cast %39 : vector<16x16x128xf32> to vector<256x128xf32>
    %c6 = arith.constant 6 : index
    %c0_22 = arith.constant 0 : index
    %c0_23 = arith.constant 0 : index
    %41 = vector.load %arg2[%c6, %c0_22, %c0_23] : memref<9x128x128xf32, #tpu.memory_space<vmem>>, vector<1x128x128xf32>
    %42 = vector.shape_cast %41 : vector<1x128x128xf32> to vector<128x128xf32>
    %cst_24 = arith.constant dense<0.000000e+00> : vector<256x128xf32>
    %43 = tpu.matmul %40, %42, %cst_24 {dimension_numbers = #tpu.dot_dimension_numbers<[1], [0], [0], [1], [0, 0, 1, 1], [], []>} : vector<256x128xf32>, vector<128x128xf32>, vector<256x128xf32> -> vector<256x128xf32>
    %44 = arith.addf %38, %43 : vector<256x128xf32>
    %45 = vector.extract_strided_slice %1 {offsets = [2, 1, 0], sizes = [16, 16, 128], strides = [1, 1, 1]} : vector<18x18x128xf32> to vector<16x16x128xf32>
    %46 = vector.shape_cast %45 : vector<16x16x128xf32> to vector<256x128xf32>
    %c7 = arith.constant 7 : index
    %c0_25 = arith.constant 0 : index
    %c0_26 = arith.constant 0 : index
    %47 = vector.load %arg2[%c7, %c0_25, %c0_26] : memref<9x128x128xf32, #tpu.memory_space<vmem>>, vector<1x128x128xf32>
    %48 = vector.shape_cast %47 : vector<1x128x128xf32> to vector<128x128xf32>
    %cst_27 = arith.constant dense<0.000000e+00> : vector<256x128xf32>
    %49 = tpu.matmul %46, %48, %cst_27 {dimension_numbers = #tpu.dot_dimension_numbers<[1], [0], [0], [1], [0, 0, 1, 1], [], []>} : vector<256x128xf32>, vector<128x128xf32>, vector<256x128xf32> -> vector<256x128xf32>
    %50 = arith.addf %44, %49 : vector<256x128xf32>
    %51 = vector.extract_strided_slice %1 {offsets = [2, 2, 0], sizes = [16, 16, 128], strides = [1, 1, 1]} : vector<18x18x128xf32> to vector<16x16x128xf32>
    %52 = vector.shape_cast %51 : vector<16x16x128xf32> to vector<256x128xf32>
    %c8 = arith.constant 8 : index
    %c0_28 = arith.constant 0 : index
    %c0_29 = arith.constant 0 : index
    %53 = vector.load %arg2[%c8, %c0_28, %c0_29] : memref<9x128x128xf32, #tpu.memory_space<vmem>>, vector<1x128x128xf32>
    %54 = vector.shape_cast %53 : vector<1x128x128xf32> to vector<128x128xf32>
    %cst_30 = arith.constant dense<0.000000e+00> : vector<256x128xf32>
    %55 = tpu.matmul %52, %54, %cst_30 {dimension_numbers = #tpu.dot_dimension_numbers<[1], [0], [0], [1], [0, 0, 1, 1], [], []>} : vector<256x128xf32>, vector<128x128xf32>, vector<256x128xf32> -> vector<256x128xf32>
    %56 = arith.addf %50, %55 : vector<256x128xf32>
    %c0_31 = arith.constant 0 : index
    %c0_32 = arith.constant 0 : index
    %57 = vector.load %arg3[%c0_31, %c0_32] : memref<1x128xf32, #tpu.memory_space<vmem>>, vector<1x128xf32>
    %58 = vector.broadcast %57 : vector<1x128xf32> to vector<256x128xf32>
    %59 = arith.addf %56, %58 : vector<256x128xf32>
    %c0_33 = arith.constant 0 : index
    %c0_34 = arith.constant 0 : index
    %c0_35 = arith.constant 0 : index
    %60 = vector.load %arg4[%c0_33, %c0_34, %c0_35] : memref<1x256x128xf32, #tpu.memory_space<vmem>>, vector<1x256x128xf32>
    %61 = vector.shape_cast %60 : vector<1x256x128xf32> to vector<256x128xf32>
    %62 = vector.shape_cast %59 : vector<256x128xf32> to vector<1x256x128xf32>
    tpu.vector_store %arg4[%c0_33, %c0_34, %c0_35], %62 {strides = array<i32>} : memref<1x256x128xf32, #tpu.memory_space<vmem>>, vector<1x256x128xf32>,
    %c0_i32 = arith.constant 0 : i32
    %63 = arith.cmpi eq, %arg0, %c0_i32 : i32
    %64 = arith.extui %63 : i1 to i32
    %c0_i32_36 = arith.constant 0 : i32
    %65 = arith.cmpi ne, %64, %c0_i32_36 : i32
    scf.if %65 {
      %cst_47 = arith.constant 0.000000e+00 : f32
      %77 = vector.broadcast %cst_47 : f32 to vector<1x128xf32>
      %c0_48 = arith.constant 0 : index
      %c0_49 = arith.constant 0 : index
      %78 = vector.load %arg5[%c0_48, %c0_49] : memref<1x128xf32, #tpu.memory_space<vmem>>, vector<1x128xf32>
      tpu.vector_store %arg5[%c0_48, %c0_49], %77 {strides = array<i32>} : memref<1x128xf32, #tpu.memory_space<vmem>>, vector<1x128xf32>,
      %cst_50 = arith.constant 0.000000e+00 : f32
      %79 = vector.broadcast %cst_50 : f32 to vector<1x128xf32>
      %c0_51 = arith.constant 0 : index
      %c0_52 = arith.constant 0 : index
      %80 = vector.load %arg6[%c0_51, %c0_52] : memref<1x128xf32, #tpu.memory_space<vmem>>, vector<1x128xf32>
      tpu.vector_store %arg6[%c0_51, %c0_52], %79 {strides = array<i32>} : memref<1x128xf32, #tpu.memory_space<vmem>>, vector<1x128xf32>,
    } else {
    }
    %c0_37 = arith.constant 0 : index
    %c0_38 = arith.constant 0 : index
    %66 = vector.load %arg5[%c0_37, %c0_38] : memref<1x128xf32, #tpu.memory_space<vmem>>, vector<1x128xf32>
    %cst_39 = arith.constant dense<0.000000e+00> : vector<128xf32>
    %67 = vector.multi_reduction <add>, %59, %cst_39 [0] : vector<256x128xf32> to vector<128xf32>
    %68 = vector.shape_cast %67 : vector<128xf32> to vector<1x128xf32>
    %69 = arith.addf %66, %68 : vector<1x128xf32>
    %c0_40 = arith.constant 0 : index
    %c0_41 = arith.constant 0 : index
    %70 = vector.load %arg5[%c0_40, %c0_41] : memref<1x128xf32, #tpu.memory_space<vmem>>, vector<1x128xf32>
    tpu.vector_store %arg5[%c0_40, %c0_41], %69 {strides = array<i32>} : memref<1x128xf32, #tpu.memory_space<vmem>>, vector<1x128xf32>,
    %c0_42 = arith.constant 0 : index
    %c0_43 = arith.constant 0 : index
    %71 = vector.load %arg6[%c0_42, %c0_43] : memref<1x128xf32, #tpu.memory_space<vmem>>, vector<1x128xf32>
    %72 = arith.mulf %59, %59 : vector<256x128xf32>
    %cst_44 = arith.constant dense<0.000000e+00> : vector<128xf32>
    %73 = vector.multi_reduction <add>, %72, %cst_44 [0] : vector<256x128xf32> to vector<128xf32>
    %74 = vector.shape_cast %73 : vector<128xf32> to vector<1x128xf32>
    %75 = arith.addf %71, %74 : vector<1x128xf32>
    %c0_45 = arith.constant 0 : index
    %c0_46 = arith.constant 0 : index
    %76 = vector.load %arg6[%c0_45, %c0_46] : memref<1x128xf32, #tpu.memory_space<vmem>>, vector<1x128xf32>
    tpu.vector_store %arg6[%c0_45, %c0_46], %75 {strides = array<i32>} : memref<1x128xf32, #tpu.memory_space<vmem>>, vector<1x128xf32>,
    return
  }
  func.func @transform_0(%arg0: i32) -> (i32, i32, i32, i32) {
    %c0_i32 = arith.constant 0 : i32
    %c0_i32_0 = arith.constant 0 : i32
    %c0_i32_1 = arith.constant 0 : i32
    %c0_i32_2 = arith.constant 0 : i32
    return %arg0, %c0_i32, %c0_i32_0, %c0_i32_1 : i32, i32, i32, i32
  }
  func.func @transform_1(%arg0: i32) -> (i32, i32, i32) {
    %c0_i32 = arith.constant 0 : i32
    %c0_i32_0 = arith.constant 0 : i32
    %c0_i32_1 = arith.constant 0 : i32
    %c0_i32_2 = arith.constant 0 : i32
    return %c0_i32, %c0_i32_0, %c0_i32_1 : i32, i32, i32
  }
  func.func @transform_2(%arg0: i32) -> (i32, i32) {
    %c0_i32 = arith.constant 0 : i32
    %c0_i32_0 = arith.constant 0 : i32
    %c0_i32_1 = arith.constant 0 : i32
    return %c0_i32, %c0_i32_0 : i32, i32
  }
  func.func @transform_3(%arg0: i32) -> (i32, i32, i32) {
    %c0_i32 = arith.constant 0 : i32
    %c0_i32_0 = arith.constant 0 : i32
    %c0_i32_1 = arith.constant 0 : i32
    return %arg0, %c0_i32, %c0_i32_0 : i32, i32, i32
  }
  func.func @transform_4(%arg0: i32) -> (i32, i32) {
    %c0_i32 = arith.constant 0 : i32
    %c0_i32_0 = arith.constant 0 : i32
    %c0_i32_1 = arith.constant 0 : i32
    return %c0_i32, %c0_i32_0 : i32, i32
  }
  func.func @transform_5(%arg0: i32) -> (i32, i32) {
    %c0_i32 = arith.constant 0 : i32
    %c0_i32_0 = arith.constant 0 : i32
    %c0_i32_1 = arith.constant 0 : i32
    return %c0_i32, %c0_i32_0 : i32, i32
  }
}

</mosaic_0001>

<bundles_post_ra>
// kernel: tile.8
= control target key start
LH: loop header
LB: loop body
LE: loop exit
PB: predicated region body
PF: predicated region fallthrough
CT: control target
= control target key end

     0   :  { %s22_s0 = inlined_call_operand.vmem [shape: f32[128], index: 0, kind: input, shape index: {}]   ;;  %s23_s1 = inlined_call_operand.vmem [shape: f32[4,128], index: 1, kind: output, shape index: {}]  }
   0x1   :  { %v4_v0 = vld [vmem:[%s22_s0] ss:$0 sm:$0xff] }
   0x2   :  { %5 = vst [vmem:[%s23_s1] sm:$0xf] %v4_v0 }

// kernel: unet_up_noskip_forward.7
= control target key start
LH: loop header
LB: loop body
LE: loop exit
PB: predicated region body
PF: predicated region fallthrough
CT: control target
= control target key end

     0   :  { %s896_s0 = inlined_call_operand.vmem [shape: f32[512,128], index: 0, kind: input, shape index: {}]   ;;  %s897_s1 = inlined_call_operand.vmem [shape: f32[1,128], index: 1, kind: input, shape index: {}]   ;;  %s898_s2 = inlined_call_operand.vmem [shape: f32[1,128], index: 2, kind: input, shape index: {}]   ;;  %s899_s3 = inlined_call_operand.vmem [shape: f32[512,128], index: 3, kind: output, shape index: {}]  }
   0x1   :  { %v14_v0 = vld [vmem:[%s896_s0] sm:$0xff]  ;;  %v15_v4 = vld [vmem:[%s896_s0 + $0x8] sm:$0xff]  ;;  %v16_v5 = vld [vmem:[%s896_s0 + $0x10] sm:$0xff] }
   0x2   :  { %v380_v1 = vld [vmem:[%s897_s1] ss:$0 sm:$0xff]  ;;  %v17_v6 = vld [vmem:[%s896_s0 + $0x18] sm:$0xff]  ;;  %v19_v11 = vld [vmem:[%s896_s0 + $0x28] sm:$0xff] }
   0x3   :  { %v385_v2 = vld [vmem:[%s898_s2] ss:$0 sm:$0xff]  ;;  %v85_v3 = vmul.f32 %v380_v1, %v14_v0  ;;  %v86_v7 = vmul.f32 %v380_v1, %v15_v4  ;;  %v87_v8 = vmul.f32 %v380_v1, %v16_v5  ;;  %v88_v9 = vmul.f32 %v380_v1, %v17_v6  ;;  %v20_v12 = vld [vmem:[%s896_s0 + $0x30] sm:$0xff]  ;;  %v21_v17 = vld [vmem:[%s896_s0 + $0x38] sm:$0xff] }
   0x4   :  { %v18_v10 = vld [vmem:[%s896_s0 + $0x20] sm:$0xff]  ;;  %v90_v15 = vmul.f32 %v380_v1, %v19_v11  ;;  %v91_v16 = vmul.f32 %v380_v1, %v20_v12  ;;  %v92_v21 = vmul.f32 %v380_v1, %v21_v17  ;;  %v23_v27 = vld [vmem:[%s896_s0 + $0x48] sm:$0xff]  ;;  %v24_v28 = vld [vmem:[%s896_s0 + $0x50] sm:$0xff] }
   0x5   :  { %v156_v13 = vadd.f32 %v385_v2, %v85_v3  ;;  %v89_v14 = vmul.f32 %v380_v1, %v18_v10  ;;  %v157_v18 = vadd.f32 %v385_v2, %v86_v7  ;;  %v158_v19 = vadd.f32 %v385_v2, %v87_v8  ;;  %v22_v22 = vld [vmem:[%s896_s0 + $0x40] sm:$0xff]  ;;  %v25_v29 = vld [vmem:[%s896_s0 + $0x58] sm:$0xff]  ;;  %v27_v35 = vld [vmem:[%s896_s0 + $0x68] sm:$0xff] }
   0x6   :  { %v159_v20 = vadd.f32 %v385_v2, %v88_v9  ;;  %v161_v25 = vadd.f32 %v385_v2, %v90_v15  ;;  %v162_v26 = vadd.f32 %v385_v2, %v91_v16  ;;  %v163_v33 = vadd.f32 %v385_v2, %v92_v21  ;;  %v26_v34 = vld [vmem:[%s896_s0 + $0x60] sm:$0xff]  ;;  %v28_v36 = vld [vmem:[%s896_s0 + $0x70] sm:$0xff]  ;;  %v29_v41 = vld [vmem:[%s896_s0 + $0x78] sm:$0xff] }
   0x7   :  { %v220_v23 = vmax.f32 %v156_v13, 0.0  ;;  %v160_v24 = vadd.f32 %v385_v2, %v89_v14  ;;  %v221_v30 = vmax.f32 %v157_v18, 0.0  ;;  %v222_v31 = vmax.f32 %v158_v19, 0.0  ;;  %v30_v54 = vld [vmem:[%s896_s0 + $0x80] sm:$0xff]  ;;  %v31_v59 = vld [vmem:[%s896_s0 + $0x88] sm:$0xff]  ;;  %v32_v60 = vld [vmem:[%s896_s0 + $0x90] sm:$0xff] }
   0x8   :  { %v223_v32 = vmax.f32 %v159_v20, 0.0  ;;  %v225_v38 = vmax.f32 %v161_v25, 0.0  ;;  %v226_v39 = vmax.f32 %v162_v26, 0.0  ;;  %v93_v40 = vmul.f32 %v380_v1, %v22_v22  ;;  %v33_v61 = vld [vmem:[%s896_s0 + $0x98] sm:$0xff]  ;;  %v34_v4 = vld [vmem:[%s896_s0 + $0xa0] sm:$0xff]  ;;  %v35_v5 = vld [vmem:[%s896_s0 + $0xa8] sm:$0xff] }
   0x9   :  { %284 = vst [vmem:[%s899_s3] sm:$0xff] %v220_v23  ;;  %v224_v37 = vmax.f32 %v160_v24, 0.0  ;;  %285 = vst [vmem:[%s899_s3 + $0x8] sm:$0xff] %v221_v30  ;;  %v227_v42 = vmax.f32 %v163_v33, 0.0  ;;  %v94_v43 = vmul.f32 %v380_v1, %v23_v27  ;;  %v95_v44 = vmul.f32 %v380_v1, %v24_v28  ;;  %v36_v6 = vld [vmem:[%s896_s0 + $0xb0] sm:$0xff]  ;;  %v37_v11 = vld [vmem:[%s896_s0 + $0xb8] sm:$0xff] }
   0xa   :  { %286 = vst [vmem:[%s899_s3 + $0x10] sm:$0xff] %v222_v31  ;;  %287 = vst [vmem:[%s899_s3 + $0x18] sm:$0xff] %v223_v32  ;;  %v96_v45 = vmul.f32 %v380_v1, %v25_v29  ;;  %v164_v46 = vadd.f32 %v385_v2, %v93_v40  ;;  %v97_v47 = vmul.f32 %v380_v1, %v26_v34  ;;  %v38_v24 = vld [vmem:[%s896_s0 + $0xc0] sm:$0xff]  ;;  %v39_v29 = vld [vmem:[%s896_s0 + $0xc8] sm:$0xff] }
   0xb   :  { %288 = vst [vmem:[%s899_s3 + $0x20] sm:$0xff] %v224_v37  ;;  %289 = vst [vmem:[%s899_s3 + $0x28] sm:$0xff] %v225_v38  ;;  %v98_v48 = vmul.f32 %v380_v1, %v27_v35  ;;  %v99_v49 = vmul.f32 %v380_v1, %v28_v36  ;;  %v165_v50 = vadd.f32 %v385_v2, %v94_v43  ;;  %v40_v30 = vld [vmem:[%s896_s0 + $0xd0] sm:$0xff]  ;;  %v41_v31 = vld [vmem:[%s896_s0 + $0xd8] sm:$0xff] }
   0xc   :  { %290 = vst [vmem:[%s899_s3 + $0x30] sm:$0xff] %v226_v39  ;;  %291 = vst [vmem:[%s899_s3 + $0x38] sm:$0xff] %v227_v42  ;;  %v166_v51 = vadd.f32 %v385_v2, %v95_v44  ;;  %v167_v52 = vadd.f32 %v385_v2, %v96_v45  ;;  %v100_v53 = vmul.f32 %v380_v1, %v29_v41  ;;  %v228_v55 = vmax.f32 %v164_v46, 0.0  ;;  %v42_v36 = vld [vmem:[%s896_s0 + $0xe0] sm:$0xff]  ;;  %v43_v37 = vld [vmem:[%s896_s0 + $0xe8] sm:$0xff] }
   0xd   :  { %v168_v56 = vadd.f32 %v385_v2, %v97_v47  ;;  %v169_v57 = vadd.f32 %v385_v2, %v98_v48  ;;  %v170_v58 = vadd.f32 %v385_v2, %v99_v49  ;;  %v229_v62 = vmax.f32 %v165_v50, 0.0  ;;  %v44_v38 = vld [vmem:[%s896_s0 + $0xf0] sm:$0xff]  ;;  %v45_v43 = vld [vmem:[%s896_s0 + $0xf8] sm:$0xff] }
   0xe   :  { %v230_v63 = vmax.f32 %v166_v51, 0.0  ;;  %v231_v0 = vmax.f32 %v167_v52, 0.0  ;;  %v171_v3 = vadd.f32 %v385_v2, %v100_v53  ;;  %292 = vst [vmem:[%s899_s3 + $0x40] sm:$0xff] %v228_v55  ;;  %v101_v10 = vmul.f32 %v380_v1, %v30_v54 }
   0xf   :  { %v232_v7 = vmax.f32 %v168_v56, 0.0  ;;  %v233_v8 = vmax.f32 %v169_v57, 0.0  ;;  %v234_v9 = vmax.f32 %v170_v58, 0.0  ;;  %293 = vst [vmem:[%s899_s3 + $0x48] sm:$0xff] %v229_v62  ;;  %v102_v13 = vmul.f32 %v380_v1, %v31_v59  ;;  %v46_v56 = vld [vmem:[%s896_s0 + $0x100] sm:$0xff]  ;;  %v48_v62 = vld [vmem:[%s896_s0 + $0x110] sm:$0xff] }
  0x10   :  { %294 = vst [vmem:[%s899_s3 + $0x50] sm:$0xff] %v230_v63  ;;  %295 = vst [vmem:[%s899_s3 + $0x58] sm:$0xff] %v231_v0  ;;  %v235_v12 = vmax.f32 %v171_v3, 0.0  ;;  %v103_v14 = vmul.f32 %v380_v1, %v32_v60  ;;  %v104_v15 = vmul.f32 %v380_v1, %v33_v61  ;;  %v172_v16 = vadd.f32 %v385_v2, %v101_v10  ;;  %v47_v61 = vld [vmem:[%s896_s0 + $0x108] sm:$0xff]  ;;  %v49_v63 = vld [vmem:[%s896_s0 + $0x118] sm:$0xff] }
  0x11   :  { %296 = vst [vmem:[%s899_s3 + $0x60] sm:$0xff] %v232_v7  ;;  %297 = vst [vmem:[%s899_s3 + $0x68] sm:$0xff] %v233_v8  ;;  %v105_v17 = vmul.f32 %v380_v1, %v34_v4  ;;  %v106_v18 = vmul.f32 %v380_v1, %v35_v5  ;;  %v107_v19 = vmul.f32 %v380_v1, %v36_v6  ;;  %v50_v6 = vld [vmem:[%s896_s0 + $0x120] sm:$0xff]  ;;  %v51_v7 = vld [vmem:[%s896_s0 + $0x128] sm:$0xff] }
  0x12   :  { %298 = vst [vmem:[%s899_s3 + $0x70] sm:$0xff] %v234_v9  ;;  %299 = vst [vmem:[%s899_s3 + $0x78] sm:$0xff] %v235_v12  ;;  %v173_v20 = vadd.f32 %v385_v2, %v102_v13  ;;  %v174_v21 = vadd.f32 %v385_v2, %v103_v14  ;;  %v175_v22 = vadd.f32 %v385_v2, %v104_v15  ;;  %v236_v25 = vmax.f32 %v172_v16, 0.0  ;;  %v52_v8 = vld [vmem:[%s896_s0 + $0x130] sm:$0xff]  ;;  %v53_v13 = vld [vmem:[%s896_s0 + $0x138] sm:$0xff] }
  0x13   :  { %v108_v23 = vmul.f32 %v380_v1, %v37_v11  ;;  %v176_v26 = vadd.f32 %v385_v2, %v105_v17  ;;  %v177_v27 = vadd.f32 %v385_v2, %v106_v18  ;;  %v178_v28 = vadd.f32 %v385_v2, %v107_v19 }
  0x14   :  { %v237_v32 = vmax.f32 %v173_v20, 0.0  ;;  %v238_v33 = vmax.f32 %v174_v21, 0.0  ;;  %v239_v34 = vmax.f32 %v175_v22, 0.0  ;;  %300 = vst [vmem:[%s899_s3 + $0x80] sm:$0xff] %v236_v25  ;;  %v109_v42 = vmul.f32 %v380_v1, %v38_v24 }
  0x15   :  { %v179_v35 = vadd.f32 %v385_v2, %v108_v23  ;;  %v240_v39 = vmax.f32 %v176_v26, 0.0  ;;  %v241_v40 = vmax.f32 %v177_v27, 0.0  ;;  %v242_v41 = vmax.f32 %v178_v28, 0.0  ;;  %v54_v26 = vld [vmem:[%s896_s0 + $0x140] sm:$0xff] }
  0x16   :  { %301 = vst [vmem:[%s899_s3 + $0x88] sm:$0xff] %v237_v32  ;;  %302 = vst [vmem:[%s899_s3 + $0x90] sm:$0xff] %v238_v33  ;;  %v110_v45 = vmul.f32 %v380_v1, %v39_v29  ;;  %v111_v46 = vmul.f32 %v380_v1, %v40_v30  ;;  %v112_v47 = vmul.f32 %v380_v1, %v41_v31  ;;  %v55_v31 = vld [vmem:[%s896_s0 + $0x148] sm:$0xff]  ;;  %v56_v32 = vld [vmem:[%s896_s0 + $0x150] sm:$0xff] }
  0x17   :  { %303 = vst [vmem:[%s899_s3 + $0x98] sm:$0xff] %v239_v34  ;;  %v243_v44 = vmax.f32 %v179_v35, 0.0  ;;  %304 = vst [vmem:[%s899_s3 + $0xa0] sm:$0xff] %v240_v39  ;;  %v180_v48 = vadd.f32 %v385_v2, %v109_v42  ;;  %v113_v49 = vmul.f32 %v380_v1, %v42_v36  ;;  %v114_v50 = vmul.f32 %v380_v1, %v43_v37  ;;  %v57_v33 = vld [vmem:[%s896_s0 + $0x158] sm:$0xff]  ;;  %v59_v39 = vld [vmem:[%s896_s0 + $0x168] sm:$0xff] }
  0x18   :  { %305 = vst [vmem:[%s899_s3 + $0xa8] sm:$0xff] %v241_v40  ;;  %306 = vst [vmem:[%s899_s3 + $0xb0] sm:$0xff] %v242_v41  ;;  %v115_v51 = vmul.f32 %v380_v1, %v44_v38  ;;  %v181_v52 = vadd.f32 %v385_v2, %v110_v45  ;;  %v182_v53 = vadd.f32 %v385_v2, %v111_v46  ;;  %v58_v38 = vld [vmem:[%s896_s0 + $0x160] sm:$0xff]  ;;  %v60_v40 = vld [vmem:[%s896_s0 + $0x170] sm:$0xff] }
  0x19   :  { %307 = vst [vmem:[%s899_s3 + $0xb8] sm:$0xff] %v243_v44  ;;  %v183_v54 = vadd.f32 %v385_v2, %v112_v47  ;;  %v116_v55 = vmul.f32 %v380_v1, %v45_v43  ;;  %v244_v57 = vmax.f32 %v180_v48, 0.0  ;;  %v184_v58 = vadd.f32 %v385_v2, %v113_v49  ;;  %v61_v45 = vld [vmem:[%s896_s0 + $0x178] sm:$0xff] }
  0x1a   :  { %v185_v59 = vadd.f32 %v385_v2, %v114_v50  ;;  %v186_v60 = vadd.f32 %v385_v2, %v115_v51  ;;  %v245_v0 = vmax.f32 %v181_v52, 0.0  ;;  %v246_v3 = vmax.f32 %v182_v53, 0.0 }
  0x1b   :  { %v247_v4 = vmax.f32 %v183_v54, 0.0  ;;  %v187_v5 = vadd.f32 %v385_v2, %v116_v55  ;;  %308 = vst [vmem:[%s899_s3 + $0xc0] sm:$0xff] %v244_v57  ;;  %v248_v9 = vmax.f32 %v184_v58, 0.0  ;;  %v117_v12 = vmul.f32 %v380_v1, %v46_v56  ;;  %v62_v58 = vld [vmem:[%s896_s0 + $0x180] sm:$0xff] }
  0x1c   :  { %v249_v10 = vmax.f32 %v185_v59, 0.0  ;;  %v250_v11 = vmax.f32 %v186_v60, 0.0  ;;  %309 = vst [vmem:[%s899_s3 + $0xc8] sm:$0xff] %v245_v0  ;;  %310 = vst [vmem:[%s899_s3 + $0xd0] sm:$0xff] %v246_v3  ;;  %v118_v15 = vmul.f32 %v380_v1, %v47_v61  ;;  %v119_v16 = vmul.f32 %v380_v1, %v48_v62  ;;  %v64_v0 = vld [vmem:[%s896_s0 + $0x190] sm:$0xff]  ;;  %v65_v3 = vld [vmem:[%s896_s0 + $0x198] sm:$0xff] }
  0x1d   :  { %311 = vst [vmem:[%s899_s3 + $0xd8] sm:$0xff] %v247_v4  ;;  %v251_v14 = vmax.f32 %v187_v5, 0.0  ;;  %v120_v17 = vmul.f32 %v380_v1, %v49_v63  ;;  %312 = vst [vmem:[%s899_s3 + $0xe0] sm:$0xff] %v248_v9  ;;  %v188_v18 = vadd.f32 %v385_v2, %v117_v12  ;;  %v121_v19 = vmul.f32 %v380_v1, %v50_v6  ;;  %v63_v63 = vld [vmem:[%s896_s0 + $0x188] sm:$0xff] }
  0x1e   :  { %313 = vst [vmem:[%s899_s3 + $0xe8] sm:$0xff] %v249_v10  ;;  %314 = vst [vmem:[%s899_s3 + $0xf0] sm:$0xff] %v250_v11  ;;  %v122_v20 = vmul.f32 %v380_v1, %v51_v7  ;;  %v123_v21 = vmul.f32 %v380_v1, %v52_v8  ;;  %v189_v22 = vadd.f32 %v385_v2, %v118_v15  ;;  %v66_v8 = vld [vmem:[%s896_s0 + $0x1a0] sm:$0xff]  ;;  %v67_v9 = vld [vmem:[%s896_s0 + $0x1a8] sm:$0xff] }
  0x1f   :  { %315 = vst [vmem:[%s899_s3 + $0xf8] sm:$0xff] %v251_v14  ;;  %v190_v23 = vadd.f32 %v385_v2, %v119_v16  ;;  %v191_v24 = vadd.f32 %v385_v2, %v120_v17  ;;  %v124_v25 = vmul.f32 %v380_v1, %v53_v13  ;;  %v252_v27 = vmax.f32 %v188_v18, 0.0  ;;  %v68_v10 = vld [vmem:[%s896_s0 + $0x1b0] sm:$0xff]  ;;  %v69_v15 = vld [vmem:[%s896_s0 + $0x1b8] sm:$0xff] }
  0x20   :  { %v192_v28 = vadd.f32 %v385_v2, %v121_v19  ;;  %v193_v29 = vadd.f32 %v385_v2, %v122_v20  ;;  %v194_v30 = vadd.f32 %v385_v2, %v123_v21  ;;  %v253_v34 = vmax.f32 %v189_v22, 0.0 }
  0x21   :  { %v254_v35 = vmax.f32 %v190_v23, 0.0  ;;  %v255_v36 = vmax.f32 %v191_v24, 0.0  ;;  %v195_v37 = vadd.f32 %v385_v2, %v124_v25  ;;  %316 = vst [vmem:[%s899_s3 + $0x100] sm:$0xff] %v252_v27  ;;  %v125_v44 = vmul.f32 %v380_v1, %v54_v26 }
  0x22   :  { %v256_v41 = vmax.f32 %v192_v28, 0.0  ;;  %v257_v42 = vmax.f32 %v193_v29, 0.0  ;;  %v258_v43 = vmax.f32 %v194_v30, 0.0  ;;  %317 = vst [vmem:[%s899_s3 + $0x108] sm:$0xff] %v253_v34  ;;  %v126_v47 = vmul.f32 %v380_v1, %v55_v31  ;;  %v70_v28 = vld [vmem:[%s896_s0 + $0x1c0] sm:$0xff]  ;;  %v72_v34 = vld [vmem:[%s896_s0 + $0x1d0] sm:$0xff] }
  0x23   :  { %318 = vst [vmem:[%s899_s3 + $0x110] sm:$0xff] %v254_v35  ;;  %319 = vst [vmem:[%s899_s3 + $0x118] sm:$0xff] %v255_v36  ;;  %v259_v46 = vmax.f32 %v195_v37, 0.0  ;;  %v127_v48 = vmul.f32 %v380_v1, %v56_v32  ;;  %v128_v49 = vmul.f32 %v380_v1, %v57_v33  ;;  %v196_v50 = vadd.f32 %v385_v2, %v125_v44  ;;  %v71_v33 = vld [vmem:[%s896_s0 + $0x1c8] sm:$0xff]  ;;  %v73_v35 = vld [vmem:[%s896_s0 + $0x1d8] sm:$0xff] }
  0x24   :  { %320 = vst [vmem:[%s899_s3 + $0x120] sm:$0xff] %v256_v41  ;;  %321 = vst [vmem:[%s899_s3 + $0x128] sm:$0xff] %v257_v42  ;;  %v129_v51 = vmul.f32 %v380_v1, %v58_v38  ;;  %v130_v52 = vmul.f32 %v380_v1, %v59_v39  ;;  %v131_v53 = vmul.f32 %v380_v1, %v60_v40  ;;  %v74_v40 = vld [vmem:[%s896_s0 + $0x1e0] sm:$0xff]  ;;  %v75_v41 = vld [vmem:[%s896_s0 + $0x1e8] sm:$0xff] }
  0x25   :  { %322 = vst [vmem:[%s899_s3 + $0x130] sm:$0xff] %v258_v43  ;;  %323 = vst [vmem:[%s899_s3 + $0x138] sm:$0xff] %v259_v46  ;;  %v197_v54 = vadd.f32 %v385_v2, %v126_v47  ;;  %v198_v55 = vadd.f32 %v385_v2, %v127_v48  ;;  %v199_v56 = vadd.f32 %v385_v2, %v128_v49  ;;  %v260_v59 = vmax.f32 %v196_v50, 0.0  ;;  %v76_v42 = vld [vmem:[%s896_s0 + $0x1f0] sm:$0xff]  ;;  %v77_v47 = vld [vmem:[%s896_s0 + $0x1f8] sm:$0xff] }
  0x26   :  { %v132_v57 = vmul.f32 %v380_v1, %v61_v45  ;;  %v200_v60 = vadd.f32 %v385_v2, %v129_v51  ;;  %v201_v61 = vadd.f32 %v385_v2, %v130_v52  ;;  %v202_v62 = vadd.f32 %v385_v2, %v131_v53 }
  0x27   :  { %v261_v4 = vmax.f32 %v197_v54, 0.0  ;;  %v262_v5 = vmax.f32 %v198_v55, 0.0  ;;  %v263_v6 = vmax.f32 %v199_v56, 0.0  ;;  %324 = vst [vmem:[%s899_s3 + $0x140] sm:$0xff] %v260_v59  ;;  %v133_v14 = vmul.f32 %v380_v1, %v62_v58 }
  0x28   :  { %v203_v7 = vadd.f32 %v385_v2, %v132_v57  ;;  %v264_v11 = vmax.f32 %v200_v60, 0.0  ;;  %v265_v12 = vmax.f32 %v201_v61, 0.0  ;;  %v266_v13 = vmax.f32 %v202_v62, 0.0 }
  0x29   :  { %325 = vst [vmem:[%s899_s3 + $0x148] sm:$0xff] %v261_v4  ;;  %326 = vst [vmem:[%s899_s3 + $0x150] sm:$0xff] %v262_v5  ;;  %v134_v17 = vmul.f32 %v380_v1, %v63_v63  ;;  %v135_v18 = vmul.f32 %v380_v1, %v64_v0  ;;  %v136_v19 = vmul.f32 %v380_v1, %v65_v3 }
  0x2a   :  { %327 = vst [vmem:[%s899_s3 + $0x158] sm:$0xff] %v263_v6  ;;  %v267_v16 = vmax.f32 %v203_v7, 0.0  ;;  %328 = vst [vmem:[%s899_s3 + $0x160] sm:$0xff] %v264_v11  ;;  %v204_v20 = vadd.f32 %v385_v2, %v133_v14  ;;  %v137_v21 = vmul.f32 %v380_v1, %v66_v8  ;;  %v138_v22 = vmul.f32 %v380_v1, %v67_v9 }
  0x2b   :  { %329 = vst [vmem:[%s899_s3 + $0x168] sm:$0xff] %v265_v12  ;;  %330 = vst [vmem:[%s899_s3 + $0x170] sm:$0xff] %v266_v13  ;;  %v139_v23 = vmul.f32 %v380_v1, %v68_v10  ;;  %v205_v24 = vadd.f32 %v385_v2, %v134_v17  ;;  %v206_v25 = vadd.f32 %v385_v2, %v135_v18 }
  0x2c   :  { %331 = vst [vmem:[%s899_s3 + $0x178] sm:$0xff] %v267_v16  ;;  %v207_v26 = vadd.f32 %v385_v2, %v136_v19  ;;  %v140_v27 = vmul.f32 %v380_v1, %v69_v15  ;;  %v268_v29 = vmax.f32 %v204_v20, 0.0  ;;  %v208_v30 = vadd.f32 %v385_v2, %v137_v21 }
  0x2d   :  { %v209_v31 = vadd.f32 %v385_v2, %v138_v22  ;;  %v210_v32 = vadd.f32 %v385_v2, %v139_v23  ;;  %v269_v36 = vmax.f32 %v205_v24, 0.0  ;;  %v270_v37 = vmax.f32 %v206_v25, 0.0 }
  0x2e   :  { %v271_v38 = vmax.f32 %v207_v26, 0.0  ;;  %v211_v39 = vadd.f32 %v385_v2, %v140_v27  ;;  %332 = vst [vmem:[%s899_s3 + $0x180] sm:$0xff] %v268_v29  ;;  %v272_v43 = vmax.f32 %v208_v30, 0.0  ;;  %v141_v46 = vmul.f32 %v380_v1, %v70_v28 }
  0x2f   :  { %v273_v44 = vmax.f32 %v209_v31, 0.0  ;;  %v274_v45 = vmax.f32 %v210_v32, 0.0  ;;  %333 = vst [vmem:[%s899_s3 + $0x188] sm:$0xff] %v269_v36  ;;  %334 = vst [vmem:[%s899_s3 + $0x190] sm:$0xff] %v270_v37  ;;  %v142_v49 = vmul.f32 %v380_v1, %v71_v33  ;;  %v143_v50 = vmul.f32 %v380_v1, %v72_v34 }
  0x30   :  { %335 = vst [vmem:[%s899_s3 + $0x198] sm:$0xff] %v271_v38  ;;  %v275_v48 = vmax.f32 %v211_v39, 0.0  ;;  %v144_v51 = vmul.f32 %v380_v1, %v73_v35  ;;  %336 = vst [vmem:[%s899_s3 + $0x1a0] sm:$0xff] %v272_v43  ;;  %v212_v52 = vadd.f32 %v385_v2, %v141_v46  ;;  %v145_v53 = vmul.f32 %v380_v1, %v74_v40 }
  0x31   :  { %337 = vst [vmem:[%s899_s3 + $0x1a8] sm:$0xff] %v273_v44  ;;  %338 = vst [vmem:[%s899_s3 + $0x1b0] sm:$0xff] %v274_v45  ;;  %v146_v54 = vmul.f32 %v380_v1, %v75_v41  ;;  %v147_v55 = vmul.f32 %v380_v1, %v76_v42  ;;  %v213_v56 = vadd.f32 %v385_v2, %v142_v49 }
  0x32   :  { %339 = vst [vmem:[%s899_s3 + $0x1b8] sm:$0xff] %v275_v48  ;;  %v214_v57 = vadd.f32 %v385_v2, %v143_v50  ;;  %v215_v58 = vadd.f32 %v385_v2, %v144_v51  ;;  %v148_v59 = vmul.f32 %v380_v1, %v77_v47  ;;  %v276_v60 = vmax.f32 %v212_v52, 0.0 }
  0x33   :  { %v216_v61 = vadd.f32 %v385_v2, %v145_v53  ;;  %v217_v62 = vadd.f32 %v385_v2, %v146_v54  ;;  %v218_v63 = vadd.f32 %v385_v2, %v147_v55  ;;  %v277_v0 = vmax.f32 %v213_v56, 0.0 }
  0x34   :  { %v278_v3 = vmax.f32 %v214_v57, 0.0  ;;  %v279_v4 = vmax.f32 %v215_v58, 0.0  ;;  %v219_v5 = vadd.f32 %v385_v2, %v148_v59  ;;  %340 = vst [vmem:[%s899_s3 + $0x1c0] sm:$0xff] %v276_v60 }
  0x35   :  { %v280_v6 = vmax.f32 %v216_v61, 0.0  ;;  %v281_v7 = vmax.f32 %v217_v62, 0.0  ;;  %v282_v8 = vmax.f32 %v218_v63, 0.0  ;;  %341 = vst [vmem:[%s899_s3 + $0x1c8] sm:$0xff] %v277_v0 }
  0x36   :  { %342 = vst [vmem:[%s899_s3 + $0x1d0] sm:$0xff] %v278_v3  ;;  %343 = vst [vmem:[%s899_s3 + $0x1d8] sm:$0xff] %v279_v4  ;;  %v283_v1 = vmax.f32 %v219_v5, 0.0 }
  0x37   :  { %344 = vst [vmem:[%s899_s3 + $0x1e0] sm:$0xff] %v280_v6  ;;  %345 = vst [vmem:[%s899_s3 + $0x1e8] sm:$0xff] %v281_v7 }
  0x38   :  { %346 = vst [vmem:[%s899_s3 + $0x1f0] sm:$0xff] %v282_v8  ;;  %347 = vst [vmem:[%s899_s3 + $0x1f8] sm:$0xff] %v283_v1 }

// kernel: unet_up_noskip_forward.5
= control target key start
LH: loop header
LB: loop body
LE: loop exit
PB: predicated region body
PF: predicated region fallthrough
CT: control target
= control target key end

     0   :  { %v561_v3 = vmov 0.0   ;;  %vm56_vm0 = vcmask 64512   ;;  %v36_v21 = vlaneseq  ;;  %s973_s1 = inlined_call_operand.vmem [shape: f32[8,512], index: 1, kind: input, shape index: {}]   ;;  %s974_s0 = inlined_call_operand.vmem [shape: f32[16,8,8], index: 0, kind: input, shape index: {}]   ;;  %s975_s2 = inlined_call_operand.vmem [shape: f32[1,512], index: 2, kind: input, shape index: {}]   ;;  %s976_s3 = inlined_call_operand.vmem [shape: f32[16,2,8,256], index: 3, kind: output, shape index: {}]  }
   0x1   :  { %v31_v0 = vld [vmem:[%s973_s1 + $0x8] sm:$0xff]  ;;  %v33_v1 = vld [vmem:[%s973_s1 + $0x18] sm:$0xff]  ;;  %v30_v2 = vld [vmem:[%s973_s1] sm:$0xff]  ;;  %169 = vmatprep.mubr.f32.mxu0 %v561_v3  ;;  %330 = vmatprep.mubr.f32.mxu1 %v561_v3 }
   0x2   :  { %135 = vmatprep.subr.mxu0 %v31_v0  ;;  %296 = vmatprep.subr.mxu1 %v33_v1  ;;  %v32_v4 = vld [vmem:[%s973_s1 + $0x10] sm:$0xff]  ;;  %v14_v5 = vld [vmem:[%s974_s0] sm:$0xff]  ;;  %v15_v6 = vld [vmem:[%s974_s0 + $0x8] sm:$0xff]  ;;  %v37_v22 = vshrl.u32 %v36_v21, 7 }
   0x3   :  { %136 = vmatpush1.msra.mxu0 %v30_v2  ;;  %297 = vmatpush1.msra.mxu1 %v32_v4  ;;  %v16_v7 = vld [vmem:[%s974_s0 + $0x10] sm:$0xff]  ;;  %v17_v8 = vld [vmem:[%s974_s0 + $0x18] sm:$0xff]  ;;  %v18_v9 = vld [vmem:[%s974_s0 + $0x20] sm:$0xff] }
   0x4   :  { %496 = vmatmul.mubr.msk.f32.vlgmr.msra.gmra.mxu0 %vm56_vm0, %v14_v5  ;;  %512 = vmatmul.mubr.msk.f32.vlgmr.msra.gmra.mxu1 %vm56_vm0, %v14_v5  ;;  %v19_v10 = vld [vmem:[%s974_s0 + $0x28] sm:$0xff]  ;;  %v20_v11 = vld [vmem:[%s974_s0 + $0x30] sm:$0xff]  ;;  %v21_v12 = vld [vmem:[%s974_s0 + $0x38] sm:$0xff]  ;;  %v38_v23 = vsub.s32 0, %v37_v22  ;;  %v46_v24 = vsub.s32 2, %v37_v22  ;;  %v42_v26 = vsub.s32 1, %v37_v22 }
   0x5   :  { %175 = vmatprep.mubr.f32.mxu0 %v561_v3  ;;  %336 = vmatprep.mubr.f32.mxu1 %v561_v3  ;;  %v22_v13 = vld [vmem:[%s974_s0 + $0x40] sm:$0xff]  ;;  %v23_v14 = vld [vmem:[%s974_s0 + $0x48] sm:$0xff]  ;;  %v24_v15 = vld [vmem:[%s974_s0 + $0x50] sm:$0xff]  ;;  %v50_v27 = vsub.s32 3, %v37_v22 }
   0x6   :  { %v25_v16 = vld [vmem:[%s974_s0 + $0x58] sm:$0xff]  ;;  %v26_v17 = vld [vmem:[%s974_s0 + $0x60] sm:$0xff]  ;;  %v27_v18 = vld [vmem:[%s974_s0 + $0x68] sm:$0xff] }
   0x7   :  { %v28_v19 = vld [vmem:[%s974_s0 + $0x70] sm:$0xff]  ;;  %v29_v20 = vld [vmem:[%s974_s0 + $0x78] sm:$0xff]  ;;  %v34_v25 = vld [vmem:[%s975_s2] sm:$0xf] }
   0x8   :  { %497 = vmatmul.mubr.msk.f32.gmra.mxu0 %vm56_vm0, %v15_v6  ;;  %513 = vmatmul.mubr.msk.f32.gmra.mxu1 %vm56_vm0, %v15_v6  ;;  %v709_v28 = vrot.slane %v34_v25, %v38_v23  ;;  %v711_v29 = vrot.slane %v34_v25, %v46_v24  ;;  %v713_v30 = vrot.slane %v34_v25, %v42_v26 }
   0x9   :  { %181 = vmatprep.mubr.f32.mxu0 %v561_v3  ;;  %342 = vmatprep.mubr.f32.mxu1 %v561_v3  ;;  %v715_v31 = vrot.slane %v34_v25, %v50_v27 }
   0xc   :  { %498 = vmatmul.mubr.msk.f32.gmra.mxu0 %vm56_vm0, %v16_v7  ;;  %514 = vmatmul.mubr.msk.f32.gmra.mxu1 %vm56_vm0, %v16_v7 }
   0xd   :  { %187 = vmatprep.mubr.f32.mxu0 %v561_v3  ;;  %348 = vmatprep.mubr.f32.mxu1 %v561_v3 }
  0x10   :  { %499 = vmatmul.mubr.msk.f32.gmra.mxu0 %vm56_vm0, %v17_v8  ;;  %515 = vmatmul.mubr.msk.f32.gmra.mxu1 %vm56_vm0, %v17_v8 }
  0x11   :  { %193 = vmatprep.mubr.f32.mxu0 %v561_v3  ;;  %354 = vmatprep.mubr.f32.mxu1 %v561_v3 }
  0x14   :  { %500 = vmatmul.mubr.msk.f32.gmra.mxu0 %vm56_vm0, %v18_v9  ;;  %516 = vmatmul.mubr.msk.f32.gmra.mxu1 %vm56_vm0, %v18_v9 }
  0x15   :  { %199 = vmatprep.mubr.f32.mxu0 %v561_v3  ;;  %360 = vmatprep.mubr.f32.mxu1 %v561_v3 }
  0x18   :  { %501 = vmatmul.mubr.msk.f32.gmra.mxu0 %vm56_vm0, %v19_v10  ;;  %517 = vmatmul.mubr.msk.f32.gmra.mxu1 %vm56_vm0, %v19_v10 }
  0x19   :  { %205 = vmatprep.mubr.f32.mxu0 %v561_v3  ;;  %366 = vmatprep.mubr.f32.mxu1 %v561_v3 }
  0x1c   :  { %502 = vmatmul.mubr.msk.f32.gmra.mxu0 %vm56_vm0, %v20_v11  ;;  %518 = vmatmul.mubr.msk.f32.gmra.mxu1 %vm56_vm0, %v20_v11 }
  0x1d   :  { %211 = vmatprep.mubr.f32.mxu0 %v561_v3  ;;  %372 = vmatprep.mubr.f32.mxu1 %v561_v3 }
  0x20   :  { %503 = vmatmul.mubr.msk.f32.gmra.mxu0 %vm56_vm0, %v21_v12  ;;  %519 = vmatmul.mubr.msk.f32.gmra.mxu1 %vm56_vm0, %v21_v12 }
  0x21   :  { %217 = vmatprep.mubr.f32.mxu0 %v561_v3  ;;  %378 = vmatprep.mubr.f32.mxu1 %v561_v3 }
  0x24   :  { %504 = vmatmul.mubr.msk.f32.gmra.mxu0 %vm56_vm0, %v22_v13  ;;  %520 = vmatmul.mubr.msk.f32.gmra.mxu1 %vm56_vm0, %v22_v13 }
  0x25   :  { %223 = vmatprep.mubr.f32.mxu0 %v561_v3  ;;  %384 = vmatprep.mubr.f32.mxu1 %v561_v3 }
  0x28   :  { %505 = vmatmul.mubr.msk.f32.gmra.mxu0 %vm56_vm0, %v23_v14  ;;  %521 = vmatmul.mubr.msk.f32.gmra.mxu1 %vm56_vm0, %v23_v14 }
  0x29   :  { %229 = vmatprep.mubr.f32.mxu0 %v561_v3  ;;  %390 = vmatprep.mubr.f32.mxu1 %v561_v3 }
  0x2c   :  { %506 = vmatmul.mubr.msk.f32.gmra.mxu0 %vm56_vm0, %v24_v15  ;;  %522 = vmatmul.mubr.msk.f32.gmra.mxu1 %vm56_vm0, %v24_v15 }
  0x2d   :  { %235 = vmatprep.mubr.f32.mxu0 %v561_v3  ;;  %396 = vmatprep.mubr.f32.mxu1 %v561_v3 }
  0x30   :  { %507 = vmatmul.mubr.msk.f32.gmra.mxu0 %vm56_vm0, %v25_v16  ;;  %523 = vmatmul.mubr.msk.f32.gmra.mxu1 %vm56_vm0, %v25_v16 }
  0x31   :  { %241 = vmatprep.mubr.f32.mxu0 %v561_v3  ;;  %402 = vmatprep.mubr.f32.mxu1 %v561_v3 }
  0x34   :  { %508 = vmatmul.mubr.msk.f32.gmra.mxu0 %vm56_vm0, %v26_v17  ;;  %524 = vmatmul.mubr.msk.f32.gmra.mxu1 %vm56_vm0, %v26_v17 }
  0x35   :  { %247 = vmatprep.mubr.f32.mxu0 %v561_v3  ;;  %408 = vmatprep.mubr.f32.mxu1 %v561_v3 }
  0x38   :  { %509 = vmatmul.mubr.msk.f32.gmra.mxu0 %vm56_vm0, %v27_v18  ;;  %525 = vmatmul.mubr.msk.f32.gmra.mxu1 %vm56_vm0, %v27_v18 }
  0x39   :  { %253 = vmatprep.mubr.f32.mxu0 %v561_v3  ;;  %414 = vmatprep.mubr.f32.mxu1 %v561_v3 }
  0x3c   :  { %510 = vmatmul.mubr.msk.f32.gmra.mxu0 %vm56_vm0, %v28_v19  ;;  %526 = vmatmul.mubr.msk.f32.gmra.mxu1 %vm56_vm0, %v28_v19 }
  0x3d   :  { %259 = vmatprep.mubr.f32.mxu0 %v561_v3  ;;  %420 = vmatprep.mubr.f32.mxu1 %v561_v3 }
  0x40   :  { %511 = vmatmul.mubr.msk.f32.gmra.mxu0 %vm56_vm0, %v29_v20  ;;  %527 = vmatmul.mubr.msk.f32.gmra.mxu1 %vm56_vm0, %v29_v20 }
  0xc4   :  { %v171_v32 = vpop.f32.mrf.mxu0  ;;  %v332_v33 = vpop.f32.mrf.mxu1 }
  0xc5   :  { %v172_v34 = vadd.f32 %v171_v32, %v709_v28  ;;  %v333_v35 = vadd.f32 %v332_v33, %v711_v29 }
  0xc6   :  { %v173_v36 = vpop.f32.mrf.mxu0  ;;  %v334_v37 = vpop.f32.mrf.mxu1 }
  0xc7   :  { %427 = vst [vmem:[%s976_s3] sm:$0xff] %v172_v34  ;;  %528 = vst [vmem:[%s976_s3 + $0x10] sm:$0xff] %v333_v35  ;;  %v174_v38 = vadd.f32 %v173_v36, %v713_v30  ;;  %v335_v39 = vadd.f32 %v334_v37, %v715_v31 }
  0xc8   :  { %v177_v40 = vpop.f32.mrf.mxu0  ;;  %v338_v41 = vpop.f32.mrf.mxu1 }
  0xc9   :  { %428 = vst [vmem:[%s976_s3 + $0x8] sm:$0xff] %v174_v38  ;;  %529 = vst [vmem:[%s976_s3 + $0x18] sm:$0xff] %v335_v39  ;;  %v178_v42 = vadd.f32 %v177_v40, %v709_v28  ;;  %v339_v43 = vadd.f32 %v338_v41, %v711_v29 }
  0xca   :  { %v179_v44 = vpop.f32.mrf.mxu0  ;;  %v340_v45 = vpop.f32.mrf.mxu1 }
  0xcb   :  { %429 = vst [vmem:[%s976_s3 + $0x20] sm:$0xff] %v178_v42  ;;  %530 = vst [vmem:[%s976_s3 + $0x30] sm:$0xff] %v339_v43  ;;  %v180_v46 = vadd.f32 %v179_v44, %v713_v30  ;;  %v341_v47 = vadd.f32 %v340_v45, %v715_v31 }
  0xcc   :  { %v183_v48 = vpop.f32.mrf.mxu0  ;;  %v344_v49 = vpop.f32.mrf.mxu1 }
  0xcd   :  { %430 = vst [vmem:[%s976_s3 + $0x28] sm:$0xff] %v180_v46  ;;  %531 = vst [vmem:[%s976_s3 + $0x38] sm:$0xff] %v341_v47  ;;  %v184_v50 = vadd.f32 %v183_v48, %v709_v28  ;;  %v345_v51 = vadd.f32 %v344_v49, %v711_v29 }
  0xce   :  { %v185_v52 = vpop.f32.mrf.mxu0  ;;  %v346_v53 = vpop.f32.mrf.mxu1 }
  0xcf   :  { %431 = vst [vmem:[%s976_s3 + $0x40] sm:$0xff] %v184_v50  ;;  %532 = vst [vmem:[%s976_s3 + $0x50] sm:$0xff] %v345_v51  ;;  %v186_v54 = vadd.f32 %v185_v52, %v713_v30  ;;  %v347_v55 = vadd.f32 %v346_v53, %v715_v31 }
  0xd0   :  { %v189_v56 = vpop.f32.mrf.mxu0  ;;  %v350_v57 = vpop.f32.mrf.mxu1 }
  0xd1   :  { %432 = vst [vmem:[%s976_s3 + $0x48] sm:$0xff] %v186_v54  ;;  %533 = vst [vmem:[%s976_s3 + $0x58] sm:$0xff] %v347_v55  ;;  %v190_v58 = vadd.f32 %v189_v56, %v709_v28  ;;  %v351_v59 = vadd.f32 %v350_v57, %v711_v29 }
  0xd2   :  { %v191_v60 = vpop.f32.mrf.mxu0  ;;  %v352_v61 = vpop.f32.mrf.mxu1 }
  0xd3   :  { %433 = vst [vmem:[%s976_s3 + $0x60] sm:$0xff] %v190_v58  ;;  %534 = vst [vmem:[%s976_s3 + $0x70] sm:$0xff] %v351_v59  ;;  %v192_v62 = vadd.f32 %v191_v60, %v713_v30  ;;  %v353_v63 = vadd.f32 %v352_v61, %v715_v31 }
  0xd4   :  { %v195_v0 = vpop.f32.mrf.mxu0  ;;  %v356_v1 = vpop.f32.mrf.mxu1 }
  0xd5   :  { %434 = vst [vmem:[%s976_s3 + $0x68] sm:$0xff] %v192_v62  ;;  %535 = vst [vmem:[%s976_s3 + $0x78] sm:$0xff] %v353_v63  ;;  %v196_v2 = vadd.f32 %v195_v0, %v709_v28  ;;  %v357_v3 = vadd.f32 %v356_v1, %v711_v29 }
  0xd6   :  { %v197_v4 = vpop.f32.mrf.mxu0  ;;  %v358_v5 = vpop.f32.mrf.mxu1 }
  0xd7   :  { %435 = vst [vmem:[%s976_s3 + $0x80] sm:$0xff] %v196_v2  ;;  %536 = vst [vmem:[%s976_s3 + $0x90] sm:$0xff] %v357_v3  ;;  %v198_v6 = vadd.f32 %v197_v4, %v713_v30  ;;  %v359_v7 = vadd.f32 %v358_v5, %v715_v31 }
  0xd8   :  { %v201_v8 = vpop.f32.mrf.mxu0  ;;  %v362_v9 = vpop.f32.mrf.mxu1 }
  0xd9   :  { %436 = vst [vmem:[%s976_s3 + $0x88] sm:$0xff] %v198_v6  ;;  %537 = vst [vmem:[%s976_s3 + $0x98] sm:$0xff] %v359_v7  ;;  %v202_v10 = vadd.f32 %v201_v8, %v709_v28  ;;  %v363_v11 = vadd.f32 %v362_v9, %v711_v29 }
  0xda   :  { %v203_v12 = vpop.f32.mrf.mxu0  ;;  %v364_v13 = vpop.f32.mrf.mxu1 }
  0xdb   :  { %437 = vst [vmem:[%s976_s3 + $0xa0] sm:$0xff] %v202_v10  ;;  %538 = vst [vmem:[%s976_s3 + $0xb0] sm:$0xff] %v363_v11  ;;  %v204_v14 = vadd.f32 %v203_v12, %v713_v30  ;;  %v365_v15 = vadd.f32 %v364_v13, %v715_v31 }
  0xdc   :  { %v207_v16 = vpop.f32.mrf.mxu0  ;;  %v368_v17 = vpop.f32.mrf.mxu1 }
  0xdd   :  { %438 = vst [vmem:[%s976_s3 + $0xa8] sm:$0xff] %v204_v14  ;;  %539 = vst [vmem:[%s976_s3 + $0xb8] sm:$0xff] %v365_v15  ;;  %v208_v18 = vadd.f32 %v207_v16, %v709_v28  ;;  %v369_v19 = vadd.f32 %v368_v17, %v711_v29 }
  0xde   :  { %v209_v20 = vpop.f32.mrf.mxu0  ;;  %v370_v21 = vpop.f32.mrf.mxu1 }
  0xdf   :  { %439 = vst [vmem:[%s976_s3 + $0xc0] sm:$0xff] %v208_v18  ;;  %540 = vst [vmem:[%s976_s3 + $0xd0] sm:$0xff] %v369_v19  ;;  %v210_v22 = vadd.f32 %v209_v20, %v713_v30  ;;  %v371_v23 = vadd.f32 %v370_v21, %v715_v31 }
  0xe0   :  { %v213_v24 = vpop.f32.mrf.mxu0  ;;  %v374_v25 = vpop.f32.mrf.mxu1 }
  0xe1   :  { %440 = vst [vmem:[%s976_s3 + $0xc8] sm:$0xff] %v210_v22  ;;  %541 = vst [vmem:[%s976_s3 + $0xd8] sm:$0xff] %v371_v23  ;;  %v214_v26 = vadd.f32 %v213_v24, %v709_v28  ;;  %v375_v27 = vadd.f32 %v374_v25, %v711_v29 }
  0xe2   :  { %v215_v32 = vpop.f32.mrf.mxu0  ;;  %v376_v33 = vpop.f32.mrf.mxu1 }
  0xe3   :  { %441 = vst [vmem:[%s976_s3 + $0xe0] sm:$0xff] %v214_v26  ;;  %542 = vst [vmem:[%s976_s3 + $0xf0] sm:$0xff] %v375_v27  ;;  %v216_v34 = vadd.f32 %v215_v32, %v713_v30  ;;  %v377_v35 = vadd.f32 %v376_v33, %v715_v31 }
  0xe4   :  { %v219_v36 = vpop.f32.mrf.mxu0  ;;  %v380_v37 = vpop.f32.mrf.mxu1 }
  0xe5   :  { %442 = vst [vmem:[%s976_s3 + $0xe8] sm:$0xff] %v216_v34  ;;  %543 = vst [vmem:[%s976_s3 + $0xf8] sm:$0xff] %v377_v35  ;;  %v220_v38 = vadd.f32 %v219_v36, %v709_v28  ;;  %v381_v39 = vadd.f32 %v380_v37, %v711_v29 }
  0xe6   :  { %v221_v40 = vpop.f32.mrf.mxu0  ;;  %v382_v41 = vpop.f32.mrf.mxu1 }
  0xe7   :  { %443 = vst [vmem:[%s976_s3 + $0x100] sm:$0xff] %v220_v38  ;;  %544 = vst [vmem:[%s976_s3 + $0x110] sm:$0xff] %v381_v39  ;;  %v222_v42 = vadd.f32 %v221_v40, %v713_v30  ;;  %v383_v43 = vadd.f32 %v382_v41, %v715_v31 }
  0xe8   :  { %v225_v44 = vpop.f32.mrf.mxu0  ;;  %v386_v45 = vpop.f32.mrf.mxu1 }
  0xe9   :  { %444 = vst [vmem:[%s976_s3 + $0x108] sm:$0xff] %v222_v42  ;;  %545 = vst [vmem:[%s976_s3 + $0x118] sm:$0xff] %v383_v43  ;;  %v226_v46 = vadd.f32 %v225_v44, %v709_v28  ;;  %v387_v47 = vadd.f32 %v386_v45, %v711_v29 }
  0xea   :  { %v227_v48 = vpop.f32.mrf.mxu0  ;;  %v388_v49 = vpop.f32.mrf.mxu1 }
  0xeb   :  { %445 = vst [vmem:[%s976_s3 + $0x120] sm:$0xff] %v226_v46  ;;  %546 = vst [vmem:[%s976_s3 + $0x130] sm:$0xff] %v387_v47  ;;  %v228_v50 = vadd.f32 %v227_v48, %v713_v30  ;;  %v389_v51 = vadd.f32 %v388_v49, %v715_v31 }
  0xec   :  { %v231_v52 = vpop.f32.mrf.mxu0  ;;  %v392_v53 = vpop.f32.mrf.mxu1 }
  0xed   :  { %446 = vst [vmem:[%s976_s3 + $0x128] sm:$0xff] %v228_v50  ;;  %547 = vst [vmem:[%s976_s3 + $0x138] sm:$0xff] %v389_v51  ;;  %v232_v54 = vadd.f32 %v231_v52, %v709_v28  ;;  %v393_v55 = vadd.f32 %v392_v53, %v711_v29 }
  0xee   :  { %v233_v56 = vpop.f32.mrf.mxu0  ;;  %v394_v57 = vpop.f32.mrf.mxu1 }
  0xef   :  { %447 = vst [vmem:[%s976_s3 + $0x140] sm:$0xff] %v232_v54  ;;  %548 = vst [vmem:[%s976_s3 + $0x150] sm:$0xff] %v393_v55  ;;  %v234_v58 = vadd.f32 %v233_v56, %v713_v30  ;;  %v395_v59 = vadd.f32 %v394_v57, %v715_v31 }
  0xf0   :  { %v237_v60 = vpop.f32.mrf.mxu0  ;;  %v398_v61 = vpop.f32.mrf.mxu1 }
  0xf1   :  { %448 = vst [vmem:[%s976_s3 + $0x148] sm:$0xff] %v234_v58  ;;  %549 = vst [vmem:[%s976_s3 + $0x158] sm:$0xff] %v395_v59  ;;  %v238_v62 = vadd.f32 %v237_v60, %v709_v28  ;;  %v399_v63 = vadd.f32 %v398_v61, %v711_v29 }
  0xf2   :  { %v239_v0 = vpop.f32.mrf.mxu0  ;;  %v400_v1 = vpop.f32.mrf.mxu1 }
  0xf3   :  { %449 = vst [vmem:[%s976_s3 + $0x160] sm:$0xff] %v238_v62  ;;  %550 = vst [vmem:[%s976_s3 + $0x170] sm:$0xff] %v399_v63  ;;  %v240_v2 = vadd.f32 %v239_v0, %v713_v30  ;;  %v401_v3 = vadd.f32 %v400_v1, %v715_v31 }
  0xf4   :  { %v243_v4 = vpop.f32.mrf.mxu0  ;;  %v404_v5 = vpop.f32.mrf.mxu1 }
  0xf5   :  { %450 = vst [vmem:[%s976_s3 + $0x168] sm:$0xff] %v240_v2  ;;  %551 = vst [vmem:[%s976_s3 + $0x178] sm:$0xff] %v401_v3  ;;  %v244_v6 = vadd.f32 %v243_v4, %v709_v28  ;;  %v405_v7 = vadd.f32 %v404_v5, %v711_v29 }
  0xf6   :  { %v245_v8 = vpop.f32.mrf.mxu0  ;;  %v406_v9 = vpop.f32.mrf.mxu1 }
  0xf7   :  { %451 = vst [vmem:[%s976_s3 + $0x180] sm:$0xff] %v244_v6  ;;  %552 = vst [vmem:[%s976_s3 + $0x190] sm:$0xff] %v405_v7  ;;  %v246_v10 = vadd.f32 %v245_v8, %v713_v30  ;;  %v407_v11 = vadd.f32 %v406_v9, %v715_v31 }
  0xf8   :  { %v249_v12 = vpop.f32.mrf.mxu0  ;;  %v410_v13 = vpop.f32.mrf.mxu1 }
  0xf9   :  { %452 = vst [vmem:[%s976_s3 + $0x188] sm:$0xff] %v246_v10  ;;  %553 = vst [vmem:[%s976_s3 + $0x198] sm:$0xff] %v407_v11  ;;  %v250_v14 = vadd.f32 %v249_v12, %v709_v28  ;;  %v411_v15 = vadd.f32 %v410_v13, %v711_v29 }
  0xfa   :  { %v251_v16 = vpop.f32.mrf.mxu0  ;;  %v412_v17 = vpop.f32.mrf.mxu1 }
  0xfb   :  { %453 = vst [vmem:[%s976_s3 + $0x1a0] sm:$0xff] %v250_v14  ;;  %554 = vst [vmem:[%s976_s3 + $0x1b0] sm:$0xff] %v411_v15  ;;  %v252_v18 = vadd.f32 %v251_v16, %v713_v30  ;;  %v413_v19 = vadd.f32 %v412_v17, %v715_v31 }
  0xfc   :  { %v255_v20 = vpop.f32.mrf.mxu0  ;;  %v416_v21 = vpop.f32.mrf.mxu1 }
  0xfd   :  { %454 = vst [vmem:[%s976_s3 + $0x1a8] sm:$0xff] %v252_v18  ;;  %555 = vst [vmem:[%s976_s3 + $0x1b8] sm:$0xff] %v413_v19  ;;  %v256_v22 = vadd.f32 %v255_v20, %v709_v28  ;;  %v417_v23 = vadd.f32 %v416_v21, %v711_v29 }
  0xfe   :  { %v257_v24 = vpop.f32.mrf.mxu0  ;;  %v418_v25 = vpop.f32.mrf.mxu1 }
  0xff   :  { %455 = vst [vmem:[%s976_s3 + $0x1c0] sm:$0xff] %v256_v22  ;;  %556 = vst [vmem:[%s976_s3 + $0x1d0] sm:$0xff] %v417_v23  ;;  %v258_v26 = vadd.f32 %v257_v24, %v713_v30  ;;  %v419_v27 = vadd.f32 %v418_v25, %v715_v31 }
 0x100   :  { %v261_v32 = vpop.f32.mrf.mxu0  ;;  %v422_v33 = vpop.f32.mrf.mxu1 }
 0x101   :  { %456 = vst [vmem:[%s976_s3 + $0x1c8] sm:$0xff] %v258_v26  ;;  %557 = vst [vmem:[%s976_s3 + $0x1d8] sm:$0xff] %v419_v27  ;;  %v262_v34 = vadd.f32 %v261_v32, %v709_v28  ;;  %v423_v35 = vadd.f32 %v422_v33, %v711_v29 }
 0x102   :  { %v263_v36 = vpop.f32.mrf.mxu0  ;;  %v424_v37 = vpop.f32.mrf.mxu1 }
 0x103   :  { %457 = vst [vmem:[%s976_s3 + $0x1e0] sm:$0xff] %v262_v34  ;;  %558 = vst [vmem:[%s976_s3 + $0x1f0] sm:$0xff] %v423_v35  ;;  %v264_v38 = vadd.f32 %v263_v36, %v713_v30  ;;  %v425_v39 = vadd.f32 %v424_v37, %v715_v31 }
 0x105   :  { %458 = vst [vmem:[%s976_s3 + $0x1e8] sm:$0xff] %v264_v38  ;;  %559 = vst [vmem:[%s976_s3 + $0x1f8] sm:$0xff] %v425_v39 }

// kernel: unet_up_noskip_forward.6
= control target key start
LH: loop header
LB: loop body
LE: loop exit
PB: predicated region body
PF: predicated region fallthrough
CT: control target
= control target key end

     0   :  { %s4641_s18 = smov 0   ;;  %s6626_s0 = inlined_call_operand.vmem [shape: f32[2,18,18,128], index: 0, kind: input, shape index: {}]   ;;  %s6627_s1 = inlined_call_operand.vmem [shape: f32[9,128,128], index: 1, kind: input, shape index: {}]   ;;  %s6628_s2 = inlined_call_operand.vmem [shape: f32[1,128], index: 2, kind: input, shape index: {}]   ;;  %s6629_s3 = inlined_call_operand.vmem [shape: f32[2,256,128], index: 3, kind: output, shape index: {0}]   ;;  %s6630_s4 = inlined_call_operand.vmem [shape: f32[1,128], index: 4, kind: output, shape index: {1}]   ;;  %s6631_s5 = inlined_call_operand.vmem [shape: f32[1,128], index: 5, kind: output, shape index: {2}]  }
   0x1 LB: > { %s4647_s19 = sadd.s32 4294967295, %s4608_s18   ;;  %p3243_p0 = scmp.ge.s32.totalorder %s4608_s18, 1  ;;  %s4608_s18 = sphi %s4641_s18, %s16_s18  }
   0x2   : > { %p182_p1 = scmp.lt.s32.totalorder %s4608_s18, 3 }
   0x4   : > { %p183_p2 = pnand %p3243_p0, %p182_p1 }
   0x6   : > { %186 = sbr.rel (%p183_p2) target bundleno = 627 (0x273), region = 32 }
   0xb   : > { %v3262_v0 = vld [vmem:[%s6627_s1 + $0xf8] sm:$0xff]  ;;  %v3261_v1 = vld [vmem:[%s6627_s1 + $0xf0] sm:$0xff]  ;;  %v3260_v2 = vld [vmem:[%s6627_s1 + $0xe8] sm:$0xff]  ;;  %p210_p3 = scmp.lt.s32.totalorder %s4647_s19, 1  ;;  %vm338_vm0 = vcmask 1046528   ;;  %vm918_vm1 = vcmask 1045504  }
   0xc   : > { %4532 = vmatprep.subr.mxu1 %v3262_v0  ;;  %3812 = vmatprep.subr.mxu0 %v3262_v0  ;;  %v3259_v3 = vld [vmem:[%s6627_s1 + $0xe0] sm:$0xff]  ;;  %v3258_v4 = vld [vmem:[%s6627_s1 + $0xd8] sm:$0xff]  ;;  %v3257_v5 = vld [vmem:[%s6627_s1 + $0xd0] sm:$0xff]  ;;  %p3376_p4 = scmp.ne.s32.totalorder %s4647_s19, 0 }
   0xd   : > { %4548 = vmatpush3.msra.mxu1 %v3262_v0  ;;  %3813 = vmatpush3.msra.mxu0 %v3262_v0  ;;  %v3256_v6 = vld [vmem:[%s6627_s1 + $0xc8] sm:$0xff]  ;;  %s4674_s9 = scalar_select %p210_p3, %s4647_s19, 1  ;;  %v3255_v7 = vld [vmem:[%s6627_s1 + $0xc0] sm:$0xff]  ;;  %v3254_v8 = vld [vmem:[%s6627_s1 + $0xb8] sm:$0xff] }
   0xe   : > { %4533 = vmatprep.subr.mxu1 %v3261_v1  ;;  %3814 = vmatprep.subr.mxu0 %v3261_v1  ;;  %v3253_v9 = vld [vmem:[%s6627_s1 + $0xb0] sm:$0xff]  ;;  %v3252_v10 = vld [vmem:[%s6627_s1 + $0xa8] sm:$0xff]  ;;  %v3251_v11 = vld [vmem:[%s6627_s1 + $0xa0] sm:$0xff] }
   0xf   : > { %4549 = vmatpush3.msra.mxu1 %v3261_v1  ;;  %3815 = vmatpush3.msra.mxu0 %v3261_v1  ;;  %s4564_s14 = smul.u32 432, %s4674_s9  ;;  %v3250_v12 = vld [vmem:[%s6627_s1 + $0x98] sm:$0xff]  ;;  %v3249_v17 = vld [vmem:[%s6627_s1 + $0x90] sm:$0xff]  ;;  %v3248_v22 = vld [vmem:[%s6627_s1 + $0x88] sm:$0xff] }
  0x10   : > { %4534 = vmatprep.subr.mxu1 %v3260_v2  ;;  %3816 = vmatprep.subr.mxu0 %v3260_v2  ;;  %v3247_v28 = vld [vmem:[%s6627_s1 + $0x80] sm:$0xff]  ;;  %v289_v38 = vld [vmem:[%s6627_s1 + $0x78] sm:$0xff]  ;;  %v288_v45 = vld [vmem:[%s6627_s1 + $0x70] sm:$0xff] }
  0x11   : > { %4550 = vmatpush3.msra.mxu1 %v3260_v2  ;;  %3817 = vmatpush3.msra.mxu0 %v3260_v2  ;;  %s4692_s23 = scalar_lea.vmem %s6626_s0, %s4564_s14  ;;  %v3278_v41 = vld [vmem:[%s6627_s1 + $0x178] sm:$0xff]  ;;  %v3277_v49 = vld [vmem:[%s6627_s1 + $0x170] sm:$0xff]  ;;  %v287_v58 = vld [vmem:[%s6627_s1 + $0x68] sm:$0xff] }
  0x12   : > { %4535 = vmatprep.subr.mxu1 %v3259_v3  ;;  %3818 = vmatprep.subr.mxu0 %v3259_v3  ;;  %v4701_v13 = vld [vmem:[%s4692_s23 + $0xc0] sm:$0xff]  ;;  %v4704_v14 = vld [vmem:[%s4692_s23 + $0xc8] sm:$0xff]  ;;  %v4716_v18 = vld [vmem:[%s4692_s23 + $0xd0] sm:$0x3] }
  0x13   : > { %4551 = vmatpush3.msra.mxu1 %v3259_v3  ;;  %3819 = vmatpush3.msra.mxu0 %v3259_v3  ;;  %v4707_v15 = vld [vmem:[%s4692_s23] sm:$0xff]  ;;  %v4710_v16 = vld [vmem:[%s4692_s23 + $0x8] sm:$0xff]  ;;  %v379_v19 = vrot.slane %v4701_v13, 1  ;;  %v380_v20 = vrot.slane %v4704_v14, 1  ;;  %v4721_v21 = vld [vmem:[%s4692_s23 + $0x10] sm:$0x3] }
  0x14   : > { %4536 = vmatprep.subr.mxu1 %v3258_v4  ;;  %3820 = vmatprep.subr.mxu0 %v3258_v4  ;;  %v339_v23 = vrot.slane %v4707_v15, 1  ;;  %v340_v24 = vrot.slane %v4710_v16, 1  ;;  %v382_v25 = vrot.slane %v4716_v18, 1  ;;  %v4730_v26 = vld [vmem:[%s4692_s23 + $0xd8] sm:$0xff]  ;;  %v4733_v27 = vld [vmem:[%s4692_s23 + $0xe0] sm:$0xff]  ;;  %v342_v29 = vrot.slane %v4721_v21, 1 }
  0x15   : > { %4552 = vmatpush3.msra.mxu1 %v3258_v4  ;;  %3821 = vmatpush3.msra.mxu0 %v3258_v4  ;;  %v4740_v30 = vsel %vm338_vm0, %v379_v19, %v380_v20  ;;  %v4743_v31 = vld [vmem:[%s4692_s23 + $0x18] sm:$0xff]  ;;  %v4746_v32 = vld [vmem:[%s4692_s23 + $0x20] sm:$0xff]  ;;  %v4749_v33 = vld [vmem:[%s4692_s23 + $0xe8] sm:$0x3]  ;;  %v384_v35 = vrot.slane %v4730_v26, 1  ;;  %v385_v36 = vrot.slane %v4733_v27, 1 }
  0x16   : > { %4537 = vmatprep.subr.mxu1 %v3257_v5  ;;  %3822 = vmatprep.subr.mxu0 %v3257_v5  ;;  %6697 = vst [vmem:[#allocation2_spill] sm:$0xff] %v4740_v30  ;;  %v341_v34 = vsel %vm338_vm0, %v339_v23, %v340_v24  ;;  %v4755_v37 = vsel %vm338_vm0, %v380_v20, %v382_v25  ;;  %v4761_v39 = vld [vmem:[%s4692_s23 + $0x28] sm:$0x3]  ;;  %v344_v42 = vrot.slane %v4743_v31, 1  ;;  %v345_v43 = vrot.slane %v4746_v32, 1  ;;  %v4775_v46 = vld [vmem:[%s4692_s23 + $0xf0] sm:$0xff] }
  0x17   : > { %4553 = vmatpush3.msra.mxu1 %v3257_v5  ;;  %3823 = vmatpush3.msra.mxu0 %v3257_v5  ;;  %6698 = vst [vmem:[#allocation3_spill] sm:$0xff] %v4755_v37  ;;  %v343_v40 = vsel %vm338_vm0, %v340_v24, %v342_v29  ;;  %v387_v44 = vrot.slane %v4749_v33, 1  ;;  %v4778_v47 = vld [vmem:[%s4692_s23 + $0xf8] sm:$0xff]  ;;  %v4782_v48 = vsel %vm338_vm0, %v384_v35, %v385_v36  ;;  %v347_v50 = vrot.slane %v4761_v39, 1  ;;  %v4789_v51 = vld [vmem:[%s4692_s23 + $0x30] sm:$0xff]  ;;  %v3276_v61 = vld [vmem:[%s6627_s1 + $0x168] sm:$0xff] }
  0x18   : > { %4538 = vmatprep.subr.mxu1 %v3256_v6  ;;  %3824 = vmatprep.subr.mxu0 %v3256_v6  ;;  %6699 = vst [vmem:[#allocation4_spill] sm:$0xff] %v4782_v48  ;;  %v4792_v52 = vld [vmem:[%s4692_s23 + $0x38] sm:$0xff]  ;;  %v4795_v53 = vld [vmem:[%s4692_s23 + $0x100] sm:$0x3]  ;;  %v4798_v54 = vsel %vm338_vm0, %v344_v42, %v345_v43  ;;  %v389_v56 = vrot.slane %v4775_v46, 1  ;;  %v390_v57 = vrot.slane %v4778_v47, 1 }
  0x19   : > { %4554 = vmatpush3.msra.mxu1 %v3256_v6  ;;  %3825 = vmatpush3.msra.mxu0 %v3256_v6  ;;  %v4801_v55 = vsel %vm338_vm0, %v385_v36, %v387_v44  ;;  %v4810_v59 = vld [vmem:[%s4692_s23 + $0x40] sm:$0x3]  ;;  %v4813_v60 = vsel %vm338_vm0, %v345_v43, %v347_v50  ;;  %v349_v62 = vrot.slane %v4789_v51, 1  ;;  %v350_v63 = vrot.slane %v4792_v52, 1  ;;  %v4827_v2 = vld [vmem:[%s4692_s23 + $0x108] sm:$0xff]  ;;  %v4830_v3 = vld [vmem:[%s4692_s23 + $0x110] sm:$0xff] }
  0x1a   : > { %4539 = vmatprep.subr.mxu1 %v3255_v7  ;;  %3826 = vmatprep.subr.mxu0 %v3255_v7  ;;  %6700 = vst [vmem:[#allocation5_spill] sm:$0xff] %v4801_v55  ;;  %6701 = vst [vmem:[#allocation6_spill] sm:$0xff] %v4813_v60  ;;  %v392_v0 = vrot.slane %v4795_v53, 1  ;;  %v286_v1 = vld [vmem:[%s6627_s1 + $0x60] sm:$0xff]  ;;  %v4833_v4 = vsel %vm338_vm0, %v389_v56, %v390_v57  ;;  %v352_v6 = vrot.slane %v4810_v59, 1  ;;  %v285_v19 = vld [vmem:[%s6627_s1 + $0x58] sm:$0xff] }
  0x1b   : > { %4555 = vmatpush3.msra.mxu1 %v3255_v7  ;;  %3827 = vmatpush3.msra.mxu0 %v3255_v7  ;;  %6702 = vst [vmem:[#allocation7_spill] sm:$0xff] %v4833_v4  ;;  %v3275_v5 = vld [vmem:[%s6627_s1 + $0x160] sm:$0xff]  ;;  %v4841_v7 = vld [vmem:[%s4692_s23 + $0x48] sm:$0xff]  ;;  %v4862_v20 = vld [vmem:[%s4692_s23 + $0x58] sm:$0x3] }
  0x1c   : > { %4540 = vmatprep.subr.mxu1 %v3254_v8  ;;  %3828 = vmatprep.subr.mxu0 %v3254_v8  ;;  %v3274_v23 = vld [vmem:[%s6627_s1 + $0x158] sm:$0xff]  ;;  %v354_v24 = vrot.slane %v4841_v7, 1  ;;  %v284_v29 = vld [vmem:[%s6627_s1 + $0x50] sm:$0xff]  ;;  %v4882_v35 = vld [vmem:[%s4692_s23 + $0x128] sm:$0xff] }
  0x1d   : > { %4556 = vmatpush3.msra.mxu1 %v3254_v8  ;;  %3829 = vmatpush3.msra.mxu0 %v3254_v8  ;;  %v4844_v8 = vld [vmem:[%s4692_s23 + $0x50] sm:$0xff]  ;;  %v4896_v42 = vld [vmem:[%s4692_s23 + $0x68] sm:$0xff]  ;;  %v400_v50 = vrot.slane %v4882_v35, 1 }
  0x1e   : > { %4541 = vmatprep.subr.mxu1 %v3253_v9  ;;  %3830 = vmatprep.subr.mxu0 %v3253_v9  ;;  %v355_v25 = vrot.slane %v4844_v8, 1  ;;  %v4899_v43 = vld [vmem:[%s4692_s23 + $0x130] sm:$0x3]  ;;  %v283_v56 = vld [vmem:[%s6627_s1 + $0x48] sm:$0xff] }
  0x1f   : > { %4557 = vmatpush3.msra.mxu1 %v3253_v9  ;;  %3831 = vmatpush3.msra.mxu0 %v3253_v9  ;;  %v4847_v9 = vld [vmem:[%s4692_s23 + $0x118] sm:$0x3] }
  0x20   : > { %4542 = vmatprep.subr.mxu1 %v3252_v10  ;;  %3832 = vmatprep.subr.mxu0 %v3252_v10  ;;  %v4902_v44 = vsel %vm338_vm0, %v354_v24, %v355_v25  ;;  %v4948_v24 = vld [vmem:[%s4692_s23 + $0x80] sm:$0xff] }
  0x21   : > { %4558 = vmatpush3.msra.mxu1 %v3252_v10  ;;  %3833 = vmatpush3.msra.mxu0 %v3252_v10  ;;  %v4850_v10 = vsel %vm338_vm0, %v349_v62, %v350_v63  ;;  %6707 = vst [vmem:[#allocation12_spill] sm:$0xff] %v4902_v44 }
  0x22   : > { %4543 = vmatprep.subr.mxu1 %v3251_v11  ;;  %3834 = vmatprep.subr.mxu0 %v3251_v11  ;;  %6703 = vst [vmem:[#allocation8_spill] sm:$0xff] %v4850_v10 }
  0x23   : > { %4559 = vmatpush3.msra.mxu1 %v3251_v11  ;;  %3835 = vmatpush3.msra.mxu0 %v3251_v11  ;;  %v4853_v11 = vsel %vm338_vm0, %v390_v57, %v392_v0  ;;  %v4914_v57 = vld [vmem:[%s4692_s23 + $0x70] sm:$0x3]  ;;  %v402_v0 = vrot.slane %v4899_v43, 1 }
  0x24   : > { %4544 = vmatprep.subr.mxu1 %v3250_v12  ;;  %3836 = vmatprep.subr.mxu0 %v3250_v12  ;;  %6704 = vst [vmem:[#allocation9_spill] sm:$0xff] %v4853_v11 }
  0x25   : > { %4560 = vmatpush3.msra.mxu1 %v3250_v12  ;;  %3837 = vmatpush3.msra.mxu0 %v3250_v12  ;;  %v394_v12 = vrot.slane %v4827_v2, 1 }
  0x26   : > { %4545 = vmatprep.subr.mxu1 %v3249_v17  ;;  %3838 = vmatprep.subr.mxu0 %v3249_v17 }
  0x27   : > { %4561 = vmatpush3.msra.mxu1 %v3249_v17  ;;  %3839 = vmatpush3.msra.mxu0 %v3249_v17  ;;  %v395_v17 = vrot.slane %v4830_v3, 1 }
  0x28   : > { %4546 = vmatprep.subr.mxu1 %v3248_v22  ;;  %3840 = vmatprep.subr.mxu0 %v3248_v22 }
  0x29   : > { %4562 = vmatpush3.msra.mxu1 %v3248_v22  ;;  %3841 = vmatpush3.msra.mxu0 %v3248_v22  ;;  %v4865_v22 = vsel %vm338_vm0, %v350_v63, %v352_v6  ;;  %v4885_v36 = vsel %vm338_vm0, %v394_v12, %v395_v17  ;;  %v360_v63 = vrot.slane %v4896_v42, 1  ;;  %v4934_v6 = vld [vmem:[%s4692_s23 + $0x140] sm:$0xff] }
  0x2a   : > { %4547 = vmatprep.subr.mxu1 %v3247_v28  ;;  %3842 = vmatprep.subr.mxu0 %v3247_v28  ;;  %6705 = vst [vmem:[#allocation10_spill] sm:$0xff] %v4865_v22  ;;  %6706 = vst [vmem:[#allocation11_spill] sm:$0xff] %v4885_v36 }
  0x2b   : > { %4563 = vmatpush3.msra.mxu1 %v3247_v28  ;;  %3868 = vmatprep.mubr.f32.mxu1 %v4740_v30  ;;  %v5018_v30 = vld [vmem:[%s4692_s23 + $0xa0] sm:$0x3] }
  0x2c   : > { %3843 = vmatpush3.msra.mxu0 %v3247_v28  ;;  %3844 = vmatprep.mubr.f32.mxu0 %v341_v34  ;;  %v397_v28 = vrot.slane %v4847_v9, 1  ;;  %v4879_v34 = vld [vmem:[%s4692_s23 + $0x120] sm:$0xff] }
  0x2d   : > { %3869 = vmatmul.mubr.f32.vlgmr.msra.gmra.mxu1 %v4755_v37  ;;  %3892 = vmatprep.subr.mxu1 %v289_v38 }
  0x2e   : > { %3845 = vmatmul.mubr.f32.vlgmr.msra.gmra.mxu0 %v343_v40  ;;  %3893 = vmatpush3.msra.mxu1 %v289_v38  ;;  %v3273_v38 = vld [vmem:[%s6627_s1 + $0x150] sm:$0xff]  ;;  %v357_v40 = vrot.slane %v4862_v20, 1 }
  0x2f   : > { %3972 = vmatprep.subr.mxu0 %v3278_v41  ;;  %3894 = vmatprep.subr.mxu1 %v288_v45 }
  0x30   : > { %3973 = vmatpush3.msra.mxu0 %v3278_v41  ;;  %3871 = vmatprep.mubr.f32.mxu1 %v4782_v48  ;;  %v4893_v41 = vld [vmem:[%s4692_s23 + $0x60] sm:$0xff] }
  0x31   : > { %3895 = vmatpush3.msra.mxu1 %v288_v45  ;;  %3974 = vmatprep.subr.mxu0 %v3277_v49  ;;  %v4905_v45 = vsel %vm338_vm0, %v395_v17, %v397_v28  ;;  %v359_v62 = vrot.slane %v4893_v41, 1  ;;  %v3271_v17 = vld [vmem:[%s6627_s1 + $0x140] sm:$0xff] }
  0x32   : > { %3847 = vmatprep.mubr.f32.mxu0 %v4798_v54  ;;  %3872 = vmatmul.mubr.f32.gmra.mxu1 %v4801_v55  ;;  %6708 = vst [vmem:[#allocation13_spill] sm:$0xff] %v4905_v45  ;;  %v5003_v55 = vld [vmem:[%s4692_s23 + $0x160] sm:$0x3] }
  0x33   : > { %3896 = vmatprep.subr.mxu1 %v287_v58  ;;  %3975 = vmatpush3.msra.mxu0 %v3277_v49  ;;  %v399_v49 = vrot.slane %v4879_v34, 1  ;;  %v4954_v28 = vsel %vm338_vm0, %v359_v62, %v360_v63  ;;  %v3270_v62 = vld [vmem:[%s6627_s1 + $0x138] sm:$0xff] }
  0x34   : > { %3848 = vmatmul.mubr.f32.gmra.mxu0 %v4813_v60  ;;  %3897 = vmatpush3.msra.mxu1 %v287_v58  ;;  %v4917_v58 = vsel %vm338_vm0, %v355_v25, %v357_v40  ;;  %v4951_v25 = vld [vmem:[%s4692_s23 + $0x148] sm:$0x3]  ;;  %6711 = vst [vmem:[#allocation16_spill] sm:$0xff] %v4954_v28  ;;  %v405_v40 = vrot.slane %v4934_v6, 1 }
  0x35   : > { %3976 = vmatprep.subr.mxu0 %v3276_v61  ;;  %3898 = vmatprep.subr.mxu1 %v286_v1  ;;  %6709 = vst [vmem:[#allocation14_spill] sm:$0xff] %v4917_v58  ;;  %v4937_v12 = vsel %vm338_vm0, %v399_v49, %v400_v50  ;;  %v281_v49 = vld [vmem:[%s6627_s1 + $0x38] sm:$0xff] }
  0x36   : > { %3977 = vmatpush3.msra.mxu0 %v3276_v61  ;;  %3874 = vmatprep.mubr.f32.mxu1 %v4833_v4  ;;  %v3272_v61 = vld [vmem:[%s6627_s1 + $0x148] sm:$0xff]  ;;  %6710 = vst [vmem:[#allocation15_spill] sm:$0xff] %v4937_v12  ;;  %v5000_v4 = vld [vmem:[%s4692_s23 + $0x98] sm:$0xff] }
  0x37   : > { %3899 = vmatpush3.msra.mxu1 %v286_v1  ;;  %3978 = vmatprep.subr.mxu0 %v3275_v5  ;;  %v282_v1 = vld [vmem:[%s6627_s1 + $0x40] sm:$0xff] }
  0x38   : > { %3850 = vmatprep.mubr.f32.mxu0 %v4850_v10  ;;  %3875 = vmatmul.mubr.f32.gmra.mxu1 %v4853_v11  ;;  %v4997_v11 = vld [vmem:[%s4692_s23 + $0x90] sm:$0xff] }
  0x39   : > { %3900 = vmatprep.subr.mxu1 %v285_v19  ;;  %3979 = vmatpush3.msra.mxu0 %v3275_v5  ;;  %v4931_v5 = vld [vmem:[%s4692_s23 + $0x138] sm:$0xff] }
  0x3a   : > { %3851 = vmatmul.mubr.f32.gmra.mxu0 %v4865_v22  ;;  %3901 = vmatpush3.msra.mxu1 %v285_v19  ;;  %v362_v19 = vrot.slane %v4914_v57, 1 }
  0x3b   : > { %3980 = vmatprep.subr.mxu0 %v3274_v23  ;;  %3902 = vmatprep.subr.mxu1 %v284_v29 }
  0x3c   : > { %3981 = vmatpush3.msra.mxu0 %v3274_v23  ;;  %3877 = vmatprep.mubr.f32.mxu1 %v4885_v36  ;;  %v4945_v23 = vld [vmem:[%s4692_s23 + $0x78] sm:$0xff]  ;;  %v3269_v36 = vld [vmem:[%s6627_s1 + $0x130] sm:$0xff] }
  0x3d   : > { %3903 = vmatpush3.msra.mxu1 %v284_v29  ;;  %3982 = vmatprep.subr.mxu0 %v3273_v38  ;;  %v4957_v29 = vsel %vm338_vm0, %v400_v50, %v402_v0  ;;  %v4969_v50 = vsel %vm338_vm0, %v360_v63, %v362_v19  ;;  %v365_v0 = vrot.slane %v4948_v24, 1  ;;  %v280_v63 = vld [vmem:[%s6627_s1 + $0x30] sm:$0xff]  ;;  %v4986_v19 = vld [vmem:[%s4692_s23 + $0x158] sm:$0xff] }
  0x3e   : > { %3853 = vmatprep.mubr.f32.mxu0 %v4902_v44  ;;  %3878 = vmatmul.mubr.f32.gmra.mxu1 %v4905_v45  ;;  %6712 = vst [vmem:[#allocation17_spill] sm:$0xff] %v4957_v29  ;;  %6713 = vst [vmem:[#allocation18_spill] sm:$0xff] %v4969_v50  ;;  %v410_v37 = vrot.slane %v4986_v19, 1  ;;  %v5055_v44 = vld [vmem:[%s4692_s23 + $0x178] sm:$0x3] }
  0x3f   : > { %3904 = vmatprep.subr.mxu1 %v283_v56  ;;  %3983 = vmatpush3.msra.mxu0 %v3273_v38  ;;  %v404_v38 = vrot.slane %v4931_v5, 1  ;;  %v417_v60 = vrot.slane %v5055_v44, 1 }
  0x40   : > { %3854 = vmatmul.mubr.f32.gmra.mxu0 %v4917_v58  ;;  %3905 = vmatpush3.msra.mxu1 %v283_v56  ;;  %v4966_v56 = vld [vmem:[%s4692_s23 + $0x88] sm:$0x3]  ;;  %v5052_v58 = vld [vmem:[%s4692_s23 + $0xb0] sm:$0xff] }
  0x41   : > { %3984 = vmatprep.subr.mxu0 %v3272_v61  ;;  %3906 = vmatprep.subr.mxu1 %v282_v1  ;;  %v4989_v45 = vsel %vm338_vm0, %v404_v38, %v405_v40 }
  0x42   : > { %3985 = vmatpush3.msra.mxu0 %v3272_v61  ;;  %3880 = vmatprep.mubr.f32.mxu1 %v4937_v12  ;;  %v364_v61 = vrot.slane %v4945_v23, 1  ;;  %v407_v12 = vrot.slane %v4951_v25, 1  ;;  %6714 = vst [vmem:[#allocation19_spill] sm:$0xff] %v4989_v45 }
  0x43   : > { %3907 = vmatpush3.msra.mxu1 %v282_v1  ;;  %3986 = vmatprep.subr.mxu0 %v3271_v17  ;;  %v4983_v1 = vld [vmem:[%s4692_s23 + $0x150] sm:$0xff] }
  0x44   : > { %3856 = vmatprep.mubr.f32.mxu0 %v4954_v28  ;;  %3881 = vmatmul.mubr.f32.gmra.mxu1 %v4957_v29  ;;  %v367_v29 = vrot.slane %v4966_v56, 1  ;;  %v5009_v38 = vsel %vm338_vm0, %v405_v40, %v407_v12  ;;  %v409_v48 = vrot.slane %v4983_v1, 1  ;;  %v3268_v40 = vld [vmem:[%s6627_s1 + $0x128] sm:$0xff]  ;;  %v3267_v28 = vld [vmem:[%s6627_s1 + $0x120] sm:$0xff] }
  0x45   : > { %3908 = vmatprep.subr.mxu1 %v281_v49  ;;  %3987 = vmatpush3.msra.mxu0 %v3271_v17  ;;  %v5006_v17 = vsel %vm338_vm0, %v364_v61, %v365_v0  ;;  %6716 = vst [vmem:[#allocation21_spill] sm:$0xff] %v5009_v38  ;;  %v370_v61 = vrot.slane %v5000_v4, 1 }
  0x46   : > { %3857 = vmatmul.mubr.f32.gmra.mxu0 %v4969_v50  ;;  %3909 = vmatpush3.msra.mxu1 %v281_v49  ;;  %6715 = vst [vmem:[#allocation20_spill] sm:$0xff] %v5006_v17  ;;  %v279_v49 = vld [vmem:[%s6627_s1 + $0x28] sm:$0xff]  ;;  %v5021_v12 = vsel %vm338_vm0, %v365_v0, %v367_v29  ;;  %v278_v29 = vld [vmem:[%s6627_s1 + $0x20] sm:$0xff]  ;;  %v5041_v50 = vsel %vm338_vm0, %v409_v48, %v410_v37 }
  0x47   : > { %3988 = vmatprep.subr.mxu0 %v3270_v62  ;;  %3910 = vmatprep.subr.mxu1 %v280_v63  ;;  %6717 = vst [vmem:[#allocation22_spill] sm:$0xff] %v5021_v12  ;;  %v5035_v0 = vld [vmem:[%s4692_s23 + $0x168] sm:$0xff]  ;;  %6718 = vst [vmem:[#allocation23_spill] sm:$0xff] %v5041_v50 }
  0x48   : > { %3989 = vmatpush3.msra.mxu0 %v3270_v62  ;;  %3883 = vmatprep.mubr.f32.mxu1 %v4989_v45  ;;  %v369_v62 = vrot.slane %v4997_v11, 1  ;;  %v412_v45 = vrot.slane %v5003_v55, 1  ;;  %v414_v22 = vrot.slane %v5035_v0, 1 }
  0x49   : > { %3911 = vmatpush3.msra.mxu1 %v280_v63  ;;  %3990 = vmatprep.subr.mxu0 %v3269_v36  ;;  %v5038_v63 = vld [vmem:[%s4692_s23 + $0x170] sm:$0xff] }
  0x4a   : > { %3859 = vmatprep.mubr.f32.mxu0 %v5006_v17  ;;  %3884 = vmatmul.mubr.f32.gmra.mxu1 %v5009_v38  ;;  %v372_v38 = vrot.slane %v5018_v30, 1  ;;  %v5049_v17 = vld [vmem:[%s4692_s23 + $0xa8] sm:$0xff]  ;;  %v5058_v48 = vsel %vm338_vm0, %v369_v62, %v370_v61  ;;  %v415_v10 = vrot.slane %v5038_v63, 1 }
  0x4b   : > { %3912 = vmatprep.subr.mxu1 %v279_v49  ;;  %3991 = vmatpush3.msra.mxu0 %v3269_v36  ;;  %6719 = vst [vmem:[#allocation24_spill] sm:$0xff] %v5058_v48  ;;  %v5061_v36 = vsel %vm338_vm0, %v410_v37, %v412_v45  ;;  %v374_v37 = vrot.slane %v5049_v17, 1  ;;  %v375_v45 = vrot.slane %v5052_v58, 1 }
  0x4c   : > { %3860 = vmatmul.mubr.f32.gmra.mxu0 %v5021_v12  ;;  %3913 = vmatpush3.msra.mxu1 %v279_v49  ;;  %6720 = vst [vmem:[#allocation25_spill] sm:$0xff] %v5061_v36  ;;  %v277_v49 = vld [vmem:[%s6627_s1 + $0x18] sm:$0xff]  ;;  %v5073_v62 = vsel %vm338_vm0, %v370_v61, %v372_v38  ;;  %v5087_v38 = vsel %vm338_vm0, %v414_v22, %v415_v10  ;;  %v275_v22 = vld [vmem:[%s6627_s1 + $0x8] sm:$0xff] }
  0x4d   : > { %3992 = vmatprep.subr.mxu0 %v3268_v40  ;;  %3914 = vmatprep.subr.mxu1 %v278_v29  ;;  %v5070_v12 = vld [vmem:[%s4692_s23 + $0xb8] sm:$0x3]  ;;  %6721 = vst [vmem:[#allocation26_spill] sm:$0xff] %v5087_v38 }
  0x4e   : > { %3993 = vmatpush3.msra.mxu0 %v3268_v40  ;;  %3886 = vmatprep.mubr.f32.mxu1 %v5041_v50  ;;  %v3266_v40 = vld [vmem:[%s6627_s1 + $0x118] sm:$0xff]  ;;  %v377_v61 = vrot.slane %v5070_v12, 1  ;;  %v5095_v50 = vsel %vm338_vm0, %v374_v37, %v375_v45  ;;  %v920_v37 = vrot.slane %v4710_v16, 2 }
  0x4f   : > { %3915 = vmatpush3.msra.mxu1 %v278_v29  ;;  %3994 = vmatprep.subr.mxu0 %v3267_v28  ;;  %v276_v29 = vld [vmem:[%s6627_s1 + $0x10] sm:$0xff] }
  0x50   : > { %3862 = vmatprep.mubr.f32.mxu0 %v5058_v48  ;;  %3887 = vmatmul.mubr.f32.gmra.mxu1 %v5061_v36  ;;  %v3265_v36 = vld [vmem:[%s6627_s1 + $0x110] sm:$0xff]  ;;  %v5098_v48 = vsel %vm338_vm0, %v415_v10, %v417_v60  ;;  %v3264_v60 = vld [vmem:[%s6627_s1 + $0x108] sm:$0xff]  ;;  %v274_v10 = vld [vmem:[%s6627_s1] sm:$0xff] }
  0x51   : > { %3916 = vmatprep.subr.mxu1 %v277_v49  ;;  %3995 = vmatpush3.msra.mxu0 %v3267_v28  ;;  %6722 = vst [vmem:[#allocation27_spill] sm:$0xff] %v5098_v48  ;;  %v5105_v28 = vsel %vm338_vm0, %v375_v45, %v377_v61  ;;  %v3263_v45 = vld [vmem:[%s6627_s1 + $0x100] sm:$0xff]  ;;  %v925_v61 = vrot.slane %v4746_v32, 2 }
  0x52   : > { %3863 = vmatmul.mubr.f32.gmra.mxu0 %v5073_v62  ;;  %3917 = vmatpush3.msra.mxu1 %v277_v49  ;;  %v919_v49 = vrot.slane %v4707_v15, 2 }
  0x53   : > { %3996 = vmatprep.subr.mxu0 %v3266_v40  ;;  %3918 = vmatprep.subr.mxu1 %v276_v29 }
  0x54   : > { %3997 = vmatpush3.msra.mxu0 %v3266_v40  ;;  %3889 = vmatprep.mubr.f32.mxu1 %v5087_v38  ;;  %v922_v40 = vrot.slane %v4721_v21, 2  ;;  %v3294_v21 = vld [vmem:[%s6627_s1 + $0x1f8] sm:$0xff] }
  0x55   : > { %3919 = vmatpush3.msra.mxu1 %v276_v29  ;;  %3998 = vmatprep.subr.mxu0 %v3265_v36  ;;  %v921_v29 = vsel %vm918_vm1, %v919_v49, %v920_v37 }
  0x56   : > { %3865 = vmatprep.mubr.f32.mxu0 %v5095_v50  ;;  %3890 = vmatmul.mubr.f32.gmra.mxu1 %v5098_v48  ;;  %v927_v48 = vrot.slane %v4761_v39, 2  ;;  %v929_v39 = vrot.slane %v4789_v51, 2 }
  0x57   : > { %3920 = vmatprep.subr.mxu1 %v275_v22  ;;  %3999 = vmatpush3.msra.mxu0 %v3265_v36  ;;  %v924_v36 = vrot.slane %v4743_v31, 2 }
  0x58   : > { %3866 = vmatmul.mubr.f32.gmra.mxu0 %v5105_v28  ;;  %3921 = vmatpush3.msra.mxu1 %v275_v22  ;;  %v923_v22 = vsel %vm918_vm1, %v920_v37, %v922_v40  ;;  %v5145_v49 = vsel %vm918_vm1, %v925_v61, %v927_v48  ;;  %v932_v37 = vrot.slane %v4810_v59, 2  ;;  %v3309_v40 = vld [vmem:[%s6627_s1 + $0x270] sm:$0xff]  ;;  %v3292_v59 = vld [vmem:[%s6627_s1 + $0x1e8] sm:$0xff]  ;;  %v934_v48 = vrot.slane %v4841_v7, 2 }
  0x59   : > { %4000 = vmatprep.subr.mxu0 %v3264_v60  ;;  %3922 = vmatprep.subr.mxu1 %v274_v10 }
  0x5a   : > { %4001 = vmatpush3.msra.mxu0 %v3264_v60  ;;  %3923 = vmatpush3.msra.mxu1 %v274_v10  ;;  %v3310_v60 = vld [vmem:[%s6627_s1 + $0x278] sm:$0xff]  ;;  %v5136_v10 = vsel %vm918_vm1, %v924_v36, %v925_v61  ;;  %v937_v36 = vrot.slane %v4862_v20, 2  ;;  %v3308_v61 = vld [vmem:[%s6627_s1 + $0x268] sm:$0xff]  ;;  %v3291_v20 = vld [vmem:[%s6627_s1 + $0x1e0] sm:$0xff] }
  0x5b   : > { %3924 = vmatprep.mubr.f32.mxu1 %v4707_v15  ;;  %4002 = vmatprep.subr.mxu0 %v3263_v45  ;;  %v3293_v15 = vld [vmem:[%s6627_s1 + $0x1f0] sm:$0xff] }
  0x5c   : > { %3925 = vmatmul.mubr.f32.vlgmr.msra.gmra.mxu1 %v4710_v16  ;;  %4003 = vmatpush3.msra.mxu0 %v3263_v45  ;;  %v930_v16 = vrot.slane %v4792_v52, 2 }
  0x5d   : > { %4004 = vmatprep.mubr.f32.mxu0 %v921_v29  ;;  %4052 = vmatprep.subr.mxu1 %v3294_v21  ;;  %v935_v29 = vrot.slane %v4844_v8, 2 }
  0x5e   : > { %4005 = vmatmul.mubr.f32.vlgmr.msra.gmra.mxu0 %v923_v22  ;;  %4053 = vmatpush3.msra.mxu1 %v3294_v21  ;;  %v5155_v45 = vsel %vm918_vm1, %v929_v39, %v930_v16  ;;  %v5164_v21 = vsel %vm918_vm1, %v930_v16, %v932_v37  ;;  %v942_v16 = vrot.slane %v4914_v57, 2  ;;  %v3307_v37 = vld [vmem:[%s6627_s1 + $0x260] sm:$0xff]  ;;  %v3290_v57 = vld [vmem:[%s6627_s1 + $0x1d8] sm:$0xff] }
  0x5f   : > { %4132 = vmatprep.subr.mxu0 %v3310_v60  ;;  %3927 = vmatprep.mubr.f32.mxu1 %v4743_v31  ;;  %v5174_v22 = vsel %vm918_vm1, %v934_v48, %v935_v29  ;;  %v5183_v39 = vsel %vm918_vm1, %v935_v29, %v937_v36  ;;  %v945_v48 = vrot.slane %v4948_v24, 2  ;;  %v947_v36 = vrot.slane %v4966_v56, 2  ;;  %v3289_v56 = vld [vmem:[%s6627_s1 + $0x1d0] sm:$0xff] }
  0x60   : > { %4133 = vmatpush3.msra.mxu0 %v3310_v60  ;;  %3928 = vmatmul.mubr.f32.gmra.mxu1 %v4746_v32  ;;  %v939_v60 = vrot.slane %v4893_v41, 2 }
  0x61   : > { %4007 = vmatprep.mubr.f32.mxu0 %v5136_v10  ;;  %4054 = vmatprep.subr.mxu1 %v3293_v15 }
  0x62   : > { %4008 = vmatmul.mubr.f32.gmra.mxu0 %v5145_v49  ;;  %4055 = vmatpush3.msra.mxu1 %v3293_v15  ;;  %v940_v15 = vrot.slane %v4896_v42, 2 }
  0x63   : > { %4134 = vmatprep.subr.mxu0 %v3309_v40  ;;  %3930 = vmatprep.mubr.f32.mxu1 %v4789_v51 }
  0x64   : > { %4135 = vmatpush3.msra.mxu0 %v3309_v40  ;;  %3931 = vmatmul.mubr.f32.gmra.mxu1 %v4792_v52  ;;  %v5193_v40 = vsel %vm918_vm1, %v939_v60, %v940_v15  ;;  %v5202_v29 = vsel %vm918_vm1, %v940_v15, %v942_v16  ;;  %v949_v60 = vrot.slane %v4997_v11, 2  ;;  %v950_v15 = vrot.slane %v5000_v4, 2 }
  0x65   : > { %4010 = vmatprep.mubr.f32.mxu0 %v5155_v45  ;;  %4056 = vmatprep.subr.mxu1 %v3292_v59  ;;  %v5221_v16 = vsel %vm918_vm1, %v945_v48, %v947_v36  ;;  %v955_v36 = vrot.slane %v5052_v58, 2 }
  0x66   : > { %4011 = vmatmul.mubr.f32.gmra.mxu0 %v5164_v21  ;;  %4057 = vmatpush3.msra.mxu1 %v3292_v59  ;;  %v944_v59 = vrot.slane %v4945_v23, 2  ;;  %6723 = vst [vmem:[#allocation28_spill] sm:$0xff] %v5221_v16 }
  0x67   : > { %4136 = vmatprep.subr.mxu0 %v3308_v61  ;;  %3933 = vmatprep.mubr.f32.mxu1 %v4841_v7 }
  0x68   : > { %4137 = vmatpush3.msra.mxu0 %v3308_v61  ;;  %3934 = vmatmul.mubr.f32.gmra.mxu1 %v4844_v8  ;;  %v3306_v61 = vld [vmem:[%s6627_s1 + $0x258] sm:$0xff] }
  0x69   : > { %4013 = vmatprep.mubr.f32.mxu0 %v5174_v22  ;;  %4058 = vmatprep.subr.mxu1 %v3291_v20 }
  0x6a   : > { %4014 = vmatmul.mubr.f32.gmra.mxu0 %v5183_v39  ;;  %4059 = vmatpush3.msra.mxu1 %v3291_v20  ;;  %v5212_v20 = vsel %vm918_vm1, %v944_v59, %v945_v48  ;;  %v5231_v59 = vsel %vm918_vm1, %v949_v60, %v950_v15  ;;  %v954_v48 = vrot.slane %v5049_v17, 2 }
  0x6b   : > { %4138 = vmatprep.subr.mxu0 %v3307_v37  ;;  %3936 = vmatprep.mubr.f32.mxu1 %v4893_v41 }
  0x6c   : > { %4139 = vmatpush3.msra.mxu0 %v3307_v37  ;;  %3937 = vmatmul.mubr.f32.gmra.mxu1 %v4896_v42  ;;  %v952_v37 = vrot.slane %v5018_v30, 2  ;;  %v3288_v30 = vld [vmem:[%s6627_s1 + $0x1c8] sm:$0xff]  ;;  %v5250_v60 = vsel %vm918_vm1, %v954_v48, %v955_v36 }
  0x6d   : > { %4016 = vmatprep.mubr.f32.mxu0 %v5193_v40  ;;  %4060 = vmatprep.subr.mxu1 %v3290_v57 }
  0x6e   : > { %4017 = vmatmul.mubr.f32.gmra.mxu0 %v5202_v29  ;;  %4061 = vmatpush3.msra.mxu1 %v3290_v57  ;;  %v3305_v57 = vld [vmem:[%s6627_s1 + $0x250] sm:$0xff] }
  0x6f   : > { %4140 = vmatprep.subr.mxu0 %v3306_v61  ;;  %3939 = vmatprep.mubr.f32.mxu1 %v4945_v23 }
  0x70   : > { %4141 = vmatpush3.msra.mxu0 %v3306_v61  ;;  %3940 = vmatmul.mubr.f32.gmra.mxu1 %v4948_v24  ;;  %v5240_v61 = vsel %vm918_vm1, %v950_v15, %v952_v37  ;;  %v959_v15 = vrot.slane %v4701_v13, 2  ;;  %v960_v37 = vrot.slane %v4704_v14, 2 }
  0x71   : > { %4019 = vmatprep.mubr.f32.mxu0 %v5212_v20  ;;  %4062 = vmatprep.subr.mxu1 %v3289_v56  ;;  %6724 = vst [vmem:[#allocation29_spill] sm:$0xff] %v5240_v61 }
  0x72   : > { %4020 = vmatmul.mubr.f32.gmra.mxu0 %v5221_v16  ;;  %4063 = vmatpush3.msra.mxu1 %v3289_v56  ;;  %v957_v16 = vrot.slane %v5070_v12, 2  ;;  %v3304_v56 = vld [vmem:[%s6627_s1 + $0x248] sm:$0xff]  ;;  %v3287_v12 = vld [vmem:[%s6627_s1 + $0x1c0] sm:$0xff]  ;;  %v5269_v48 = vsel %vm918_vm1, %v959_v15, %v960_v37 }
  0x73   : > { %4142 = vmatprep.subr.mxu0 %v3305_v57  ;;  %3942 = vmatprep.mubr.f32.mxu1 %v4997_v11 }
  0x74   : > { %4143 = vmatpush3.msra.mxu0 %v3305_v57  ;;  %3943 = vmatmul.mubr.f32.gmra.mxu1 %v5000_v4  ;;  %v5259_v57 = vsel %vm918_vm1, %v955_v36, %v957_v16  ;;  %v964_v16 = vrot.slane %v4730_v26, 2  ;;  %v965_v36 = vrot.slane %v4733_v27, 2 }
  0x75   : > { %4022 = vmatprep.mubr.f32.mxu0 %v5231_v59  ;;  %4064 = vmatprep.subr.mxu1 %v3288_v30  ;;  %6725 = vst [vmem:[#allocation30_spill] sm:$0xff] %v5259_v57 }
  0x76   : > { %4023 = vmatmul.mubr.f32.gmra.mxu0 %v5240_v61  ;;  %4065 = vmatpush3.msra.mxu1 %v3288_v30  ;;  %v962_v61 = vrot.slane %v4716_v18, 2  ;;  %v3303_v30 = vld [vmem:[%s6627_s1 + $0x240] sm:$0xff]  ;;  %v3286_v18 = vld [vmem:[%s6627_s1 + $0x1b8] sm:$0xff] }
  0x77   : > { %4144 = vmatprep.subr.mxu0 %v3304_v56  ;;  %3945 = vmatprep.mubr.f32.mxu1 %v5049_v17 }
  0x78   : > { %4145 = vmatpush3.msra.mxu0 %v3304_v56  ;;  %3946 = vmatmul.mubr.f32.gmra.mxu1 %v5052_v58  ;;  %v5278_v56 = vsel %vm918_vm1, %v960_v37, %v962_v61  ;;  %v969_v61 = vrot.slane %v4775_v46, 2  ;;  %v972_v37 = vrot.slane %v4795_v53, 2  ;;  %v3284_v53 = vld [vmem:[%s6627_s1 + $0x1a8] sm:$0xff] }
  0x79   : > { %4025 = vmatprep.mubr.f32.mxu0 %v5250_v60  ;;  %4066 = vmatprep.subr.mxu1 %v3287_v12 }
  0x7a   : > { %4026 = vmatmul.mubr.f32.gmra.mxu0 %v5259_v57  ;;  %4067 = vmatpush3.msra.mxu1 %v3287_v12  ;;  %v967_v57 = vrot.slane %v4749_v33, 2  ;;  %v3302_v12 = vld [vmem:[%s6627_s1 + $0x238] sm:$0xff]  ;;  %v3285_v33 = vld [vmem:[%s6627_s1 + $0x1b0] sm:$0xff] }
  0x7b   : > { %4146 = vmatprep.subr.mxu0 %v3303_v30  ;;  %3948 = vmatprep.mubr.f32.mxu1 %v4701_v13  ;;  %v5288_v13 = vsel %vm918_vm1, %v964_v16, %v965_v36  ;;  %v977_v16 = vrot.slane %v4847_v9, 2  ;;  %v3283_v9 = vld [vmem:[%s6627_s1 + $0x1a0] sm:$0xff] }
  0x7c   : > { %4147 = vmatpush3.msra.mxu0 %v3303_v30  ;;  %3949 = vmatmul.mubr.f32.gmra.mxu1 %v4704_v14  ;;  %v970_v14 = vrot.slane %v4778_v47, 2  ;;  %v5297_v15 = vsel %vm918_vm1, %v965_v36, %v967_v57  ;;  %v3301_v30 = vld [vmem:[%s6627_s1 + $0x230] sm:$0xff]  ;;  %v974_v57 = vrot.slane %v4827_v2, 2  ;;  %v3300_v36 = vld [vmem:[%s6627_s1 + $0x228] sm:$0xff] }
  0x7d   : > { %4028 = vmatprep.mubr.f32.mxu0 %v5269_v48  ;;  %4068 = vmatprep.subr.mxu1 %v3286_v18 }
  0x7e   : > { %4029 = vmatmul.mubr.f32.gmra.mxu0 %v5278_v56  ;;  %4069 = vmatpush3.msra.mxu1 %v3286_v18  ;;  %v5316_v18 = vsel %vm918_vm1, %v970_v14, %v972_v37  ;;  %v984_v37 = vrot.slane %v4931_v5, 2 }
  0x7f   : > { %4148 = vmatprep.subr.mxu0 %v3302_v12  ;;  %3951 = vmatprep.mubr.f32.mxu1 %v4730_v26  ;;  %v5307_v26 = vsel %vm918_vm1, %v969_v61, %v970_v14  ;;  %v982_v61 = vrot.slane %v4899_v43, 2  ;;  %v3299_v14 = vld [vmem:[%s6627_s1 + $0x220] sm:$0xff]  ;;  %v3282_v43 = vld [vmem:[%s6627_s1 + $0x198] sm:$0xff] }
  0x80   : > { %4149 = vmatpush3.msra.mxu0 %v3302_v12  ;;  %3952 = vmatmul.mubr.f32.gmra.mxu1 %v4733_v27  ;;  %v975_v27 = vrot.slane %v4830_v3, 2  ;;  %v979_v12 = vrot.slane %v4879_v34, 2 }
  0x81   : > { %4031 = vmatprep.mubr.f32.mxu0 %v5288_v13  ;;  %4070 = vmatprep.subr.mxu1 %v3285_v33 }
  0x82   : > { %4032 = vmatmul.mubr.f32.gmra.mxu0 %v5297_v15  ;;  %4071 = vmatpush3.msra.mxu1 %v3285_v33  ;;  %v5335_v33 = vsel %vm918_vm1, %v975_v27, %v977_v16  ;;  %v989_v16 = vrot.slane %v4983_v1, 2 }
  0x83   : > { %4150 = vmatprep.subr.mxu0 %v3301_v30  ;;  %3954 = vmatprep.mubr.f32.mxu1 %v4775_v46  ;;  %v5326_v46 = vsel %vm918_vm1, %v974_v57, %v975_v27  ;;  %v3298_v57 = vld [vmem:[%s6627_s1 + $0x218] sm:$0xff] }
  0x84   : > { %4151 = vmatpush3.msra.mxu0 %v3301_v30  ;;  %3955 = vmatmul.mubr.f32.gmra.mxu1 %v4778_v47  ;;  %v980_v47 = vrot.slane %v4882_v35, 2 }
  0x85   : > { %4034 = vmatprep.mubr.f32.mxu0 %v5307_v26  ;;  %4072 = vmatprep.subr.mxu1 %v3284_v53 }
  0x86   : > { %4035 = vmatmul.mubr.f32.gmra.mxu0 %v5316_v18  ;;  %4073 = vmatpush3.msra.mxu1 %v3284_v53  ;;  %v5354_v30 = vsel %vm918_vm1, %v980_v47, %v982_v61  ;;  %v987_v53 = vrot.slane %v4951_v25, 2  ;;  %v3281_v25 = vld [vmem:[%s6627_s1 + $0x190] sm:$0xff]  ;;  %v994_v61 = vrot.slane %v5035_v0, 2 }
  0x87   : > { %4152 = vmatprep.subr.mxu0 %v3300_v36  ;;  %3957 = vmatprep.mubr.f32.mxu1 %v4827_v2  ;;  %v5345_v2 = vsel %vm918_vm1, %v979_v12, %v980_v47  ;;  %6727 = vst [vmem:[#allocation32_spill] sm:$0xff] %v5354_v30  ;;  %v3297_v12 = vld [vmem:[%s6627_s1 + $0x210] sm:$0xff] }
  0x88   : > { %4153 = vmatpush3.msra.mxu0 %v3300_v36  ;;  %3958 = vmatmul.mubr.f32.gmra.mxu1 %v4830_v3  ;;  %6726 = vst [vmem:[#allocation31_spill] sm:$0xff] %v5345_v2  ;;  %v985_v3 = vrot.slane %v4934_v6, 2 }
  0x89   : > { %4037 = vmatprep.mubr.f32.mxu0 %v5326_v46  ;;  %4074 = vmatprep.subr.mxu1 %v3283_v9 }
  0x8a   : > { %4038 = vmatmul.mubr.f32.gmra.mxu0 %v5335_v33  ;;  %4075 = vmatpush3.msra.mxu1 %v3283_v9  ;;  %v5364_v27 = vsel %vm918_vm1, %v984_v37, %v985_v3  ;;  %v5373_v36 = vsel %vm918_vm1, %v985_v3, %v987_v53  ;;  %v992_v9 = vrot.slane %v5003_v55, 2  ;;  %v3280_v55 = vld [vmem:[%s6627_s1 + $0x188] sm:$0xff]  ;;  %v997_v37 = vrot.slane %v5055_v44, 2  ;;  %v3279_v44 = vld [vmem:[%s6627_s1 + $0x180] sm:$0xff] }
  0x8b   : > { %4154 = vmatprep.subr.mxu0 %v3299_v14  ;;  %3960 = vmatprep.mubr.f32.mxu1 %v4879_v34  ;;  %6728 = vst [vmem:[#allocation33_spill] sm:$0xff] %v5364_v27  ;;  %6729 = vst [vmem:[#allocation34_spill] sm:$0xff] %v5373_v36  ;;  %v3296_v3 = vld [vmem:[%s6627_s1 + $0x208] sm:$0xff] }
  0x8c   : > { %4155 = vmatpush3.msra.mxu0 %v3299_v14  ;;  %3961 = vmatmul.mubr.f32.gmra.mxu1 %v4882_v35  ;;  %v990_v35 = vrot.slane %v4986_v19, 2  ;;  %v995_v14 = vrot.slane %v5038_v63, 2 }
  0x8d   : > { %4040 = vmatprep.mubr.f32.mxu0 %v5345_v2  ;;  %4076 = vmatprep.subr.mxu1 %v3282_v43 }
  0x8e   : > { %4041 = vmatmul.mubr.f32.gmra.mxu0 %v5354_v30  ;;  %4077 = vmatpush3.msra.mxu1 %v3282_v43  ;;  %v5383_v47 = vsel %vm918_vm1, %v989_v16, %v990_v35  ;;  %v5392_v43 = vsel %vm918_vm1, %v990_v35, %v992_v9  ;;  %v5402_v53 = vsel %vm918_vm1, %v994_v61, %v995_v14  ;;  %v3326_v16 = vld [vmem:[%s6627_s1 + $0x2f8] sm:$0xff]  ;;  %v6732_v9 = vld [vmem:[#allocation6_spill] sm:$0xff] }
  0x8f   : > { %4156 = vmatprep.subr.mxu0 %v3298_v57  ;;  %3963 = vmatprep.mubr.f32.mxu1 %v4931_v5  ;;  %6730 = vst [vmem:[#allocation35_spill] sm:$0xff] %v5392_v43  ;;  %v3342_v35 = vld [vmem:[%s6627_s1 + $0x378] sm:$0xff]  ;;  %v6736_v61 = vld [vmem:[#allocation14_spill] sm:$0xff] }
  0x90   : > { %4157 = vmatpush3.msra.mxu0 %v3298_v57  ;;  %3964 = vmatmul.mubr.f32.gmra.mxu1 %v4934_v6  ;;  %v5409_v57 = vsel %vm918_vm1, %v995_v14, %v997_v37  ;;  %v3323_v14 = vld [vmem:[%s6627_s1 + $0x2e0] sm:$0xff] }
  0x91   : > { %4043 = vmatprep.mubr.f32.mxu0 %v5364_v27  ;;  %4078 = vmatprep.subr.mxu1 %v3281_v25  ;;  %6731 = vst [vmem:[#allocation36_spill] sm:$0xff] %v5409_v57  ;;  %v6738_v37 = vld [vmem:[#allocation18_spill] sm:$0xff] }
  0x92   : > { %4044 = vmatmul.mubr.f32.gmra.mxu0 %v5373_v36  ;;  %4079 = vmatpush3.msra.mxu1 %v3281_v25  ;;  %v3295_v25 = vld [vmem:[%s6627_s1 + $0x200] sm:$0xff] }
  0x93   : > { %4158 = vmatprep.subr.mxu0 %v3297_v12  ;;  %3966 = vmatprep.mubr.f32.mxu1 %v4983_v1 }
  0x94   : > { %4159 = vmatpush3.msra.mxu0 %v3297_v12  ;;  %3967 = vmatmul.mubr.f32.gmra.mxu1 %v4986_v19  ;;  %v3325_v12 = vld [vmem:[%s6627_s1 + $0x2f0] sm:$0xff] }
  0x95   : > { %4046 = vmatprep.mubr.f32.mxu0 %v5383_v47  ;;  %4080 = vmatprep.subr.mxu1 %v3280_v55 }
  0x96   : > { %4047 = vmatmul.mubr.f32.gmra.mxu0 %v5392_v43  ;;  %4081 = vmatpush3.msra.mxu1 %v3280_v55  ;;  %v3324_v55 = vld [vmem:[%s6627_s1 + $0x2e8] sm:$0xff] }
  0x97   : > { %4160 = vmatprep.subr.mxu0 %v3296_v3  ;;  %3969 = vmatprep.mubr.f32.mxu1 %v5035_v0 }
  0x98   : > { %4161 = vmatpush3.msra.mxu0 %v3296_v3  ;;  %3970 = vmatmul.mubr.f32.gmra.mxu1 %v5038_v63  ;;  %v3322_v3 = vld [vmem:[%s6627_s1 + $0x2d8] sm:$0xff] }
  0x99   : > { %4049 = vmatprep.mubr.f32.mxu0 %v5402_v53  ;;  %4082 = vmatprep.subr.mxu1 %v3279_v44 }
  0x9a   : > { %4050 = vmatmul.mubr.f32.gmra.mxu0 %v5409_v57  ;;  %4083 = vmatpush3.msra.mxu1 %v3279_v44  ;;  %v6740_v44 = vld [vmem:[#allocation22_spill] sm:$0xff] }
  0x9b   : > { %4162 = vmatprep.subr.mxu0 %v3295_v25  ;;  %4084 = vmatprep.mubr.f32.mxu1 %v4743_v31  ;;  %v3341_v31 = vld [vmem:[%s6627_s1 + $0x370] sm:$0xff] }
  0x9c   : > { %4163 = vmatpush3.msra.mxu0 %v3295_v25  ;;  %4085 = vmatmul.mubr.f32.vlgmr.msra.gmra.mxu1 %v4746_v32  ;;  %v6733_v32 = vld [vmem:[#allocation8_spill] sm:$0xff] }
  0x9d   : > { %4164 = vmatprep.mubr.f32.mxu0 %v4798_v54  ;;  %4212 = vmatprep.subr.mxu1 %v3326_v16  ;;  %v6734_v54 = vld [vmem:[#allocation10_spill] sm:$0xff]  ;;  %v3321_v25 = vld [vmem:[%s6627_s1 + $0x2d0] sm:$0xff] }
  0x9e   : > { %4165 = vmatmul.mubr.f32.vlgmr.msra.gmra.mxu0 %v6732_v9  ;;  %4213 = vmatpush3.msra.mxu1 %v3326_v16  ;;  %v3320_v16 = vld [vmem:[%s6627_s1 + $0x2c8] sm:$0xff]  ;;  %v6742_v9 = vld [vmem:[#allocation2_spill] sm:$0xff] }
  0x9f   : > { %4292 = vmatprep.subr.mxu0 %v3342_v35  ;;  %4087 = vmatprep.mubr.f32.mxu1 %v4789_v51  ;;  %v3340_v51 = vld [vmem:[%s6627_s1 + $0x368] sm:$0xff] }
  0xa0   : > { %4293 = vmatpush3.msra.mxu0 %v3342_v35  ;;  %4088 = vmatmul.mubr.f32.gmra.mxu1 %v4792_v52  ;;  %v6735_v52 = vld [vmem:[#allocation12_spill] sm:$0xff]  ;;  %v3335_v35 = vld [vmem:[%s6627_s1 + $0x340] sm:$0xff] }
  0xa1   : > { %4167 = vmatprep.mubr.f32.mxu0 %v6733_v32  ;;  %4214 = vmatprep.subr.mxu1 %v3325_v12 }
  0xa2   : > { %4168 = vmatmul.mubr.f32.gmra.mxu0 %v6734_v54  ;;  %4215 = vmatpush3.msra.mxu1 %v3325_v12  ;;  %v6743_v12 = vld [vmem:[#allocation3_spill] sm:$0xff] }
  0xa3   : > { %4294 = vmatprep.subr.mxu0 %v3341_v31  ;;  %4090 = vmatprep.mubr.f32.mxu1 %v4841_v7  ;;  %v3339_v7 = vld [vmem:[%s6627_s1 + $0x360] sm:$0xff] }
  0xa4   : > { %4295 = vmatpush3.msra.mxu0 %v3341_v31  ;;  %4091 = vmatmul.mubr.f32.gmra.mxu1 %v4844_v8  ;;  %v6737_v8 = vld [vmem:[#allocation16_spill] sm:$0xff]  ;;  %v3318_v31 = vld [vmem:[%s6627_s1 + $0x2b8] sm:$0xff] }
  0xa5   : > { %4170 = vmatprep.mubr.f32.mxu0 %v6735_v52  ;;  %4216 = vmatprep.subr.mxu1 %v3324_v55 }
  0xa6   : > { %4171 = vmatmul.mubr.f32.gmra.mxu0 %v6736_v61  ;;  %4217 = vmatpush3.msra.mxu1 %v3324_v55  ;;  %v5507_v55 = vld [vmem:[%s4692_s23 + $0xd8] sm:$0xff] }
  0xa7   : > { %4296 = vmatprep.subr.mxu0 %v3340_v51  ;;  %4093 = vmatprep.mubr.f32.mxu1 %v4893_v41  ;;  %v3338_v41 = vld [vmem:[%s6627_s1 + $0x358] sm:$0xff] }
  0xa8   : > { %4297 = vmatpush3.msra.mxu0 %v3340_v51  ;;  %4094 = vmatmul.mubr.f32.gmra.mxu1 %v4896_v42  ;;  %v6739_v42 = vld [vmem:[#allocation20_spill] sm:$0xff]  ;;  %v5511_v51 = vld [vmem:[%s4692_s23 + $0xe0] sm:$0xff] }
  0xa9   : > { %4173 = vmatprep.mubr.f32.mxu0 %v6737_v8  ;;  %4218 = vmatprep.subr.mxu1 %v3323_v14 }
  0xaa   : > { %4174 = vmatmul.mubr.f32.gmra.mxu0 %v6738_v37  ;;  %4219 = vmatpush3.msra.mxu1 %v3323_v14  ;;  %v3334_v14 = vld [vmem:[%s6627_s1 + $0x338] sm:$0xff] }
  0xab   : > { %4298 = vmatprep.subr.mxu0 %v3339_v7  ;;  %4096 = vmatprep.mubr.f32.mxu1 %v4945_v23  ;;  %v3337_v23 = vld [vmem:[%s6627_s1 + $0x350] sm:$0xff] }
  0xac   : > { %4299 = vmatpush3.msra.mxu0 %v3339_v7  ;;  %4097 = vmatmul.mubr.f32.gmra.mxu1 %v4948_v24  ;;  %v6741_v24 = vld [vmem:[#allocation24_spill] sm:$0xff] }
  0xad   : > { %4176 = vmatprep.mubr.f32.mxu0 %v6739_v42  ;;  %4220 = vmatprep.subr.mxu1 %v3322_v3  ;;  %v6744_v7 = vld [vmem:[#allocation4_spill] sm:$0xff] }
  0xae   : > { %4177 = vmatmul.mubr.f32.gmra.mxu0 %v6740_v44  ;;  %4221 = vmatpush3.msra.mxu1 %v3322_v3  ;;  %v6745_v3 = vld [vmem:[#allocation5_spill] sm:$0xff] }
  0xaf   : > { %4300 = vmatprep.subr.mxu0 %v3338_v41  ;;  %4099 = vmatprep.mubr.f32.mxu1 %v4997_v11  ;;  %v3319_v11 = vld [vmem:[%s6627_s1 + $0x2c0] sm:$0xff] }
  0xb0   : > { %4301 = vmatpush3.msra.mxu0 %v3338_v41  ;;  %4100 = vmatmul.mubr.f32.gmra.mxu1 %v5000_v4  ;;  %v3336_v4 = vld [vmem:[%s6627_s1 + $0x348] sm:$0xff]  ;;  %v3317_v41 = vld [vmem:[%s6627_s1 + $0x2b0] sm:$0xff] }
  0xb1   : > { %4179 = vmatprep.mubr.f32.mxu0 %v6741_v24  ;;  %4222 = vmatprep.subr.mxu1 %v3321_v25 }
  0xb2   : > { %4180 = vmatmul.mubr.f32.gmra.mxu0 %v5073_v62  ;;  %4223 = vmatpush3.msra.mxu1 %v3321_v25  ;;  %v5523_v25 = vld [vmem:[%s4692_s23 + $0xf0] sm:$0xff] }
  0xb3   : > { %4302 = vmatprep.subr.mxu0 %v3337_v23  ;;  %4102 = vmatprep.mubr.f32.mxu1 %v5049_v17  ;;  %v5491_v17 = vld [vmem:[%s4692_s23 + $0xc0] sm:$0xff] }
  0xb4   : > { %4303 = vmatpush3.msra.mxu0 %v3337_v23  ;;  %4103 = vmatmul.mubr.f32.gmra.mxu1 %v5052_v58  ;;  %v5495_v58 = vld [vmem:[%s4692_s23 + $0xc8] sm:$0xff]  ;;  %v5527_v23 = vld [vmem:[%s4692_s23 + $0xf8] sm:$0xff] }
  0xb5   : > { %4182 = vmatprep.mubr.f32.mxu0 %v5095_v50  ;;  %4224 = vmatprep.subr.mxu1 %v3320_v16 }
  0xb6   : > { %4183 = vmatmul.mubr.f32.gmra.mxu0 %v5105_v28  ;;  %4225 = vmatpush3.msra.mxu1 %v3320_v16  ;;  %v3333_v16 = vld [vmem:[%s6627_s1 + $0x330] sm:$0xff] }
  0xb7   : > { %4304 = vmatprep.subr.mxu0 %v3336_v4  ;;  %4105 = vmatprep.mubr.f32.mxu1 %v5491_v17 }
  0xb8   : > { %4305 = vmatpush3.msra.mxu0 %v3336_v4  ;;  %4106 = vmatmul.mubr.f32.gmra.mxu1 %v5495_v58  ;;  %v6746_v4 = vld [vmem:[#allocation7_spill] sm:$0xff] }
  0xb9   : > { %4185 = vmatprep.mubr.f32.mxu0 %v6742_v9  ;;  %4226 = vmatprep.subr.mxu1 %v3319_v11 }
  0xba   : > { %4186 = vmatmul.mubr.f32.gmra.mxu0 %v6743_v12  ;;  %4227 = vmatpush3.msra.mxu1 %v3319_v11  ;;  %v6747_v11 = vld [vmem:[#allocation9_spill] sm:$0xff] }
  0xbb   : > { %4306 = vmatprep.subr.mxu0 %v3335_v35  ;;  %4108 = vmatprep.mubr.f32.mxu1 %v5507_v55 }
  0xbc   : > { %4307 = vmatpush3.msra.mxu0 %v3335_v35  ;;  %4109 = vmatmul.mubr.f32.gmra.mxu1 %v5511_v51  ;;  %v3316_v35 = vld [vmem:[%s6627_s1 + $0x2a8] sm:$0xff] }
  0xbd   : > { %4188 = vmatprep.mubr.f32.mxu0 %v6744_v7  ;;  %4228 = vmatprep.subr.mxu1 %v3318_v31  ;;  %v6750_v7 = vld [vmem:[#allocation15_spill] sm:$0xff] }
  0xbe   : > { %4189 = vmatmul.mubr.f32.gmra.mxu0 %v6745_v3  ;;  %4229 = vmatpush3.msra.mxu1 %v3318_v31  ;;  %v5539_v31 = vld [vmem:[%s4692_s23 + $0x108] sm:$0xff]  ;;  %v3315_v3 = vld [vmem:[%s6627_s1 + $0x2a0] sm:$0xff] }
  0xbf   : > { %4308 = vmatprep.subr.mxu0 %v3334_v14  ;;  %4111 = vmatprep.mubr.f32.mxu1 %v5523_v25 }
  0xc0   : > { %4309 = vmatpush3.msra.mxu0 %v3334_v14  ;;  %4112 = vmatmul.mubr.f32.gmra.mxu1 %v5527_v23  ;;  %v5543_v14 = vld [vmem:[%s4692_s23 + $0x110] sm:$0xff] }
  0xc1   : > { %4191 = vmatprep.mubr.f32.mxu0 %v6746_v4  ;;  %4230 = vmatprep.subr.mxu1 %v3317_v41  ;;  %v6749_v4 = vld [vmem:[#allocation13_spill] sm:$0xff] }
  0xc2   : > { %4192 = vmatmul.mubr.f32.gmra.mxu0 %v6747_v11  ;;  %4231 = vmatpush3.msra.mxu1 %v3317_v41  ;;  %v3332_v11 = vld [vmem:[%s6627_s1 + $0x328] sm:$0xff] }
  0xc3   : > { %4310 = vmatprep.subr.mxu0 %v3333_v16  ;;  %4114 = vmatprep.mubr.f32.mxu1 %v5539_v31  ;;  %v6748_v41 = vld [vmem:[#allocation11_spill] sm:$0xff] }
  0xc4   : > { %4311 = vmatpush3.msra.mxu0 %v3333_v16  ;;  %4115 = vmatmul.mubr.f32.gmra.mxu1 %v5543_v14  ;;  %v5556_v16 = vld [vmem:[%s4692_s23 + $0x128] sm:$0xff] }
  0xc5   : > { %4194 = vmatprep.mubr.f32.mxu0 %v6748_v41  ;;  %4232 = vmatprep.subr.mxu1 %v3316_v35  ;;  %v3331_v41 = vld [vmem:[%s6627_s1 + $0x320] sm:$0xff] }
  0xc6   : > { %4195 = vmatmul.mubr.f32.gmra.mxu0 %v6749_v4  ;;  %4233 = vmatpush3.msra.mxu1 %v3316_v35  ;;  %v6751_v35 = vld [vmem:[#allocation17_spill] sm:$0xff] }
  0xc7   : > { %4312 = vmatprep.subr.mxu0 %v3332_v11  ;;  %4117 = vmatprep.mubr.f32.mxu1 %v4879_v34  ;;  %v3314_v34 = vld [vmem:[%s6627_s1 + $0x298] sm:$0xff] }
  0xc8   : > { %4313 = vmatpush3.msra.mxu0 %v3332_v11  ;;  %4118 = vmatmul.mubr.f32.gmra.mxu1 %v5556_v16  ;;  %v3330_v11 = vld [vmem:[%s6627_s1 + $0x318] sm:$0xff] }
  0xc9   : > { %4197 = vmatprep.mubr.f32.mxu0 %v6750_v7  ;;  %4234 = vmatprep.subr.mxu1 %v3315_v3  ;;  %v6752_v7 = vld [vmem:[#allocation19_spill] sm:$0xff] }
  0xca   : > { %4198 = vmatmul.mubr.f32.gmra.mxu0 %v6751_v35  ;;  %4235 = vmatpush3.msra.mxu1 %v3315_v3  ;;  %v6753_v35 = vld [vmem:[#allocation21_spill] sm:$0xff]  ;;  %v3313_v3 = vld [vmem:[%s6627_s1 + $0x290] sm:$0xff] }
  0xcb   : > { %4314 = vmatprep.subr.mxu0 %v3331_v41  ;;  %4120 = vmatprep.mubr.f32.mxu1 %v4931_v5  ;;  %v5579_v5 = vld [vmem:[%s4692_s23 + $0x180] sm:$0xff] }
  0xcc   : > { %4315 = vmatpush3.msra.mxu0 %v3331_v41  ;;  %4121 = vmatmul.mubr.f32.gmra.mxu1 %v4934_v6  ;;  %v5582_v6 = vld [vmem:[%s4692_s23 + $0x188] sm:$0xff]  ;;  %v3329_v41 = vld [vmem:[%s6627_s1 + $0x310] sm:$0xff] }
  0xcd   : > { %4200 = vmatprep.mubr.f32.mxu0 %v6752_v7  ;;  %4236 = vmatprep.subr.mxu1 %v3314_v34  ;;  %v6755_v7 = vld [vmem:[#allocation25_spill] sm:$0xff] }
  0xce   : > { %4201 = vmatmul.mubr.f32.gmra.mxu0 %v6753_v35  ;;  %4237 = vmatpush3.msra.mxu1 %v3314_v34  ;;  %v5589_v35 = vld [vmem:[%s4692_s23 + $0x190] sm:$0x3]  ;;  %v6754_v34 = vld [vmem:[#allocation23_spill] sm:$0xff] }
  0xcf   : > { %4316 = vmatprep.subr.mxu0 %v3330_v11  ;;  %4123 = vmatprep.mubr.f32.mxu1 %v4983_v1  ;;  %v3312_v1 = vld [vmem:[%s6627_s1 + $0x288] sm:$0xff]  ;;  %v1585_v4 = vrot.slane %v5589_v35, 1 }
  0xd0   : > { %4317 = vmatpush3.msra.mxu0 %v3330_v11  ;;  %4124 = vmatmul.mubr.f32.gmra.mxu1 %v4986_v19  ;;  %v1582_v11 = vrot.slane %v5579_v5, 1  ;;  %v1583_v19 = vrot.slane %v5582_v6, 1 }
  0xd1   : > { %4203 = vmatprep.mubr.f32.mxu0 %v6754_v34  ;;  %4238 = vmatprep.subr.mxu1 %v3313_v3 }
  0xd2   : > { %4204 = vmatmul.mubr.f32.gmra.mxu0 %v6755_v7  ;;  %4239 = vmatpush3.msra.mxu1 %v3313_v3  ;;  %v3328_v3 = vld [vmem:[%s6627_s1 + $0x308] sm:$0xff]  ;;  %v5607_v34 = vsel %vm338_vm0, %v1582_v11, %v1583_v19  ;;  %v4583_v11 = vld [vmem:[%s4692_s23 + $0x30] sm:$0xff] }
  0xd3   : > { %4318 = vmatprep.subr.mxu0 %v3329_v41  ;;  %4126 = vmatprep.mubr.f32.mxu1 %v5035_v0  ;;  %v6756_v7 = vld [vmem:[#allocation27_spill] sm:$0xff]  ;;  %6757 = vst [vmem:[#allocation6_spill] sm:$0xff] %v5607_v34  ;;  %v3311_v0 = vld [vmem:[%s6627_s1 + $0x280] sm:$0xff] }
  0xd4   : > { %4319 = vmatpush3.msra.mxu0 %v3329_v41  ;;  %4127 = vmatmul.mubr.f32.gmra.mxu1 %v5038_v63  ;;  %v5614_v63 = vsel %vm338_vm0, %v1583_v19, %v1585_v4  ;;  %v3327_v41 = vld [vmem:[%s6627_s1 + $0x300] sm:$0xff]  ;;  %v3374_v4 = vld [vmem:[%s6627_s1 + $0x478] sm:$0xff] }
  0xd5   : > { %4206 = vmatprep.mubr.f32.mxu0 %v5087_v38  ;;  %4240 = vmatprep.subr.mxu1 %v3312_v1  ;;  %6758 = vst [vmem:[#allocation8_spill] sm:$0xff] %v5614_v63  ;;  %v4584_v19 = vld [vmem:[%s4692_s23 + $0x38] sm:$0xff] }
  0xd6   : > { %4207 = vmatmul.mubr.f32.gmra.mxu0 %v6756_v7  ;;  %4241 = vmatpush3.msra.mxu1 %v3312_v1  ;;  %v3358_v1 = vld [vmem:[%s6627_s1 + $0x3f8] sm:$0xff]  ;;  %v3352_v7 = vld [vmem:[%s6627_s1 + $0x3c8] sm:$0xff] }
  0xd7   : > { %4320 = vmatprep.subr.mxu0 %v3328_v3  ;;  %4129 = vmatprep.mubr.f32.mxu1 %v5579_v5 }
  0xd8   : > { %4321 = vmatpush3.msra.mxu0 %v3328_v3  ;;  %4130 = vmatmul.mubr.f32.gmra.mxu1 %v5582_v6  ;;  %v3357_v3 = vld [vmem:[%s6627_s1 + $0x3f0] sm:$0xff] }
  0xd9   : > { %4209 = vmatprep.mubr.f32.mxu0 %v5607_v34  ;;  %4242 = vmatprep.subr.mxu1 %v3311_v0  ;;  %v4594_v34 = vld [vmem:[%s4692_s23 + $0xb0] sm:$0xff] }
  0xda   : > { %4210 = vmatmul.mubr.f32.gmra.mxu0 %v5614_v63  ;;  %4243 = vmatpush3.msra.mxu1 %v3311_v0  ;;  %v4586_v0 = vld [vmem:[%s4692_s23 + $0x50] sm:$0xff] }
  0xdb   : > { %4322 = vmatprep.subr.mxu0 %v3327_v41  ;;  %4244 = vmatprep.mubr.f32.mxu1 %v5136_v10  ;;  %v3373_v10 = vld [vmem:[%s6627_s1 + $0x470] sm:$0xff] }
  0xdc   : > { %4323 = vmatpush3.msra.mxu0 %v3327_v41  ;;  %4245 = vmatmul.mubr.f32.vlgmr.msra.gmra.mxu1 %v5145_v49  ;;  %v4585_v49 = vld [vmem:[%s4692_s23 + $0x48] sm:$0xff]  ;;  %v3369_v63 = vld [vmem:[%s6627_s1 + $0x450] sm:$0xff] }
  0xdd   : > { %4324 = vmatprep.mubr.f32.mxu0 %v4583_v11  ;;  %4372 = vmatprep.subr.mxu1 %v3358_v1  ;;  %v3356_v41 = vld [vmem:[%s6627_s1 + $0x3e8] sm:$0xff] }
  0xde   : > { %4325 = vmatmul.mubr.f32.vlgmr.msra.gmra.mxu0 %v4584_v19  ;;  %4373 = vmatpush3.msra.mxu1 %v3358_v1  ;;  %v3372_v1 = vld [vmem:[%s6627_s1 + $0x468] sm:$0xff]  ;;  %v3355_v19 = vld [vmem:[%s6627_s1 + $0x3e0] sm:$0xff] }
  0xdf   : > { %4452 = vmatprep.subr.mxu0 %v3374_v4  ;;  %4247 = vmatprep.mubr.f32.mxu1 %v5155_v45  ;;  %v4588_v11 = vld [vmem:[%s4692_s23 + $0x68] sm:$0xff] }
  0xe0   : > { %4453 = vmatpush3.msra.mxu0 %v3374_v4  ;;  %4248 = vmatmul.mubr.f32.gmra.mxu1 %v5164_v21  ;;  %v4587_v4 = vld [vmem:[%s4692_s23 + $0x60] sm:$0xff] }
  0xe1   : > { %4327 = vmatprep.mubr.f32.mxu0 %v4585_v49  ;;  %4374 = vmatprep.subr.mxu1 %v3357_v3  ;;  %v4590_v49 = vld [vmem:[%s4692_s23 + $0x80] sm:$0xff] }
  0xe2   : > { %4328 = vmatmul.mubr.f32.gmra.mxu0 %v4586_v0  ;;  %4375 = vmatpush3.msra.mxu1 %v3357_v3  ;;  %v3371_v3 = vld [vmem:[%s6627_s1 + $0x460] sm:$0xff]  ;;  %v3354_v0 = vld [vmem:[%s6627_s1 + $0x3d8] sm:$0xff] }
  0xe3   : > { %4454 = vmatprep.subr.mxu0 %v3373_v10  ;;  %4250 = vmatprep.mubr.f32.mxu1 %v5174_v22 }
  0xe4   : > { %4455 = vmatpush3.msra.mxu0 %v3373_v10  ;;  %4251 = vmatmul.mubr.f32.gmra.mxu1 %v5183_v39  ;;  %v4589_v10 = vld [vmem:[%s4692_s23 + $0x78] sm:$0xff] }
  0xe5   : > { %4330 = vmatprep.mubr.f32.mxu0 %v4587_v4  ;;  %4376 = vmatprep.subr.mxu1 %v3356_v41  ;;  %v4591_v4 = vld [vmem:[%s4692_s23 + $0x90] sm:$0xff] }
  0xe6   : > { %4331 = vmatmul.mubr.f32.gmra.mxu0 %v4588_v11  ;;  %4377 = vmatpush3.msra.mxu1 %v3356_v41  ;;  %v6759_v41 = vld [vmem:[#allocation28_spill] sm:$0xff] }
  0xe7   : > { %4456 = vmatprep.subr.mxu0 %v3372_v1  ;;  %4253 = vmatprep.mubr.f32.mxu1 %v5193_v40 }
  0xe8   : > { %4457 = vmatpush3.msra.mxu0 %v3372_v1  ;;  %4254 = vmatmul.mubr.f32.gmra.mxu1 %v5202_v29  ;;  %v3370_v1 = vld [vmem:[%s6627_s1 + $0x458] sm:$0xff] }
  0xe9   : > { %4333 = vmatprep.mubr.f32.mxu0 %v4589_v10  ;;  %4378 = vmatprep.subr.mxu1 %v3355_v19 }
  0xea   : > { %4334 = vmatmul.mubr.f32.gmra.mxu0 %v4590_v49  ;;  %4379 = vmatpush3.msra.mxu1 %v3355_v19  ;;  %v4592_v19 = vld [vmem:[%s4692_s23 + $0x98] sm:$0xff] }
  0xeb   : > { %4458 = vmatprep.subr.mxu0 %v3371_v3  ;;  %4256 = vmatprep.mubr.f32.mxu1 %v5212_v20 }
  0xec   : > { %4459 = vmatpush3.msra.mxu0 %v3371_v3  ;;  %4257 = vmatmul.mubr.f32.gmra.mxu1 %v6759_v41  ;;  %v3353_v3 = vld [vmem:[%s6627_s1 + $0x3d0] sm:$0xff] }
  0xed   : > { %4336 = vmatprep.mubr.f32.mxu0 %v4591_v4  ;;  %4380 = vmatprep.subr.mxu1 %v3354_v0  ;;  %v5671_v11 = vpop.f32.mrf.mxu1  ;;  %v6761_v4 = vld [vmem:[#allocation29_spill] sm:$0xff] }
  0xee   : > { %4337 = vmatmul.mubr.f32.gmra.mxu0 %v4592_v19  ;;  %4381 = vmatpush3.msra.mxu1 %v3354_v0  ;;  %v5677_v10 = vpop.f32.mrf.mxu0  ;;  %v4593_v0 = vld [vmem:[%s4692_s23 + $0xa8] sm:$0xff] }
  0xef   : > { %4460 = vmatprep.subr.mxu0 %v3370_v1  ;;  %4259 = vmatprep.mubr.f32.mxu1 %v5231_v59  ;;  %v5680_v49 = vpop.f32.mrf.mxu1 }
  0xf0   : > { %6760 = vst [vmem:[#allocation10_spill] sm:$0xff] %v5680_v49  ;;  %4461 = vmatpush3.msra.mxu0 %v3370_v1  ;;  %4260 = vmatmul.mubr.f32.gmra.mxu1 %v6761_v4  ;;  %v5686_v19 = vpop.f32.mrf.mxu0  ;;  %v6762_v1 = vld [vmem:[#allocation30_spill] sm:$0xff] }
  0xf1   : > { %4339 = vmatprep.mubr.f32.mxu0 %v4593_v0  ;;  %4382 = vmatprep.subr.mxu1 %v3353_v3  ;;  %v3368_v0 = vld [vmem:[%s6627_s1 + $0x448] sm:$0xff] }
  0xf2   : > { %4340 = vmatmul.mubr.f32.gmra.mxu0 %v4594_v34  ;;  %4383 = vmatpush3.msra.mxu1 %v3353_v3  ;;  %v5693_v38 = vpop.f32.mrf.mxu1 }
  0xf3   : > { %4462 = vmatprep.subr.mxu0 %v3369_v63  ;;  %4262 = vmatprep.mubr.f32.mxu1 %v5250_v60 }
  0xf4   : > { %4463 = vmatpush3.msra.mxu0 %v3369_v63  ;;  %4263 = vmatmul.mubr.f32.gmra.mxu1 %v6762_v1  ;;  %v5700_v49 = vpop.f32.mrf.mxu0  ;;  %v5702_v34 = vpop.f32.mrf.mxu1  ;;  %v3351_v63 = vld [vmem:[%s6627_s1 + $0x3c0] sm:$0xff] }
  0xf5   : > { %6763 = vst [vmem:[#allocation12_spill] sm:$0xff] %v5702_v34  ;;  %4342 = vmatprep.mubr.f32.mxu0 %v5491_v17  ;;  %4384 = vmatprep.subr.mxu1 %v3352_v7  ;;  %v3367_v17 = vld [vmem:[%s6627_s1 + $0x440] sm:$0xff] }
  0xf6   : > { %4343 = vmatmul.mubr.f32.gmra.mxu0 %v5495_v58  ;;  %4385 = vmatpush3.msra.mxu1 %v3352_v7  ;;  %v5709_v3 = vpop.f32.mrf.mxu0  ;;  %v3350_v58 = vld [vmem:[%s6627_s1 + $0x3b8] sm:$0xff] }
  0xf7   : > { %4464 = vmatprep.subr.mxu0 %v3368_v0  ;;  %4265 = vmatprep.mubr.f32.mxu1 %v5269_v48 }
  0xf8   : > { %4465 = vmatpush3.msra.mxu0 %v3368_v0  ;;  %4266 = vmatmul.mubr.f32.gmra.mxu1 %v5278_v56  ;;  %v5716_v34 = vpop.f32.mrf.mxu1 }
  0xf9   : > { %6764 = vst [vmem:[#allocation14_spill] sm:$0xff] %v5716_v34  ;;  %4345 = vmatprep.mubr.f32.mxu0 %v5507_v55  ;;  %4386 = vmatprep.subr.mxu1 %v3351_v63  ;;  %v3366_v55 = vld [vmem:[%s6627_s1 + $0x438] sm:$0xff] }
  0xfa   : > { %4346 = vmatmul.mubr.f32.gmra.mxu0 %v5511_v51  ;;  %4387 = vmatpush3.msra.mxu1 %v3351_v63  ;;  %v5723_v7 = vpop.f32.mrf.mxu0  ;;  %v5725_v0 = vpop.f32.mrf.mxu1  ;;  %v3349_v63 = vld [vmem:[%s6627_s1 + $0x3b0] sm:$0xff]  ;;  %v4599_v34 = vld [vmem:[%s4692_s23 + $0x158] sm:$0xff] }
  0xfb   : > { %6765 = vst [vmem:[#allocation16_spill] sm:$0xff] %v5725_v0  ;;  %4466 = vmatprep.subr.mxu0 %v3367_v17  ;;  %4268 = vmatprep.mubr.f32.mxu1 %v5288_v13 }
  0xfc   : > { %4467 = vmatpush3.msra.mxu0 %v3367_v17  ;;  %4269 = vmatmul.mubr.f32.gmra.mxu1 %v5297_v15  ;;  %v5732_v51 = vpop.f32.mrf.mxu0 }
  0xfd   : > { %4348 = vmatprep.mubr.f32.mxu0 %v5523_v25  ;;  %4388 = vmatprep.subr.mxu1 %v3350_v58  ;;  %v3365_v25 = vld [vmem:[%s6627_s1 + $0x430] sm:$0xff] }
  0xfe   : > { %4349 = vmatmul.mubr.f32.gmra.mxu0 %v5527_v23  ;;  %4389 = vmatpush3.msra.mxu1 %v3350_v58  ;;  %v5739_v0 = vpop.f32.mrf.mxu1  ;;  %v3348_v58 = vld [vmem:[%s6627_s1 + $0x3a8] sm:$0xff] }
  0xff   : > { %6766 = vst [vmem:[#allocation18_spill] sm:$0xff] %v5739_v0  ;;  %4468 = vmatprep.subr.mxu0 %v3366_v55  ;;  %4271 = vmatprep.mubr.f32.mxu1 %v5307_v26 }
 0x100   : > { %4469 = vmatpush3.msra.mxu0 %v3366_v55  ;;  %4272 = vmatmul.mubr.f32.gmra.mxu1 %v5316_v18  ;;  %v5746_v17 = vpop.f32.mrf.mxu0  ;;  %v5748_v23 = vpop.f32.mrf.mxu1 }
 0x101   : > { %6767 = vst [vmem:[#allocation20_spill] sm:$0xff] %v5748_v23  ;;  %4351 = vmatprep.mubr.f32.mxu0 %v5539_v31  ;;  %4390 = vmatprep.subr.mxu1 %v3349_v63  ;;  %v3364_v31 = vld [vmem:[%s6627_s1 + $0x428] sm:$0xff] }
 0x102   : > { %4352 = vmatmul.mubr.f32.gmra.mxu0 %v5543_v14  ;;  %4391 = vmatpush3.msra.mxu1 %v3349_v63  ;;  %v5755_v55 = vpop.f32.mrf.mxu0  ;;  %v4595_v14 = vld [vmem:[%s4692_s23 + $0x120] sm:$0xff] }
 0x103   : > { %4470 = vmatprep.subr.mxu0 %v3365_v25  ;;  %4274 = vmatprep.mubr.f32.mxu1 %v5326_v46  ;;  %v3347_v63 = vld [vmem:[%s6627_s1 + $0x3a0] sm:$0xff] }
 0x104   : > { %4471 = vmatpush3.msra.mxu0 %v3365_v25  ;;  %4275 = vmatmul.mubr.f32.gmra.mxu1 %v5335_v33  ;;  %v5762_v23 = vpop.f32.mrf.mxu1 }
 0x105   : > { %6768 = vst [vmem:[#allocation22_spill] sm:$0xff] %v5762_v23  ;;  %4354 = vmatprep.mubr.f32.mxu0 %v4595_v14  ;;  %4392 = vmatprep.subr.mxu1 %v3348_v58  ;;  %v3363_v14 = vld [vmem:[%s6627_s1 + $0x420] sm:$0xff] }
 0x106   : > { %4355 = vmatmul.mubr.f32.gmra.mxu0 %v5556_v16  ;;  %4393 = vmatpush3.msra.mxu1 %v3348_v58  ;;  %v5769_v25 = vpop.f32.mrf.mxu0  ;;  %v5771_v0 = vpop.f32.mrf.mxu1  ;;  %v4596_v58 = vld [vmem:[%s4692_s23 + $0x138] sm:$0xff]  ;;  %v4597_v23 = vld [vmem:[%s4692_s23 + $0x140] sm:$0xff] }
 0x107   : > { %6769 = vst [vmem:[#allocation24_spill] sm:$0xff] %v5771_v0  ;;  %4472 = vmatprep.subr.mxu0 %v3364_v31  ;;  %4277 = vmatprep.mubr.f32.mxu1 %v5345_v2  ;;  %v4601_v2 = vld [vmem:[%s4692_s23 + $0x170] sm:$0xff] }
 0x108   : > { %4473 = vmatpush3.msra.mxu0 %v3364_v31  ;;  %4278 = vmatmul.mubr.f32.gmra.mxu1 %v5354_v30  ;;  %v5778_v16 = vpop.f32.mrf.mxu0  ;;  %v3346_v31 = vld [vmem:[%s6627_s1 + $0x398] sm:$0xff] }
 0x109   : > { %4357 = vmatprep.mubr.f32.mxu0 %v4596_v58  ;;  %4394 = vmatprep.subr.mxu1 %v3347_v63  ;;  %v3362_v58 = vld [vmem:[%s6627_s1 + $0x418] sm:$0xff] }
 0x10a   : > { %4358 = vmatmul.mubr.f32.gmra.mxu0 %v4597_v23  ;;  %4395 = vmatpush3.msra.mxu1 %v3347_v63  ;;  %v5785_v0 = vpop.f32.mrf.mxu1  ;;  %v4598_v63 = vld [vmem:[%s4692_s23 + $0x150] sm:$0xff] }
 0x10b   : > { %6770 = vst [vmem:[#allocation2_spill] sm:$0xff] %v5785_v0  ;;  %4474 = vmatprep.subr.mxu0 %v3363_v14  ;;  %4280 = vmatprep.mubr.f32.mxu1 %v5364_v27  ;;  %v1866_v27 = vrot.slane %v5589_v35, 2 }
 0x10c   : > { %4475 = vmatpush3.msra.mxu0 %v3363_v14  ;;  %4281 = vmatmul.mubr.f32.gmra.mxu1 %v5373_v36  ;;  %v5792_v30 = vpop.f32.mrf.mxu0  ;;  %v5794_v23 = vpop.f32.mrf.mxu1  ;;  %v3345_v14 = vld [vmem:[%s6627_s1 + $0x390] sm:$0xff]  ;;  %v4600_v36 = vld [vmem:[%s4692_s23 + $0x168] sm:$0xff] }
 0x10d   : > { %6771 = vst [vmem:[#allocation3_spill] sm:$0xff] %v5794_v23  ;;  %4360 = vmatprep.mubr.f32.mxu0 %v4598_v63  ;;  %4396 = vmatprep.subr.mxu1 %v3346_v31  ;;  %v3361_v63 = vld [vmem:[%s6627_s1 + $0x410] sm:$0xff] }
 0x10e   : > { %4361 = vmatmul.mubr.f32.gmra.mxu0 %v4599_v34  ;;  %4397 = vmatpush3.msra.mxu1 %v3346_v31  ;;  %v5801_v0 = vpop.f32.mrf.mxu0  ;;  %v1863_v34 = vrot.slane %v5579_v5, 2  ;;  %v1864_v31 = vrot.slane %v5582_v6, 2 }
 0x10f   : > { %4476 = vmatprep.subr.mxu0 %v3362_v58  ;;  %4283 = vmatprep.mubr.f32.mxu1 %v5383_v47 }
 0x110   : > { %4477 = vmatpush3.msra.mxu0 %v3362_v58  ;;  %4284 = vmatmul.mubr.f32.gmra.mxu1 %v5392_v43  ;;  %v5808_v23 = vpop.f32.mrf.mxu1  ;;  %v3344_v58 = vld [vmem:[%s6627_s1 + $0x388] sm:$0xff]  ;;  %v5830_v35 = vsel %vm918_vm1, %v1863_v34, %v1864_v31  ;;  %v5847_v34 = vld [vmem:[%s4692_s23 + $0x1a0] sm:$0xff] }
 0x111   : > { %6772 = vst [vmem:[#allocation28_spill] sm:$0xff] %v5808_v23  ;;  %4363 = vmatprep.mubr.f32.mxu0 %v4600_v36  ;;  %4398 = vmatprep.subr.mxu1 %v3345_v14 }
 0x112   : > { %4364 = vmatmul.mubr.f32.gmra.mxu0 %v4601_v2  ;;  %4399 = vmatpush3.msra.mxu1 %v3345_v14  ;;  %v5818_v43 = vpop.f32.mrf.mxu0  ;;  %v5820_v23 = vpop.f32.mrf.mxu1  ;;  %v3360_v2 = vld [vmem:[%s6627_s1 + $0x408] sm:$0xff]  ;;  %v5834_v14 = vsel %vm918_vm1, %v1864_v31, %v1866_v27 }
 0x113   : > { %6773 = vst [vmem:[#allocation29_spill] sm:$0xff] %v5820_v23  ;;  %4478 = vmatprep.subr.mxu0 %v3361_v63  ;;  %4286 = vmatprep.mubr.f32.mxu1 %v5402_v53  ;;  %6774 = vst [vmem:[#allocation30_spill] sm:$0xff] %v5834_v14  ;;  %v5840_v23 = vld [vmem:[%s4692_s23 + $0x198] sm:$0xff] }
 0x114   : > { %4479 = vmatpush3.msra.mxu0 %v3361_v63  ;;  %4287 = vmatmul.mubr.f32.gmra.mxu1 %v5409_v57  ;;  %v5827_v36 = vpop.f32.mrf.mxu0  ;;  %v3343_v57 = vld [vmem:[%s6627_s1 + $0x380] sm:$0xff] }
 0x115   : > { %4366 = vmatprep.mubr.f32.mxu0 %v5579_v5  ;;  %4400 = vmatprep.subr.mxu1 %v3344_v58 }
 0x116   : > { %4367 = vmatmul.mubr.f32.gmra.mxu0 %v5582_v6  ;;  %4401 = vmatpush3.msra.mxu1 %v3344_v58  ;;  %v5837_v63 = vpop.f32.mrf.mxu1  ;;  %v3359_v6 = vld [vmem:[%s6627_s1 + $0x400] sm:$0xff] }
 0x117   : > { %6775 = vst [vmem:[#allocation37_spill] sm:$0xff] %v5837_v63  ;;  %4480 = vmatprep.subr.mxu0 %v3360_v2  ;;  %4289 = vmatprep.mubr.f32.mxu1 %v5830_v35 }
 0x118   : > { %4481 = vmatpush3.msra.mxu0 %v3360_v2  ;;  %4290 = vmatmul.mubr.f32.gmra.mxu1 %v5834_v14  ;;  %v5850_v27 = vpop.f32.mrf.mxu0  ;;  %v5852_v5 = vpop.f32.mrf.mxu1 }
 0x119   : > { %6776 = vst [vmem:[#allocation38_spill] sm:$0xff] %v5852_v5  ;;  %4369 = vmatprep.mubr.f32.mxu0 %v5840_v23  ;;  %4402 = vmatprep.subr.mxu1 %v3343_v57 }
 0x11a   : > { %4370 = vmatmul.mubr.f32.gmra.mxu0 %v5847_v34  ;;  %4403 = vmatpush3.msra.mxu1 %v3343_v57  ;;  %v5859_v31 = vpop.f32.mrf.mxu0 }
 0x11b   : > { %4482 = vmatprep.subr.mxu0 %v3359_v6  ;;  %4404 = vmatprep.mubr.f32.mxu1 %v6733_v32 }
 0x11c   : > { %4483 = vmatpush3.msra.mxu0 %v3359_v6  ;;  %v3926_v58 = vpop.f32.mrf.mxu1  ;;  %4405 = vmatmul.mubr.f32.vlgmr.msra.gmra.mxu1 %v6734_v54 }
 0x11d   : > { %v765_v2 = vadd.f32 %v3926_v58, %v5677_v10  ;;  %4484 = vmatprep.mubr.f32.mxu0 %v5155_v45  ;;  %4407 = vmatprep.mubr.f32.mxu1 %v6735_v52 }
 0x11e   : > { %v4006_v5 = vpop.f32.mrf.mxu0  ;;  %4485 = vmatmul.mubr.f32.vlgmr.msra.gmra.mxu0 %v5164_v21  ;;  %v759_v63 = vpop.f32.mrf.mxu1 }
 0x11f   : > { %v5867_v57 = vadd.f32 %v4006_v5, %v765_v2  ;;  %v760_v14 = vadd.f32 %v759_v63, %v5686_v19  ;;  %4487 = vmatprep.mubr.f32.mxu0 %v5174_v22 }
 0x120   : > { %v1114_v32 = vpop.f32.mrf.mxu0  ;;  %v3929_v6 = vpop.f32.mrf.mxu1  ;;  %4408 = vmatmul.mubr.f32.gmra.mxu1 %v6736_v61 }
 0x121   : > { %v5872_v54 = vadd.f32 %v1114_v32, %v760_v14  ;;  %v775_v45 = vadd.f32 %v3929_v6, %v5700_v49  ;;  %4410 = vmatprep.mubr.f32.mxu1 %v6737_v8 }
 0x122   : > { %v4009_v52 = vpop.f32.mrf.mxu0  ;;  %4488 = vmatmul.mubr.f32.gmra.mxu0 %v5183_v39  ;;  %v769_v21 = vpop.f32.mrf.mxu1 }
 0x123   : > { %v5877_v10 = vadd.f32 %v4009_v52, %v775_v45  ;;  %v770_v19 = vadd.f32 %v769_v21, %v5709_v3  ;;  %4490 = vmatprep.mubr.f32.mxu0 %v5193_v40  ;;  %v6777_v21 = vld [vmem:[#allocation4_spill] sm:$0xff] }
 0x124   : > { %v1124_v22 = vpop.f32.mrf.mxu0  ;;  %v3932_v63 = vpop.f32.mrf.mxu1  ;;  %4411 = vmatmul.mubr.f32.gmra.mxu1 %v6738_v37 }
 0x125   : > { %v5882_v61 = vadd.f32 %v1124_v22, %v770_v19  ;;  %v785_v49 = vadd.f32 %v3932_v63, %v5723_v7  ;;  %4413 = vmatprep.mubr.f32.mxu1 %v6739_v42  ;;  %v6778_v63 = vld [vmem:[#allocation5_spill] sm:$0xff] }
 0x126   : > { %v4012_v8 = vpop.f32.mrf.mxu0  ;;  %4491 = vmatmul.mubr.f32.gmra.mxu0 %v5202_v29  ;;  %v779_v39 = vpop.f32.mrf.mxu1 }
 0x127   : > { %v5887_v14 = vadd.f32 %v4012_v8, %v785_v49  ;;  %v780_v3 = vadd.f32 %v779_v39, %v5732_v51  ;;  %4493 = vmatprep.mubr.f32.mxu0 %v5212_v20  ;;  %v6779_v49 = vld [vmem:[#allocation7_spill] sm:$0xff] }
 0x128   : > { %v1134_v40 = vpop.f32.mrf.mxu0  ;;  %v3935_v5 = vpop.f32.mrf.mxu1  ;;  %4414 = vmatmul.mubr.f32.gmra.mxu1 %v6740_v44 }
 0x129   : > { %v5892_v37 = vadd.f32 %v1134_v40, %v780_v3  ;;  %v795_v7 = vadd.f32 %v3935_v5, %v5746_v17  ;;  %4416 = vmatprep.mubr.f32.mxu1 %v6741_v24  ;;  %v6780_v40 = vld [vmem:[#allocation9_spill] sm:$0xff] }
 0x12a   : > { %v4015_v42 = vpop.f32.mrf.mxu0  ;;  %4494 = vmatmul.mubr.f32.gmra.mxu0 %v6759_v41  ;;  %v789_v29 = vpop.f32.mrf.mxu1 }
 0x12b   : > { %v5897_v58 = vadd.f32 %v4015_v42, %v795_v7  ;;  %v790_v51 = vadd.f32 %v789_v29, %v5755_v55  ;;  %4496 = vmatprep.mubr.f32.mxu0 %v5231_v59  ;;  %v6781_v7 = vld [vmem:[#allocation11_spill] sm:$0xff] }
 0x12c   : > { %v1144_v20 = vpop.f32.mrf.mxu0  ;;  %v3938_v2 = vpop.f32.mrf.mxu1  ;;  %4417 = vmatmul.mubr.f32.gmra.mxu1 %v5073_v62 }
 0x12d   : > { %v5902_v44 = vadd.f32 %v1144_v20, %v790_v51  ;;  %v805_v17 = vadd.f32 %v3938_v2, %v5769_v25  ;;  %4419 = vmatprep.mubr.f32.mxu1 %v5095_v50  ;;  %v6782_v51 = vld [vmem:[#allocation10_spill] sm:$0xff]  ;;  %v6783_v2 = vld [vmem:[#allocation13_spill] sm:$0xff] }
 0x12e   : > { %v4018_v24 = vpop.f32.mrf.mxu0  ;;  %4497 = vmatmul.mubr.f32.gmra.mxu0 %v6761_v4  ;;  %v799_v41 = vpop.f32.mrf.mxu1 }
 0x12f   : > { %v5907_v32 = vadd.f32 %v4018_v24, %v805_v17  ;;  %v800_v55 = vadd.f32 %v799_v41, %v5778_v16  ;;  %4499 = vmatprep.mubr.f32.mxu0 %v5250_v60  ;;  %v6784_v24 = vld [vmem:[#allocation15_spill] sm:$0xff] }
 0x130   : > { %v1154_v59 = vpop.f32.mrf.mxu0  ;;  %v3941_v6 = vpop.f32.mrf.mxu1  ;;  %4420 = vmatmul.mubr.f32.gmra.mxu1 %v5105_v28 }
 0x131   : > { %v5912_v62 = vadd.f32 %v1154_v59, %v800_v55  ;;  %v815_v25 = vadd.f32 %v3941_v6, %v5792_v30  ;;  %4422 = vmatprep.mubr.f32.mxu1 %v6742_v9  ;;  %v6785_v59 = vld [vmem:[#allocation12_spill] sm:$0xff] }
 0x132   : > { %v4021_v50 = vpop.f32.mrf.mxu0  ;;  %4500 = vmatmul.mubr.f32.gmra.mxu0 %v6762_v1  ;;  %v809_v4 = vpop.f32.mrf.mxu1 }
 0x133   : > { %v5917_v45 = vadd.f32 %v4021_v50, %v815_v25  ;;  %v810_v16 = vadd.f32 %v809_v4, %v5801_v0  ;;  %4502 = vmatprep.mubr.f32.mxu0 %v5269_v48  ;;  %v6786_v25 = vld [vmem:[#allocation31_spill] sm:$0xff]  ;;  %v6787_v4 = vld [vmem:[#allocation17_spill] sm:$0xff] }
 0x134   : > { %v1164_v60 = vpop.f32.mrf.mxu0  ;;  %v3944_v52 = vpop.f32.mrf.mxu1  ;;  %4423 = vmatmul.mubr.f32.gmra.mxu1 %v6743_v12 }
 0x135   : > { %v5922_v28 = vadd.f32 %v1164_v60, %v810_v16  ;;  %v825_v30 = vadd.f32 %v3944_v52, %v5818_v43  ;;  %4425 = vmatprep.mubr.f32.mxu1 %v6777_v21  ;;  %v6788_v60 = vld [vmem:[#allocation14_spill] sm:$0xff]  ;;  %v6789_v52 = vld [vmem:[#allocation19_spill] sm:$0xff]  ;;  %v6790_v21 = vld [vmem:[#allocation32_spill] sm:$0xff] }
 0x136   : > { %v4024_v9 = vpop.f32.mrf.mxu0  ;;  %4503 = vmatmul.mubr.f32.gmra.mxu0 %v5278_v56  ;;  %v819_v1 = vpop.f32.mrf.mxu1 }
 0x137   : > { %v5927_v19 = vadd.f32 %v4024_v9, %v825_v30  ;;  %v820_v0 = vadd.f32 %v819_v1, %v5827_v36  ;;  %4505 = vmatprep.mubr.f32.mxu0 %v5288_v13  ;;  %v6791_v1 = vld [vmem:[#allocation16_spill] sm:$0xff] }
 0x138   : > { %v1174_v48 = vpop.f32.mrf.mxu0  ;;  %v3947_v22 = vpop.f32.mrf.mxu1  ;;  %4426 = vmatmul.mubr.f32.gmra.mxu1 %v6778_v63 }
 0x139   : > { %v5932_v12 = vadd.f32 %v1174_v48, %v820_v0  ;;  %v835_v43 = vadd.f32 %v3947_v22, %v5850_v27  ;;  %4428 = vmatprep.mubr.f32.mxu1 %v6779_v49  ;;  %v6792_v48 = vld [vmem:[#allocation33_spill] sm:$0xff] }
 0x13a   : > { %v4027_v8 = vpop.f32.mrf.mxu0  ;;  %4506 = vmatmul.mubr.f32.gmra.mxu0 %v5297_v15  ;;  %v829_v56 = vpop.f32.mrf.mxu1 }
 0x13b   : > { %v5937_v39 = vadd.f32 %v4027_v8, %v835_v43  ;;  %v830_v36 = vadd.f32 %v829_v56, %v5859_v31  ;;  %4508 = vmatprep.mubr.f32.mxu0 %v5307_v26  ;;  %v6793_v43 = vld [vmem:[#allocation21_spill] sm:$0xff]  ;;  %v6794_v8 = vld [vmem:[#allocation18_spill] sm:$0xff] }
 0x13c   : > { %v1184_v13 = vpop.f32.mrf.mxu0  ;;  %v3950_v3 = vpop.f32.mrf.mxu1  ;;  %4429 = vmatmul.mubr.f32.gmra.mxu1 %v6780_v40 }
 0x13d   : > { %v5942_v5 = vadd.f32 %v1184_v13, %v830_v36  ;;  %v845_v27 = vadd.f32 %v3950_v3, %v5671_v11  ;;  %4431 = vmatprep.mubr.f32.mxu1 %v6781_v7  ;;  %v6795_v36 = vld [vmem:[#allocation23_spill] sm:$0xff]  ;;  %v6796_v3 = vld [vmem:[#allocation34_spill] sm:$0xff]  ;;  %v6797_v7 = vld [vmem:[#allocation20_spill] sm:$0xff] }
 0x13e   : > { %v4030_v42 = vpop.f32.mrf.mxu0  ;;  %4509 = vmatmul.mubr.f32.gmra.mxu0 %v5316_v18  ;;  %v839_v15 = vpop.f32.mrf.mxu1 }
 0x13f   : > { %v5947_v29 = vadd.f32 %v4030_v42, %v845_v27  ;;  %v840_v31 = vadd.f32 %v839_v15, %v6782_v51  ;;  %4511 = vmatprep.mubr.f32.mxu0 %v5326_v46 }
 0x140   : > { %v1194_v26 = vpop.f32.mrf.mxu0  ;;  %v3953_v20 = vpop.f32.mrf.mxu1  ;;  %4432 = vmatmul.mubr.f32.gmra.mxu1 %v6783_v2 }
 0x141   : > { %v5952_v17 = vadd.f32 %v1194_v26, %v840_v31  ;;  %v855_v11 = vadd.f32 %v3953_v20, %v5693_v38  ;;  %4434 = vmatprep.mubr.f32.mxu1 %v6784_v24  ;;  %v6798_v31 = vld [vmem:[#allocation25_spill] sm:$0xff]  ;;  %v6799_v20 = vld [vmem:[#allocation22_spill] sm:$0xff]  ;;  %v2421_v24 = vrot.slane %v5840_v23, 1 }
 0x142   : > { %v4033_v41 = vpop.f32.mrf.mxu0  ;;  %4512 = vmatmul.mubr.f32.gmra.mxu0 %v5335_v33  ;;  %v849_v18 = vpop.f32.mrf.mxu1 }
 0x143   : > { %v5957_v55 = vadd.f32 %v4033_v41, %v855_v11  ;;  %v850_v6 = vadd.f32 %v849_v18, %v6785_v59  ;;  %4514 = vmatprep.mubr.f32.mxu0 %v6786_v25  ;;  %v6800_v11 = vld [vmem:[#allocation26_spill] sm:$0xff]  ;;  %v2422_v41 = vrot.slane %v5847_v34, 1  ;;  %v6801_v59 = vld [vmem:[#allocation35_spill] sm:$0xff] }
 0x144   : > { %v1204_v46 = vpop.f32.mrf.mxu0  ;;  %v3956_v50 = vpop.f32.mrf.mxu1  ;;  %4435 = vmatmul.mubr.f32.gmra.mxu1 %v6787_v4  ;;  %v273_v25 = vld [vmem:[%s4692_s23 + $0x1a8] sm:$0x3]  ;;  %v2702_v4 = vrot.slane %v5840_v23, 2  ;;  %s3379_s23 = sshll.u32 %s4674_s9, 8 }
 0x145   : > { %v5962_v16 = vadd.f32 %v1204_v46, %v850_v6  ;;  %v865_v38 = vadd.f32 %v3956_v50, %v6788_v60  ;;  %4437 = vmatprep.mubr.f32.mxu1 %v6789_v52  ;;  %v6802_v46 = vld [vmem:[#allocation24_spill] sm:$0xff]  ;;  %v2703_v60 = vrot.slane %v5847_v34, 2  ;;  %v6807_v34 = vld [vmem:[#allocation3_spill] sm:$0xff]  ;;  %s6265_s9 = scalar_lea.vmem %s6629_s3, %s3379_s23 }
 0x146   : > { %v4036_v30 = vpop.f32.mrf.mxu0  ;;  %4515 = vmatmul.mubr.f32.gmra.mxu0 %v6790_v21  ;;  %v859_v33 = vpop.f32.mrf.mxu1 }
 0x147   : > { %v5967_v9 = vadd.f32 %v4036_v30, %v865_v38  ;;  %v860_v0 = vadd.f32 %v859_v33, %v6791_v1  ;;  %4517 = vmatprep.mubr.f32.mxu0 %v6792_v48  ;;  %v6803_v30 = vld [vmem:[#allocation27_spill] sm:$0xff]  ;;  %v6804_v33 = vld [vmem:[#allocation2_spill] sm:$0xff]  ;;  %v2424_v48 = vrot.slane %v273_v25, 1 }
 0x148   : > { %v1214_v22 = vpop.f32.mrf.mxu0  ;;  %v3959_v63 = vpop.f32.mrf.mxu1  ;;  %4438 = vmatmul.mubr.f32.gmra.mxu1 %v6793_v43 }
 0x149   : > { %v5972_v49 = vadd.f32 %v1214_v22, %v860_v0  ;;  %v875_v56 = vadd.f32 %v3959_v63, %v6794_v8  ;;  %4440 = vmatprep.mubr.f32.mxu1 %v6795_v36  ;;  %v6805_v0 = vld [vmem:[#allocation6_spill] sm:$0xff]  ;;  %v6806_v63 = vld [vmem:[#allocation36_spill] sm:$0xff] }
 0x14a   : > { %v4039_v13 = vpop.f32.mrf.mxu0  ;;  %4518 = vmatmul.mubr.f32.gmra.mxu0 %v6796_v3  ;;  %v869_v40 = vpop.f32.mrf.mxu1  ;;  %v6808_v3 = vld [vmem:[#allocation8_spill] sm:$0xff] }
 0x14b   : > { %v5977_v27 = vadd.f32 %v4039_v13, %v875_v56  ;;  %v870_v42 = vadd.f32 %v869_v40, %v6797_v7  ;;  %4520 = vmatprep.mubr.f32.mxu0 %v5383_v47  ;;  %v2705_v56 = vrot.slane %v273_v25, 2  ;;  %v2704_v40 = vsel %vm918_vm1, %v2702_v4, %v2703_v60 }
 0x14c   : > { %v1224_v15 = vpop.f32.mrf.mxu0  ;;  %v3962_v51 = vpop.f32.mrf.mxu1  ;;  %4441 = vmatmul.mubr.f32.gmra.mxu1 %v6798_v31 }
 0x14d   : > { %v5982_v26 = vadd.f32 %v1224_v15, %v870_v42  ;;  %v885_v2 = vadd.f32 %v3962_v51, %v6799_v20  ;;  %4443 = vmatprep.mubr.f32.mxu1 %v6800_v11  ;;  %v6809_v42 = vld [vmem:[#allocation28_spill] sm:$0xff]  ;;  %v2425_v51 = vsel %vm338_vm0, %v2422_v41, %v2424_v48  ;;  %v6810_v20 = vld [vmem:[#allocation30_spill] sm:$0xff] }
 0x14e   : > { %v4042_v18 = vpop.f32.mrf.mxu0  ;;  %4521 = vmatmul.mubr.f32.gmra.mxu0 %v6801_v59  ;;  %v879_v6 = vpop.f32.mrf.mxu1 }
 0x14f   : > { %v5990_v47 = vadd.f32 %v4042_v18, %v885_v2  ;;  %v880_v50 = vadd.f32 %v879_v6, %v6802_v46  ;;  %4523 = vmatprep.mubr.f32.mxu0 %v5402_v53  ;;  %v2423_v53 = vsel %vm338_vm0, %v2421_v24, %v2422_v41  ;;  %v2706_v18 = vsel %vm918_vm1, %v2703_v60, %v2705_v56  ;;  %v6812_v46 = vld [vmem:[#allocation37_spill] sm:$0xff] }
 0x150   : > { %v1234_v38 = vpop.f32.mrf.mxu0  ;;  %v3965_v52 = vpop.f32.mrf.mxu1  ;;  %4444 = vmatmul.mubr.f32.gmra.mxu1 %v6803_v30 }
 0x151   : > { %v5997_v21 = vadd.f32 %v1234_v38, %v880_v50  ;;  %v895_v1 = vadd.f32 %v3965_v52, %v6804_v33  ;;  %4446 = vmatprep.mubr.f32.mxu1 %v6805_v0  ;;  %v6813_v52 = vld [vmem:[#allocation38_spill] sm:$0xff] }
 0x152   : > { %v4045_v22 = vpop.f32.mrf.mxu0  ;;  %4524 = vmatmul.mubr.f32.gmra.mxu0 %v6806_v63  ;;  %v889_v43 = vpop.f32.mrf.mxu1 }
 0x153   : > { %v6003_v23 = vadd.f32 %v4045_v22, %v895_v1  ;;  %v890_v8 = vadd.f32 %v889_v43, %v6807_v34  ;;  %4526 = vmatprep.mubr.f32.mxu0 %v5830_v35  ;;  %v6811_v35 = vld [vmem:[#allocation29_spill] sm:$0xff] }
 0x154   : > { %v1244_v36 = vpop.f32.mrf.mxu0  ;;  %v3968_v13 = vpop.f32.mrf.mxu1  ;;  %4447 = vmatmul.mubr.f32.gmra.mxu1 %v6808_v3 }
 0x155   : > { %v6009_v7 = vadd.f32 %v1244_v36, %v890_v8  ;;  %v905_v15 = vadd.f32 %v3968_v13, %v6809_v42  ;;  %4449 = vmatprep.mubr.f32.mxu1 %v2423_v53 }
 0x156   : > { %v4048_v31 = vpop.f32.mrf.mxu0  ;;  %4527 = vmatmul.mubr.f32.gmra.mxu0 %v6810_v20  ;;  %v899_v2 = vpop.f32.mrf.mxu1 }
 0x157   : > { %v6014_v11 = vadd.f32 %v4048_v31, %v905_v15  ;;  %v900_v24 = vadd.f32 %v899_v2, %v6811_v35  ;;  %4529 = vmatprep.mubr.f32.mxu0 %v2704_v40 }
 0x158   : > { %v1254_v59 = vpop.f32.mrf.mxu0  ;;  %v3971_v6 = vpop.f32.mrf.mxu1  ;;  %4450 = vmatmul.mubr.f32.gmra.mxu1 %v2425_v51 }
 0x159   : > { %v6018_v25 = vadd.f32 %v1254_v59, %v900_v24  ;;  %v915_v50 = vadd.f32 %v3971_v6, %v6812_v46 }
 0x15a   : > { %v4051_v4 = vpop.f32.mrf.mxu0  ;;  %4530 = vmatmul.mubr.f32.gmra.mxu0 %v2706_v18  ;;  %v909_v41 = vpop.f32.mrf.mxu1 }
 0x15b   : > { %v6021_v38 = vadd.f32 %v4051_v4, %v915_v50  ;;  %v910_v30 = vadd.f32 %v909_v41, %v6813_v52 }
 0x15c   : > { %v1264_v33 = vpop.f32.mrf.mxu0  ;;  %v4086_v1 = vpop.f32.mrf.mxu1 }
 0x15d   : > { %v6024_v0 = vadd.f32 %v1264_v33, %v910_v30  ;;  %v1548_v60 = vadd.f32 %v4086_v1, %v5867_v57 }
 0x15e   : > { %v4166_v48 = vpop.f32.mrf.mxu0  ;;  %v1388_v22 = vpop.f32.mrf.mxu1 }
 0x15f   : > { %v6027_v63 = vadd.f32 %v4166_v48, %v1548_v60  ;;  %v1547_v43 = vadd.f32 %v1388_v22, %v5872_v54 }
 0x160   : > { %v1672_v53 = vpop.f32.mrf.mxu0  ;;  %v4089_v34 = vpop.f32.mrf.mxu1 }
 0x161   : > { %v6030_v8 = vadd.f32 %v1672_v53, %v1547_v43  ;;  %v1550_v56 = vadd.f32 %v4089_v34, %v5877_v10 }
 0x162   : > { %v4169_v36 = vpop.f32.mrf.mxu0  ;;  %v1398_v13 = vpop.f32.mrf.mxu1 }
 0x163   : > { %v6033_v3 = vadd.f32 %v4169_v36, %v1550_v56  ;;  %v1549_v40 = vadd.f32 %v1398_v13, %v5882_v61 }
 0x164   : > { %v1682_v42 = vpop.f32.mrf.mxu0  ;;  %v4092_v57 = vpop.f32.mrf.mxu1 }
 0x165   : > { %v6036_v15 = vadd.f32 %v1682_v42, %v1549_v40  ;;  %v1552_v51 = vadd.f32 %v4092_v57, %v5887_v14 }
 0x166   : > { %v4172_v31 = vpop.f32.mrf.mxu0  ;;  %v1408_v54 = vpop.f32.mrf.mxu1 }
 0x167   : > { %v6039_v20 = vadd.f32 %v4172_v31, %v1552_v51  ;;  %v1551_v2 = vadd.f32 %v1408_v54, %v5892_v37 }
 0x168   : > { %v1692_v35 = vpop.f32.mrf.mxu0  ;;  %v4095_v10 = vpop.f32.mrf.mxu1 }
 0x169   : > { %v6042_v24 = vadd.f32 %v1692_v35, %v1551_v2  ;;  %v1554_v18 = vadd.f32 %v4095_v10, %v5897_v58 }
 0x16a   : > { %v4175_v59 = vpop.f32.mrf.mxu0  ;;  %v1418_v61 = vpop.f32.mrf.mxu1 }
 0x16b   : > { %v6045_v6 = vadd.f32 %v4175_v59, %v1554_v18  ;;  %v1553_v46 = vadd.f32 %v1418_v61, %v5902_v44 }
 0x16c   : > { %v1702_v50 = vpop.f32.mrf.mxu0  ;;  %v4098_v14 = vpop.f32.mrf.mxu1 }
 0x16d   : > { %v6048_v4 = vadd.f32 %v1702_v50, %v1553_v46  ;;  %v1556_v41 = vadd.f32 %v4098_v14, %v5907_v32 }
 0x16e   : > { %v4178_v52 = vpop.f32.mrf.mxu0  ;;  %v1428_v37 = vpop.f32.mrf.mxu1 }
 0x16f   : > { %v6051_v30 = vadd.f32 %v4178_v52, %v1556_v41  ;;  %v1555_v33 = vadd.f32 %v1428_v37, %v5912_v62 }
 0x170   : > { %v1712_v1 = vpop.f32.mrf.mxu0  ;;  %v4101_v58 = vpop.f32.mrf.mxu1 }
 0x171   : > { %v6054_v60 = vadd.f32 %v1712_v1, %v1555_v33  ;;  %v1558_v48 = vadd.f32 %v4101_v58, %v5917_v45 }
 0x172   : > { %v4181_v22 = vpop.f32.mrf.mxu0  ;;  %v1438_v44 = vpop.f32.mrf.mxu1 }
 0x173   : > { %v6057_v43 = vadd.f32 %v4181_v22, %v1558_v48  ;;  %v1557_v53 = vadd.f32 %v1438_v44, %v5922_v28 }
 0x174   : > { %v1722_v34 = vpop.f32.mrf.mxu0  ;;  %v4104_v32 = vpop.f32.mrf.mxu1 }
 0x175   : > { %v6060_v56 = vadd.f32 %v1722_v34, %v1557_v53  ;;  %v1560_v36 = vadd.f32 %v4104_v32, %v5927_v19 }
 0x176   : > { %v4184_v13 = vpop.f32.mrf.mxu0  ;;  %v1448_v62 = vpop.f32.mrf.mxu1 }
 0x177   : > { %v6063_v40 = vadd.f32 %v4184_v13, %v1560_v36  ;;  %v1559_v42 = vadd.f32 %v1448_v62, %v5932_v12 }
 0x178   : > { %v1732_v57 = vpop.f32.mrf.mxu0  ;;  %v4107_v45 = vpop.f32.mrf.mxu1 }
 0x179   : > { %v6066_v51 = vadd.f32 %v1732_v57, %v1559_v42  ;;  %v1562_v31 = vadd.f32 %v4107_v45, %v5937_v39 }
 0x17a   : > { %v4187_v54 = vpop.f32.mrf.mxu0  ;;  %v1458_v28 = vpop.f32.mrf.mxu1 }
 0x17b   : > { %v6069_v2 = vadd.f32 %v4187_v54, %v1562_v31  ;;  %v1561_v35 = vadd.f32 %v1458_v28, %v5942_v5 }
 0x17c   : > { %v1742_v10 = vpop.f32.mrf.mxu0  ;;  %v4110_v19 = vpop.f32.mrf.mxu1 }
 0x17d   : > { %v6072_v18 = vadd.f32 %v1742_v10, %v1561_v35  ;;  %v1564_v59 = vadd.f32 %v4110_v19, %v5947_v29 }
 0x17e   : > { %v4190_v61 = vpop.f32.mrf.mxu0  ;;  %v1468_v12 = vpop.f32.mrf.mxu1 }
 0x17f   : > { %v6075_v46 = vadd.f32 %v4190_v61, %v1564_v59  ;;  %v1563_v50 = vadd.f32 %v1468_v12, %v5952_v17 }
 0x180   : > { %v1752_v14 = vpop.f32.mrf.mxu0  ;;  %v4113_v39 = vpop.f32.mrf.mxu1 }
 0x181   : > { %v6078_v41 = vadd.f32 %v1752_v14, %v1563_v50  ;;  %v1566_v52 = vadd.f32 %v4113_v39, %v5957_v55 }
 0x182   : > { %v4193_v37 = vpop.f32.mrf.mxu0  ;;  %v1478_v5 = vpop.f32.mrf.mxu1 }
 0x183   : > { %v6081_v33 = vadd.f32 %v4193_v37, %v1566_v52  ;;  %v1565_v1 = vadd.f32 %v1478_v5, %v5962_v16 }
 0x184   : > { %v1762_v58 = vpop.f32.mrf.mxu0  ;;  %v4116_v29 = vpop.f32.mrf.mxu1 }
 0x185   : > { %6814 = vst [vmem:[#allocation4_spill] sm:$0xff] %v6081_v33  ;;  %v6084_v48 = vadd.f32 %v1762_v58, %v1565_v1  ;;  %v1568_v22 = vadd.f32 %v4116_v29, %v5967_v9 }
 0x186   : > { %v4196_v44 = vpop.f32.mrf.mxu0  ;;  %v1488_v17 = vpop.f32.mrf.mxu1 }
 0x187   : > { %6815 = vst [vmem:[#allocation5_spill] sm:$0xff] %v6084_v48  ;;  %v6087_v53 = vadd.f32 %v4196_v44, %v1568_v22  ;;  %v1567_v34 = vadd.f32 %v1488_v17, %v5972_v49 }
 0x188   : > { %v1772_v32 = vpop.f32.mrf.mxu0  ;;  %v4119_v55 = vpop.f32.mrf.mxu1 }
 0x189   : > { %6816 = vst [vmem:[#allocation7_spill] sm:$0xff] %v6087_v53  ;;  %v6090_v36 = vadd.f32 %v1772_v32, %v1567_v34  ;;  %v1570_v13 = vadd.f32 %v4119_v55, %v5977_v27 }
 0x18a   : > { %v4199_v62 = vpop.f32.mrf.mxu0  ;;  %v1498_v16 = vpop.f32.mrf.mxu1 }
 0x18b   : > { %6817 = vst [vmem:[#allocation9_spill] sm:$0xff] %v6090_v36  ;;  %v6093_v42 = vadd.f32 %v4199_v62, %v1570_v13  ;;  %v1569_v57 = vadd.f32 %v1498_v16, %v5982_v26 }
 0x18c   : > { %v1782_v45 = vpop.f32.mrf.mxu0  ;;  %v4122_v9 = vpop.f32.mrf.mxu1 }
 0x18d   : > { %6818 = vst [vmem:[#allocation11_spill] sm:$0xff] %v6093_v42  ;;  %v6096_v31 = vadd.f32 %v1782_v45, %v1569_v57  ;;  %v1572_v54 = vadd.f32 %v4122_v9, %v5990_v47 }
 0x18e   : > { %v4202_v28 = vpop.f32.mrf.mxu0  ;;  %v1508_v49 = vpop.f32.mrf.mxu1 }
 0x18f   : > { %6819 = vst [vmem:[#allocation10_spill] sm:$0xff] %v6096_v31  ;;  %v6099_v35 = vadd.f32 %v4202_v28, %v1572_v54  ;;  %v1571_v10 = vadd.f32 %v1508_v49, %v5997_v21 }
 0x190   : > { %v1792_v19 = vpop.f32.mrf.mxu0  ;;  %v4125_v27 = vpop.f32.mrf.mxu1 }
 0x191   : > { %6820 = vst [vmem:[#allocation13_spill] sm:$0xff] %v6099_v35  ;;  %v6102_v59 = vadd.f32 %v1792_v19, %v1571_v10  ;;  %v1574_v61 = vadd.f32 %v4125_v27, %v6003_v23 }
 0x192   : > { %v4205_v12 = vpop.f32.mrf.mxu0  ;;  %v1518_v26 = vpop.f32.mrf.mxu1 }
 0x193   : > { %6821 = vst [vmem:[#allocation15_spill] sm:$0xff] %v6102_v59  ;;  %v6105_v50 = vadd.f32 %v4205_v12, %v1574_v61  ;;  %v1573_v14 = vadd.f32 %v1518_v26, %v6009_v7 }
 0x194   : > { %v1802_v39 = vpop.f32.mrf.mxu0  ;;  %v4128_v47 = vpop.f32.mrf.mxu1 }
 0x195   : > { %6822 = vst [vmem:[#allocation12_spill] sm:$0xff] %v6105_v50  ;;  %v6108_v52 = vadd.f32 %v1802_v39, %v1573_v14  ;;  %v1576_v37 = vadd.f32 %v4128_v47, %v6014_v11 }
 0x196   : > { %v4208_v5 = vpop.f32.mrf.mxu0  ;;  %v1528_v21 = vpop.f32.mrf.mxu1 }
 0x197   : > { %6823 = vst [vmem:[#allocation31_spill] sm:$0xff] %v6108_v52  ;;  %v6111_v1 = vadd.f32 %v4208_v5, %v1576_v37  ;;  %v1575_v58 = vadd.f32 %v1528_v21, %v6018_v25 }
 0x198   : > { %v1812_v29 = vpop.f32.mrf.mxu0  ;;  %v4131_v23 = vpop.f32.mrf.mxu1 }
 0x199   : > { %6824 = vst [vmem:[#allocation17_spill] sm:$0xff] %v6111_v1  ;;  %v6114_v22 = vadd.f32 %v1812_v29, %v1575_v58  ;;  %v1578_v44 = vadd.f32 %v4131_v23, %v6021_v38 }
 0x19a   : > { %v4211_v17 = vpop.f32.mrf.mxu0  ;;  %v1538_v7 = vpop.f32.mrf.mxu1 }
 0x19b   : > { %6825 = vst [vmem:[#allocation14_spill] sm:$0xff] %v6114_v22  ;;  %v6117_v34 = vadd.f32 %v4211_v17, %v1578_v44  ;;  %v1577_v32 = vadd.f32 %v1538_v7, %v6024_v0 }
 0x19c   : > { %v1822_v55 = vpop.f32.mrf.mxu0  ;;  %v4246_v11 = vpop.f32.mrf.mxu1 }
 0x19d   : > { %6826 = vst [vmem:[#allocation19_spill] sm:$0xff] %v6117_v34  ;;  %v6120_v13 = vadd.f32 %v1822_v55, %v1577_v32 }
 0x19e   : > { %v6122_v62 = vpop.f32.mrf.mxu0  ;;  %v1953_v16 = vpop.f32.mrf.mxu1 }
 0x19f   : > { %6827 = vst [vmem:[#allocation32_spill] sm:$0xff] %v6120_v13 }
 0x1a0   : > { %v6124_v25 = vpop.f32.mrf.mxu0  ;;  %v4249_v57 = vpop.f32.mrf.mxu1 }
 0x1a2   : > { %v6126_v45 = vpop.f32.mrf.mxu0  ;;  %v6128_v9 = vpop.f32.mrf.mxu1 }
 0x1a4   : > { %v6130_v38 = vpop.f32.mrf.mxu0  ;;  %v6132_v54 = vpop.f32.mrf.mxu1 }
 0x1a6   : > { %v6134_v28 = vpop.f32.mrf.mxu0  ;;  %v6136_v0 = vpop.f32.mrf.mxu1 }
 0x1a8   : > { %v6138_v49 = vpop.f32.mrf.mxu0  ;;  %v6140_v10 = vpop.f32.mrf.mxu1 }
 0x1aa   : > { %v6142_v19 = vpop.f32.mrf.mxu0  ;;  %v6144_v27 = vpop.f32.mrf.mxu1 }
 0x1ac   : > { %v6146_v61 = vpop.f32.mrf.mxu0  ;;  %v6148_v12 = vpop.f32.mrf.mxu1 }
 0x1ae   : > { %v6150_v26 = vpop.f32.mrf.mxu0  ;;  %v6152_v14 = vpop.f32.mrf.mxu1 }
 0x1b0   : > { %v6154_v39 = vpop.f32.mrf.mxu0  ;;  %v6156_v47 = vpop.f32.mrf.mxu1 }
 0x1b2   : > { %v6158_v37 = vpop.f32.mrf.mxu0  ;;  %v6160_v5 = vpop.f32.mrf.mxu1 }
 0x1b4   : > { %v6162_v21 = vpop.f32.mrf.mxu0  ;;  %v6164_v58 = vpop.f32.mrf.mxu1 }
 0x1b6   : > { %v6166_v29 = vpop.f32.mrf.mxu0  ;;  %v6168_v23 = vpop.f32.mrf.mxu1 }
 0x1b8   : > { %v6170_v44 = vpop.f32.mrf.mxu0  ;;  %v6172_v17 = vpop.f32.mrf.mxu1 }
 0x1ba   : > { %v6174_v7 = vpop.f32.mrf.mxu0  ;;  %v6176_v32 = vpop.f32.mrf.mxu1 }
 0x1bc   : > { %v6178_v55 = vpop.f32.mrf.mxu0  ;;  %v6180_v13 = vpop.f32.mrf.mxu1 }
 0x1be   : > { %v6182_v34 = vpop.f32.mrf.mxu0  ;;  %v6184_v22 = vpop.f32.mrf.mxu1 }
 0x1c0   : > { %v6186_v1 = vpop.f32.mrf.mxu0  ;;  %v6188_v52 = vpop.f32.mrf.mxu1 }
 0x1c1   : > { %6828 = vst [vmem:[#allocation16_spill] sm:$0xff] %v6186_v1  ;;  %6829 = vst [vmem:[#allocation33_spill] sm:$0xff] %v6188_v52 }
 0x1c2   : > { %v6190_v50 = vpop.f32.mrf.mxu0  ;;  %v6192_v59 = vpop.f32.mrf.mxu1 }
 0x1c3   : > { %6830 = vst [vmem:[#allocation21_spill] sm:$0xff] %v6190_v50  ;;  %6831 = vst [vmem:[#allocation18_spill] sm:$0xff] %v6192_v59 }
 0x1c4   : > { %v6194_v35 = vpop.f32.mrf.mxu0  ;;  %v6196_v31 = vpop.f32.mrf.mxu1 }
 0x1c5   : > { %6832 = vst [vmem:[#allocation23_spill] sm:$0xff] %v6194_v35  ;;  %6833 = vst [vmem:[#allocation34_spill] sm:$0xff] %v6196_v31 }
 0x1c6   : > { %v6198_v42 = vpop.f32.mrf.mxu0  ;;  %v6200_v36 = vpop.f32.mrf.mxu1 }
 0x1c7   : > { %6834 = vst [vmem:[#allocation20_spill] sm:$0xff] %v6198_v42  ;;  %6835 = vst [vmem:[#allocation25_spill] sm:$0xff] %v6200_v36 }
 0x1c8   : > { %v6202_v53 = vpop.f32.mrf.mxu0  ;;  %v6204_v48 = vpop.f32.mrf.mxu1 }
 0x1c9   : > { %6836 = vst [vmem:[#allocation22_spill] sm:$0xff] %v6202_v53  ;;  %6837 = vst [vmem:[#allocation26_spill] sm:$0xff] %v6204_v48 }
 0x1ca   : > { %v6206_v33 = vpop.f32.mrf.mxu0  ;;  %v6208_v1 = vpop.f32.mrf.mxu1 }
 0x1cb   : > { %6838 = vst [vmem:[#allocation35_spill] sm:$0xff] %v6206_v33  ;;  %6839 = vst [vmem:[#allocation24_spill] sm:$0xff] %v6208_v1 }
 0x1cc   : > { %v6210_v52 = vpop.f32.mrf.mxu0  ;;  %v6212_v50 = vpop.f32.mrf.mxu1 }
 0x1cd   : > { %6840 = vst [vmem:[#allocation27_spill] sm:$0xff] %v6210_v52  ;;  %6841 = vst [vmem:[#allocation2_spill] sm:$0xff] %v6212_v50 }
 0x1ce   : > { %v6214_v59 = vpop.f32.mrf.mxu0  ;;  %v6216_v35 = vpop.f32.mrf.mxu1 }
 0x1cf   : > { %6842 = vst [vmem:[#allocation6_spill] sm:$0xff] %v6214_v59  ;;  %6843 = vst [vmem:[#allocation36_spill] sm:$0xff] %v6216_v35  ;;  %v2113_v59 = vadd.f32 %v4246_v11, %v6027_v63  ;;  %v2114_v63 = vadd.f32 %v6128_v9, %v6036_v15  ;;  %v2119_v9 = vadd.f32 %v6140_v10, %v6045_v6 }
 0x1d0   : > { %v6218_v31 = vpop.f32.mrf.mxu0  ;;  %v6220_v42 = vpop.f32.mrf.mxu1 }
 0x1d1   : > { %6844 = vst [vmem:[#allocation3_spill] sm:$0xff] %v6218_v31  ;;  %6845 = vst [vmem:[#allocation8_spill] sm:$0xff] %v6220_v42  ;;  %v2112_v42 = vadd.f32 %v1953_v16, %v6030_v8  ;;  %v2117_v8 = vadd.f32 %v6132_v54, %v6039_v20 }
 0x1d2   : > { %v6222_v36 = vpop.f32.mrf.mxu0  ;;  %v6224_v53 = vpop.f32.mrf.mxu1 }
 0x1d3   : > { %6846 = vst [vmem:[#allocation28_spill] sm:$0xff] %v6222_v36  ;;  %6847 = vst [vmem:[#allocation30_spill] sm:$0xff] %v6224_v53 }
 0x1d4   : > { %v6226_v48 = vpop.f32.mrf.mxu0  ;;  %v6228_v33 = vpop.f32.mrf.mxu1 }
 0x1d5   : > { %6848 = vst [vmem:[#allocation29_spill] sm:$0xff] %v6226_v48  ;;  %6849 = vst [vmem:[#allocation37_spill] sm:$0xff] %v6228_v33  ;;  %v2387_v48 = vadd.f32 %v6122_v62, %v2113_v59  ;;  %v2115_v33 = vadd.f32 %v4249_v57, %v6033_v3  ;;  %v6257_v59 = vld [vmem:[%s6628_s2] ss:$0 sm:$0xff] }
 0x1d6   : > { %v6230_v52 = vpop.f32.mrf.mxu0  ;;  %v6232_v50 = vpop.f32.mrf.mxu1 }
 0x1d7   : > { %6850 = vst [vmem:[#allocation38_spill] sm:$0xff] %v6230_v52  ;;  %6851 = vst [vmem:[#allocation39_spill] sm:$0xff] %v6232_v50  ;;  %v2386_v50 = vadd.f32 %v6124_v25, %v2112_v42  ;;  %v2389_v62 = vadd.f32 %v6126_v45, %v2115_v33  ;;  %v2116_v42 = vadd.f32 %v6136_v0, %v6042_v24 }
 0x1d8   : > { %v6235_v35 = vpop.f32.mrf.mxu0  ;;  %v6237_v31 = vpop.f32.mrf.mxu1 }
 0x1da   : > { %v6240_v36 = vpop.f32.mrf.mxu0  ;;  %v6242_v53 = vpop.f32.mrf.mxu1 }
 0x1dc   : > { %v6246_v1 = vpop.f32.mrf.mxu0  ;;  %v4406_v52 = vpop.f32.mrf.mxu1 }
 0x1dd   : > { %6852 = vst [vmem:[#allocation40_spill] sm:$0xff] %v6246_v1  ;;  %v2671_v11 = vadd.f32 %v4406_v52, %v2387_v48  ;;  %v2388_v48 = vadd.f32 %v6130_v38, %v2114_v63  ;;  %v2390_v63 = vadd.f32 %v6138_v49, %v2116_v42  ;;  %v2393_v49 = vadd.f32 %v6142_v19, %v2119_v9 }
 0x1de   : > { %v4486_v16 = vpop.f32.mrf.mxu0  ;;  %v2511_v3 = vpop.f32.mrf.mxu1  ;;  %v2120_v42 = vadd.f32 %v6152_v14, %v6054_v60 }
 0x1df   : > { %v2952_v57 = vadd.f32 %v4486_v16, %v2671_v11  ;;  %v2670_v1 = vadd.f32 %v2511_v3, %v2386_v50  ;;  %v2391_v50 = vadd.f32 %v6134_v28, %v2117_v8  ;;  %v2118_v28 = vadd.f32 %v6144_v27, %v6048_v4 }
 0x1e0   : > { %v2792_v15 = vpop.f32.mrf.mxu0  ;;  %v4409_v20 = vpop.f32.mrf.mxu1  ;;  %v2121_v16 = vadd.f32 %v6148_v12, %v6051_v30 }
 0x1e1   : > { %v6269_v52 = vadd.f32 %v6257_v59, %v2952_v57  ;;  %v2951_v33 = vadd.f32 %v2792_v15, %v2670_v1  ;;  %v2673_v25 = vadd.f32 %v4409_v20, %v2389_v62 }
 0x1e2   : > { %v4489_v45 = vpop.f32.mrf.mxu0  ;;  %v2521_v24 = vpop.f32.mrf.mxu1 }
 0x1e3   : > { %3023 = vst [vmem:[%s6265_s9 + $0x8] sm:$0xff] %v6269_v52  ;;  %v6277_v54 = vadd.f32 %v6257_v59, %v2951_v33  ;;  %v2954_v38 = vadd.f32 %v4489_v45, %v2673_v25  ;;  %v2672_v0 = vadd.f32 %v2521_v24, %v2388_v48  ;;  %v2392_v48 = vadd.f32 %v6146_v61, %v2118_v28 }
 0x1e4   : > { %v2802_v11 = vpop.f32.mrf.mxu0  ;;  %v4412_v1 = vpop.f32.mrf.mxu1  ;;  %v2395_v33 = vadd.f32 %v6150_v26, %v2121_v16  ;;  %v2123_v45 = vadd.f32 %v6156_v47, %v6057_v43  ;;  %v2394_v24 = vadd.f32 %v6154_v39, %v2120_v42  ;;  %v2122_v26 = vadd.f32 %v6160_v5, %v6060_v56 }
 0x1e5   : > { %3022 = vst [vmem:[%s6265_s9] sm:$0xff] %v6277_v54  ;;  %v6285_v6 = vadd.f32 %v6257_v59, %v2954_v38  ;;  %v2953_v10 = vadd.f32 %v2802_v11, %v2672_v0  ;;  %v2675_v8 = vadd.f32 %v4412_v1, %v2391_v50 }
 0x1e6   : > { %v4492_v3 = vpop.f32.mrf.mxu0  ;;  %v2531_v62 = vpop.f32.mrf.mxu1  ;;  %v2397_v39 = vadd.f32 %v6158_v37, %v2123_v45 }
 0x1e7   : > { %3025 = vst [vmem:[%s6265_s9 + $0x18] sm:$0xff] %v6285_v6  ;;  %v6293_v4 = vadd.f32 %v6257_v59, %v2953_v10  ;;  %v2956_v27 = vadd.f32 %v4492_v3, %v2675_v8  ;;  %v2674_v57 = vadd.f32 %v2531_v62, %v2390_v63  ;;  %v2125_v63 = vadd.f32 %v6164_v58, %v6063_v40 }
 0x1e8   : > { %v2812_v15 = vpop.f32.mrf.mxu0  ;;  %v4415_v20 = vpop.f32.mrf.mxu1  ;;  %v2124_v10 = vadd.f32 %v6168_v23, %v6066_v51  ;;  %v2396_v3 = vadd.f32 %v6162_v21, %v2122_v26  ;;  %v6853_v26 = vld [vmem:[#allocation4_spill] sm:$0xff] }
 0x1e9   : > { %3024 = vst [vmem:[%s6265_s9 + $0x10] sm:$0xff] %v6293_v4  ;;  %v6301_v30 = vadd.f32 %v6257_v59, %v2956_v27  ;;  %v2955_v19 = vadd.f32 %v2812_v15, %v2674_v57  ;;  %v2677_v12 = vadd.f32 %v4415_v20, %v2393_v49  ;;  %v2399_v62 = vadd.f32 %v6166_v29, %v2125_v63  ;;  %v6855_v63 = vld [vmem:[#allocation16_spill] sm:$0xff] }
 0x1ea   : > { %v4495_v25 = vpop.f32.mrf.mxu0  ;;  %v2541_v50 = vpop.f32.mrf.mxu1  ;;  %v2127_v57 = vadd.f32 %v6172_v17, %v6069_v2  ;;  %v2398_v42 = vadd.f32 %v6170_v44, %v2124_v10  ;;  %v2126_v29 = vadd.f32 %v6176_v32, %v6072_v18 }
 0x1eb   : > { %3027 = vst [vmem:[%s6265_s9 + $0x28] sm:$0xff] %v6301_v30  ;;  %v6309_v60 = vadd.f32 %v6257_v59, %v2955_v19  ;;  %v2958_v61 = vadd.f32 %v4495_v25, %v2677_v12  ;;  %v2676_v14 = vadd.f32 %v2541_v50, %v2392_v48  ;;  %v2129_v19 = vadd.f32 %v6180_v13, %v6075_v46 }
 0x1ec   : > { %v2822_v9 = vpop.f32.mrf.mxu0  ;;  %v4418_v38 = vpop.f32.mrf.mxu1  ;;  %v2401_v44 = vadd.f32 %v6174_v7, %v2127_v57  ;;  %v2128_v50 = vadd.f32 %v6184_v22, %v6078_v41 }
 0x1ed   : > { %3026 = vst [vmem:[%s6265_s9 + $0x20] sm:$0xff] %v6309_v60  ;;  %v6317_v43 = vadd.f32 %v6257_v59, %v2958_v61  ;;  %v2957_v47 = vadd.f32 %v2822_v9, %v2676_v14  ;;  %v2679_v0 = vadd.f32 %v4418_v38, %v2395_v33  ;;  %v2400_v14 = vadd.f32 %v6178_v55, %v2126_v29 }
 0x1ee   : > { %v4498_v11 = vpop.f32.mrf.mxu0  ;;  %v2551_v1 = vpop.f32.mrf.mxu1 }
 0x1ef   : > { %3029 = vst [vmem:[%s6265_s9 + $0x38] sm:$0xff] %v6317_v43  ;;  %v6325_v56 = vadd.f32 %v6257_v59, %v2957_v47  ;;  %v2960_v5 = vadd.f32 %v4498_v11, %v2679_v0  ;;  %v2678_v28 = vadd.f32 %v2551_v1, %v2394_v24  ;;  %v2403_v24 = vadd.f32 %v6182_v34, %v2129_v19  ;;  %v6854_v47 = vld [vmem:[#allocation33_spill] sm:$0xff]  ;;  %v6863_v19 = vld [vmem:[#allocation23_spill] sm:$0xff] }
 0x1f0   : > { %v2832_v8 = vpop.f32.mrf.mxu0  ;;  %v4421_v16 = vpop.f32.mrf.mxu1  ;;  %v2131_v0 = vadd.f32 %v6854_v47, %v6853_v26  ;;  %v2402_v11 = vadd.f32 %v6855_v63, %v2128_v50  ;;  %v6867_v26 = vld [vmem:[#allocation22_spill] sm:$0xff]  ;;  %v6869_v63 = vld [vmem:[#allocation24_spill] sm:$0xff] }
 0x1f1   : > { %3028 = vst [vmem:[%s6265_s9 + $0x30] sm:$0xff] %v6325_v56  ;;  %v6333_v40 = vadd.f32 %v6257_v59, %v2960_v5  ;;  %v2959_v37 = vadd.f32 %v2832_v8, %v2678_v28  ;;  %v2681_v58 = vadd.f32 %v4421_v16, %v2397_v39  ;;  %v6856_v5 = vld [vmem:[#allocation5_spill] sm:$0xff]  ;;  %v6857_v28 = vld [vmem:[#allocation18_spill] sm:$0xff] }
 0x1f2   : > { %v4501_v49 = vpop.f32.mrf.mxu0  ;;  %v2561_v27 = vpop.f32.mrf.mxu1  ;;  %v2130_v34 = vadd.f32 %v6857_v28, %v6856_v5  ;;  %v6870_v28 = vld [vmem:[#allocation13_spill] sm:$0xff] }
 0x1f3   : > { %3031 = vst [vmem:[%s6265_s9 + $0x48] sm:$0xff] %v6333_v40  ;;  %v6341_v51 = vadd.f32 %v6257_v59, %v2959_v37  ;;  %v2962_v21 = vadd.f32 %v4501_v49, %v2681_v58  ;;  %v2680_v23 = vadd.f32 %v2561_v27, %v2396_v3  ;;  %v6858_v3 = vld [vmem:[#allocation7_spill] sm:$0xff]  ;;  %v6859_v37 = vld [vmem:[#allocation34_spill] sm:$0xff]  ;;  %v6860_v27 = vld [vmem:[#allocation21_spill] sm:$0xff] }
 0x1f4   : > { %v2842_v15 = vpop.f32.mrf.mxu0  ;;  %v4424_v20 = vpop.f32.mrf.mxu1  ;;  %v2133_v58 = vadd.f32 %v6859_v37, %v6858_v3  ;;  %v2405_v57 = vadd.f32 %v6860_v27, %v2131_v0  ;;  %v6872_v37 = vld [vmem:[#allocation35_spill] sm:$0xff] }
 0x1f5   : > { %3030 = vst [vmem:[%s6265_s9 + $0x40] sm:$0xff] %v6341_v51  ;;  %v6349_v2 = vadd.f32 %v6257_v59, %v2962_v21  ;;  %v2961_v17 = vadd.f32 %v2842_v15, %v2680_v23  ;;  %v2683_v48 = vadd.f32 %v4424_v20, %v2399_v62  ;;  %v6861_v15 = vld [vmem:[#allocation9_spill] sm:$0xff] }
 0x1f6   : > { %v4504_v12 = vpop.f32.mrf.mxu0  ;;  %v2571_v33 = vpop.f32.mrf.mxu1  ;;  %v6862_v20 = vld [vmem:[#allocation25_spill] sm:$0xff] }
 0x1f7   : > { %3033 = vst [vmem:[%s6265_s9 + $0x58] sm:$0xff] %v6349_v2  ;;  %v6357_v18 = vadd.f32 %v6257_v59, %v2961_v17  ;;  %v2964_v32 = vadd.f32 %v4504_v12, %v2683_v48  ;;  %v2682_v25 = vadd.f32 %v2571_v33, %v2398_v42  ;;  %v2132_v29 = vadd.f32 %v6862_v20, %v6861_v15 }
 0x1f8   : > { %v2852_v45 = vpop.f32.mrf.mxu0  ;;  %v4427_v61 = vpop.f32.mrf.mxu1  ;;  %v2404_v12 = vadd.f32 %v6863_v19, %v2130_v34  ;;  %v6871_v34 = vld [vmem:[#allocation2_spill] sm:$0xff] }
 0x1f9   : > { %3032 = vst [vmem:[%s6265_s9 + $0x50] sm:$0xff] %v6357_v18  ;;  %v6365_v46 = vadd.f32 %v6257_v59, %v2964_v32  ;;  %v2963_v13 = vadd.f32 %v2852_v45, %v2682_v25  ;;  %v2685_v7 = vadd.f32 %v4427_v61, %v2401_v44  ;;  %v6864_v25 = vld [vmem:[#allocation20_spill] sm:$0xff]  ;;  %v2406_v47 = vadd.f32 %v6867_v26, %v2132_v29  ;;  %v6875_v29 = vld [vmem:[#allocation27_spill] sm:$0xff] }
 0x1fa   : > { %v4507_v9 = vpop.f32.mrf.mxu0  ;;  %v2581_v38 = vpop.f32.mrf.mxu1  ;;  %v2407_v50 = vadd.f32 %v6864_v25, %v2133_v58 }
 0x1fb   : > { %3035 = vst [vmem:[%s6265_s9 + $0x68] sm:$0xff] %v6365_v46  ;;  %v6373_v41 = vadd.f32 %v6257_v59, %v2963_v13  ;;  %v2966_v22 = vadd.f32 %v4507_v9, %v2685_v7  ;;  %v2684_v55 = vadd.f32 %v2581_v38, %v2400_v14  ;;  %v6865_v14 = vld [vmem:[#allocation11_spill] sm:$0xff]  ;;  %v6866_v13 = vld [vmem:[#allocation26_spill] sm:$0xff] }
 0x1fc   : > { %v2862_v1 = vpop.f32.mrf.mxu0  ;;  %v4430_v39 = vpop.f32.mrf.mxu1  ;;  %v2135_v7 = vadd.f32 %v6866_v13, %v6865_v14 }
 0x1fd   : > { %3034 = vst [vmem:[%s6265_s9 + $0x60] sm:$0xff] %v6373_v41  ;;  %v6381_v10 = vadd.f32 %v6257_v59, %v2966_v22  ;;  %v2965_v8 = vadd.f32 %v2862_v1, %v2684_v55  ;;  %v2687_v16 = vadd.f32 %v4430_v39, %v2403_v24  ;;  %v6868_v55 = vld [vmem:[#allocation10_spill] sm:$0xff] }
 0x1fe   : > { %v4510_v62 = vpop.f32.mrf.mxu0  ;;  %v2591_v49 = vpop.f32.mrf.mxu1  ;;  %v2409_v58 = vadd.f32 %v6872_v37, %v2135_v7  ;;  %v6884_v37 = vld [vmem:[#allocation28_spill] sm:$0xff] }
 0x1ff   : > { %3037 = vst [vmem:[%s6265_s9 + $0x78] sm:$0xff] %v6381_v10  ;;  %v6389_v21 = vadd.f32 %v6257_v59, %v2965_v8  ;;  %v2968_v23 = vadd.f32 %v4510_v62, %v2687_v16  ;;  %v2686_v42 = vadd.f32 %v2591_v49, %v2402_v11  ;;  %v2134_v11 = vadd.f32 %v6869_v63, %v6868_v55  ;;  %v6881_v55 = vld [vmem:[#allocation30_spill] sm:$0xff] }
 0x200   : > { %v2872_v17 = vpop.f32.mrf.mxu0  ;;  %v4433_v48 = vpop.f32.mrf.mxu1  ;;  %v2137_v8 = vadd.f32 %v6871_v34, %v6870_v28  ;;  %v6882_v28 = vld [vmem:[#allocation17_spill] sm:$0xff] }
 0x201   : > { %3036 = vst [vmem:[%s6265_s9 + $0x70] sm:$0xff] %v6389_v21  ;;  %v6397_v33 = vadd.f32 %v6257_v59, %v2968_v23  ;;  %v2967_v44 = vadd.f32 %v2872_v17, %v2686_v42  ;;  %v2689_v32 = vadd.f32 %v4433_v48, %v2405_v57  ;;  %v6873_v57 = vld [vmem:[#allocation15_spill] sm:$0xff]  ;;  %v6874_v23 = vld [vmem:[#allocation36_spill] sm:$0xff]  ;;  %v2408_v17 = vadd.f32 %v6875_v29, %v2134_v11  ;;  %v6883_v34 = vld [vmem:[#allocation37_spill] sm:$0xff] }
 0x202   : > { %v4513_v45 = vpop.f32.mrf.mxu0  ;;  %v2601_v61 = vpop.f32.mrf.mxu1  ;;  %v2136_v42 = vadd.f32 %v6874_v23, %v6873_v57  ;;  %v6885_v23 = vld [vmem:[#allocation14_spill] sm:$0xff] }
 0x203   : > { %3039 = vst [vmem:[%s6265_s9 + $0x88] sm:$0xff] %v6397_v33  ;;  %v6405_v24 = vadd.f32 %v6257_v59, %v2967_v44  ;;  %v2970_v9 = vadd.f32 %v4513_v45, %v2689_v32  ;;  %v2688_v38 = vadd.f32 %v2601_v61, %v2404_v12  ;;  %v6876_v44 = vld [vmem:[#allocation6_spill] sm:$0xff]  ;;  %v6877_v45 = vld [vmem:[#allocation12_spill] sm:$0xff] }
 0x204   : > { %v2882_v0 = vpop.f32.mrf.mxu0  ;;  %v4436_v22 = vpop.f32.mrf.mxu1  ;;  %v2411_v32 = vadd.f32 %v6876_v44, %v2137_v8  ;;  %v6878_v61 = vld [vmem:[#allocation8_spill] sm:$0xff]  ;;  %v2141_v8 = vadd.f32 %v6883_v34, %v6882_v28 }
 0x205   : > { %3038 = vst [vmem:[%s6265_s9 + $0x80] sm:$0xff] %v6405_v24  ;;  %v6413_v1 = vadd.f32 %v6257_v59, %v2970_v9  ;;  %v2969_v39 = vadd.f32 %v2882_v0, %v2688_v38  ;;  %v2691_v5 = vadd.f32 %v4436_v22, %v2407_v50  ;;  %v2139_v14 = vadd.f32 %v6878_v61, %v6877_v45  ;;  %v6879_v38 = vld [vmem:[#allocation3_spill] sm:$0xff] }
 0x206   : > { %v4516_v16 = vpop.f32.mrf.mxu0  ;;  %v2611_v3 = vpop.f32.mrf.mxu1  ;;  %v2410_v26 = vadd.f32 %v6879_v38, %v2136_v42  ;;  %v6880_v22 = vld [vmem:[#allocation31_spill] sm:$0xff] }
 0x207   : > { %3041 = vst [vmem:[%s6265_s9 + $0x98] sm:$0xff] %v6413_v1  ;;  %v6421_v62 = vadd.f32 %v6257_v59, %v2969_v39  ;;  %v2972_v49 = vadd.f32 %v4516_v16, %v2691_v5  ;;  %v2690_v27 = vadd.f32 %v2611_v3, %v2406_v47  ;;  %v2138_v63 = vadd.f32 %v6881_v55, %v6880_v22  ;;  %v6886_v42 = vld [vmem:[#allocation39_spill] sm:$0xff]  ;;  %v6890_v55 = vld [vmem:[#allocation32_spill] sm:$0xff] }
 0x208   : > { %v2892_v15 = vpop.f32.mrf.mxu0  ;;  %v4439_v20 = vpop.f32.mrf.mxu1 }
 0x209   : > { %3040 = vst [vmem:[%s6265_s9 + $0x90] sm:$0xff] %v6421_v62  ;;  %v6429_v48 = vadd.f32 %v6257_v59, %v2972_v49  ;;  %v2971_v19 = vadd.f32 %v2892_v15, %v2690_v27  ;;  %v2693_v12 = vadd.f32 %v4439_v20, %v2409_v58  ;;  %v2413_v58 = vadd.f32 %v6884_v37, %v2139_v14  ;;  %v6889_v14 = vld [vmem:[#allocation19_spill] sm:$0xff] }
 0x20a   : > { %v4519_v25 = vpop.f32.mrf.mxu0  ;;  %v2621_v50 = vpop.f32.mrf.mxu1  ;;  %v2140_v15 = vadd.f32 %v6886_v42, %v6885_v23 }
 0x20b   : > { %3043 = vst [vmem:[%s6265_s9 + $0xa8] sm:$0xff] %v6429_v48  ;;  %v6437_v13 = vadd.f32 %v6257_v59, %v2971_v19  ;;  %v2974_v7 = vadd.f32 %v4519_v25, %v2693_v12  ;;  %v2692_v9 = vadd.f32 %v2621_v50, %v2408_v17  ;;  %v6887_v17 = vld [vmem:[#allocation29_spill] sm:$0xff]  ;;  %v6888_v25 = vld [vmem:[#allocation38_spill] sm:$0xff] }
 0x20c   : > { %v2902_v47 = vpop.f32.mrf.mxu0  ;;  %v4442_v0 = vpop.f32.mrf.mxu1  ;;  %v2412_v19 = vadd.f32 %v6887_v17, %v2138_v63  ;;  %v2415_v50 = vadd.f32 %v6888_v25, %v2141_v8  ;;  %v2142_v63 = vadd.f32 %v6242_v53, %v6890_v55 }
 0x20d   : > { %3042 = vst [vmem:[%s6265_s9 + $0xa0] sm:$0xff] %v6437_v13  ;;  %v6445_v11 = vadd.f32 %v6257_v59, %v2974_v7  ;;  %v2973_v39 = vadd.f32 %v2902_v47, %v2692_v9  ;;  %v2695_v5 = vadd.f32 %v4442_v0, %v2411_v32  ;;  %v2143_v7 = vadd.f32 %v6237_v31, %v6889_v14 }
 0x20e   : > { %v4522_v16 = vpop.f32.mrf.mxu0  ;;  %v2631_v3 = vpop.f32.mrf.mxu1  ;;  %v2414_v47 = vadd.f32 %v6235_v35, %v2140_v15 }
 0x20f   : > { %3045 = vst [vmem:[%s6265_s9 + $0xb8] sm:$0xff] %v6445_v11  ;;  %v6453_v49 = vadd.f32 %v6257_v59, %v2973_v39  ;;  %v2976_v27 = vadd.f32 %v4522_v16, %v2695_v5  ;;  %v2694_v57 = vadd.f32 %v2631_v3, %v2410_v26  ;;  %v2417_v8 = vadd.f32 %v6240_v36, %v2143_v7 }
 0x210   : > { %v2912_v20 = vpop.f32.mrf.mxu0  ;;  %v4445_v29 = vpop.f32.mrf.mxu1 }
 0x211   : > { %3044 = vst [vmem:[%s6265_s9 + $0xb0] sm:$0xff] %v6453_v49  ;;  %v6461_v12 = vadd.f32 %v6257_v59, %v2976_v27  ;;  %v2975_v44 = vadd.f32 %v2912_v20, %v2694_v57  ;;  %v2697_v32 = vadd.f32 %v4445_v29, %v2413_v58  ;;  %v6891_v58 = vld [vmem:[#allocation40_spill] sm:$0xff] }
 0x212   : > { %v4525_v45 = vpop.f32.mrf.mxu0  ;;  %v2641_v61 = vpop.f32.mrf.mxu1  ;;  %v2416_v27 = vadd.f32 %v6891_v58, %v2142_v63 }
 0x213   : > { %3047 = vst [vmem:[%s6265_s9 + $0xc8] sm:$0xff] %v6461_v12  ;;  %v6469_v9 = vadd.f32 %v6257_v59, %v2975_v44  ;;  %v2978_v38 = vadd.f32 %v4525_v45, %v2697_v32  ;;  %v2696_v26 = vadd.f32 %v2641_v61, %v2412_v19 }
 0x214   : > { %v2922_v0 = vpop.f32.mrf.mxu0  ;;  %v4448_v22 = vpop.f32.mrf.mxu1 }
 0x215   : > { %3046 = vst [vmem:[%s6265_s9 + $0xc0] sm:$0xff] %v6469_v9  ;;  %v6477_v31 = vadd.f32 %v6257_v59, %v2978_v38  ;;  %v2977_v39 = vadd.f32 %v2922_v0, %v2696_v26  ;;  %v2699_v5 = vadd.f32 %v4448_v22, %v2415_v50 }
 0x216   : > { %v4528_v28 = vpop.f32.mrf.mxu0  ;;  %v2651_v34 = vpop.f32.mrf.mxu1 }
 0x217   : > { %3049 = vst [vmem:[%s6265_s9 + $0xd8] sm:$0xff] %v6477_v31  ;;  %v6483_v35 = vadd.f32 %v6257_v59, %v2977_v39  ;;  %v2980_v16 = vadd.f32 %v4528_v28, %v2699_v5  ;;  %v2698_v53 = vadd.f32 %v2651_v34, %v2414_v47 }
 0x218   : > { %v2932_v3 = vpop.f32.mrf.mxu0  ;;  %v4451_v37 = vpop.f32.mrf.mxu1 }
 0x219   : > { %3048 = vst [vmem:[%s6265_s9 + $0xd0] sm:$0xff] %v6483_v35  ;;  %v6489_v57 = vadd.f32 %v6257_v59, %v2980_v16  ;;  %v2979_v36 = vadd.f32 %v2932_v3, %v2698_v53  ;;  %v2701_v23 = vadd.f32 %v4451_v37, %v2417_v8 }
 0x21a   : > { %v4531_v42 = vpop.f32.mrf.mxu0  ;;  %v2661_v15 = vpop.f32.mrf.mxu1 }
 0x21b   : > { %3051 = vst [vmem:[%s6265_s9 + $0xe8] sm:$0xff] %v6489_v57  ;;  %v6494_v20 = vadd.f32 %v6257_v59, %v2979_v36  ;;  %v2982_v29 = vadd.f32 %v4531_v42, %v2701_v23  ;;  %v2700_v17 = vadd.f32 %v2661_v15, %v2416_v27 }
 0x21c   : > { %v2942_v19 = vpop.f32.mrf.mxu0 }
 0x21d   : > { %3050 = vst [vmem:[%s6265_s9 + $0xe0] sm:$0xff] %v6494_v20  ;;  %v6499_v44 = vadd.f32 %v6257_v59, %v2982_v29  ;;  %v2981_v32 = vadd.f32 %v2942_v19, %v2700_v17  ;;  %3057 = sbr.rel (%p3376_p4) target bundleno = 548 (0x224), region = 36 }
 0x21f   : > { %3053 = vst [vmem:[%s6265_s9 + $0xf8] sm:$0xff] %v6499_v44  ;;  %v6504_v25 = vadd.f32 %v6257_v59, %v2981_v32 }
 0x221   : > { %3052 = vst [vmem:[%s6265_s9 + $0xf0] sm:$0xff] %v6504_v25 }
 0x222   : > { %v4610_v50 = vmov 0.0  }
 0x223   : > { %3058 = vst [vmem:[%s6630_s4] sm:$0x1] %v4610_v50  ;;  %3059 = vst [vmem:[%s6631_s5] sm:$0x1] %v4610_v50 }
 0x224 PF: > { %v3061_v45 = vadd.f32 %v6269_v52, %v6277_v54  ;;  %v3101_v14 = vmul.f32 %v6277_v54, %v6277_v54  ;;  %v3102_v7 = vmul.f32 %v6269_v52, %v6269_v52  ;;  %v3103_v26 = vmul.f32 %v6293_v4, %v6293_v4 }
 0x225   : > { %v3104_v0 = vmul.f32 %v6285_v6, %v6285_v6  ;;  %v3105_v63 = vmul.f32 %v6309_v60, %v6309_v60  ;;  %v3106_v52 = vmul.f32 %v6301_v30, %v6301_v30  ;;  %v3107_v28 = vmul.f32 %v6325_v56, %v6325_v56 }
 0x226   : > { %v3062_v59 = vadd.f32 %v3061_v45, %v6293_v4  ;;  %v3133_v22 = vadd.f32 %v3102_v7, %v3101_v14  ;;  %v3108_v8 = vmul.f32 %v6317_v43, %v6317_v43  ;;  %v3109_v53 = vmul.f32 %v6341_v51, %v6341_v51 }
 0x227   : > { %v3110_v37 = vmul.f32 %v6333_v40, %v6333_v40  ;;  %v3111_v27 = vmul.f32 %v6357_v18, %v6357_v18  ;;  %v3112_v23 = vmul.f32 %v6349_v2, %v6349_v2  ;;  %v3113_v15 = vmul.f32 %v6373_v41, %v6373_v41 }
 0x228   : > { %v3063_v61 = vadd.f32 %v3062_v59, %v6285_v6  ;;  %v3134_v54 = vadd.f32 %v3133_v22, %v3103_v26  ;;  %v3114_v17 = vmul.f32 %v6365_v46, %v6365_v46  ;;  %v3115_v32 = vmul.f32 %v6389_v21, %v6389_v21 }
 0x229   : > { %v3116_v45 = vmul.f32 %v6381_v10, %v6381_v10  ;;  %v3118_v7 = vmul.f32 %v6397_v33, %v6397_v33  ;;  %v3119_v26 = vmul.f32 %v6421_v62, %v6421_v62 }
 0x22a   : > { %v3064_v38 = vadd.f32 %v3063_v61, %v6309_v60  ;;  %v3135_v5 = vadd.f32 %v3134_v54, %v3104_v0  ;;  %v3117_v61 = vmul.f32 %v6405_v24, %v6405_v24  ;;  %v3120_v0 = vmul.f32 %v6413_v1, %v6413_v1 }
 0x22b   : > { %v3122_v54 = vmul.f32 %v6429_v48, %v6429_v48 }
 0x22c   : > { %v3065_v47 = vadd.f32 %v3064_v38, %v6301_v30  ;;  %v3136_v34 = vadd.f32 %v3135_v5, %v3105_v63 }
 0x22e   : > { %v3066_v55 = vadd.f32 %v3065_v47, %v6325_v56  ;;  %v3137_v16 = vadd.f32 %v3136_v34, %v3106_v52  ;;  %v3123_v52 = vmul.f32 %v6453_v49, %v6453_v49  ;;  %v3125_v34 = vmul.f32 %v6469_v9, %v6469_v9 }
 0x230   : > { %v3067_v39 = vadd.f32 %v3066_v55, %v6317_v43  ;;  %v3138_v3 = vadd.f32 %v3137_v16, %v3107_v28  ;;  %v3121_v55 = vmul.f32 %v6437_v13, %v6437_v13 }
 0x232   : > { %v3068_v4 = vadd.f32 %v3067_v39, %v6341_v51  ;;  %v3139_v58 = vadd.f32 %v3138_v3, %v3108_v8  ;;  %v3126_v8 = vmul.f32 %v6461_v12, %v6461_v12  ;;  %v3128_v3 = vmul.f32 %v6477_v31, %v6477_v31 }
 0x234   : > { %v3069_v6 = vadd.f32 %v3068_v4, %v6333_v40  ;;  %v3140_v36 = vadd.f32 %v3139_v58, %v3109_v53  ;;  %v3124_v4 = vmul.f32 %v6445_v11, %v6445_v11 }
 0x236   : > { %v3070_v60 = vadd.f32 %v3069_v6, %v6357_v18  ;;  %v3141_v42 = vadd.f32 %v3140_v36, %v3110_v37  ;;  %v3129_v37 = vmul.f32 %v6494_v20, %v6494_v20  ;;  %v3131_v36 = vmul.f32 %v6504_v25, %v6504_v25 }
 0x238   : > { %v3071_v30 = vadd.f32 %v3070_v60, %v6349_v2  ;;  %v3142_v29 = vadd.f32 %v3141_v42, %v3111_v27  ;;  %v3127_v60 = vmul.f32 %v6483_v35, %v6483_v35 }
 0x23a   : > { %v3072_v56 = vadd.f32 %v3071_v30, %v6373_v41  ;;  %v3143_v19 = vadd.f32 %v3142_v29, %v3112_v23 }
 0x23c   : > { %v3073_v43 = vadd.f32 %v3072_v56, %v6365_v46  ;;  %v3144_v50 = vadd.f32 %v3143_v19, %v3113_v15  ;;  %v3130_v56 = vmul.f32 %v6489_v57, %v6489_v57 }
 0x23e   : > { %v3074_v51 = vadd.f32 %v3073_v43, %v6389_v21  ;;  %v3145_v59 = vadd.f32 %v3144_v50, %v3114_v17 }
 0x240   : > { %v3075_v40 = vadd.f32 %v3074_v51, %v6381_v10  ;;  %v3146_v14 = vadd.f32 %v3145_v59, %v3115_v32 }
 0x242   : > { %v3076_v18 = vadd.f32 %v3075_v40, %v6405_v24  ;;  %v3147_v38 = vadd.f32 %v3146_v14, %v3116_v45 }
 0x244   : > { %v3077_v2 = vadd.f32 %v3076_v18, %v6397_v33  ;;  %v3148_v47 = vadd.f32 %v3147_v38, %v3117_v61 }
 0x246   : > { %v3078_v41 = vadd.f32 %v3077_v2, %v6421_v62  ;;  %v3149_v22 = vadd.f32 %v3148_v47, %v3118_v7  ;;  %v3100_v2 = vld [vmem:[%s6631_s5] sm:$0x1] }
 0x248   : > { %v3079_v46 = vadd.f32 %v3078_v41, %v6413_v1  ;;  %v3150_v63 = vadd.f32 %v3149_v22, %v3119_v26 }
 0x24a   : > { %v3080_v21 = vadd.f32 %v3079_v46, %v6437_v13  ;;  %v3151_v39 = vadd.f32 %v3150_v63, %v3120_v0 }
 0x24c   : > { %v3081_v10 = vadd.f32 %v3080_v21, %v6429_v48  ;;  %v3152_v5 = vadd.f32 %v3151_v39, %v3121_v55 }
 0x24e   : > { %v3082_v24 = vadd.f32 %v3081_v10, %v6453_v49  ;;  %v3153_v28 = vadd.f32 %v3152_v5, %v3122_v54 }
 0x250   : > { %v3083_v33 = vadd.f32 %v3082_v24, %v6445_v11  ;;  %v3154_v6 = vadd.f32 %v3153_v28, %v3123_v52 }
 0x252   : > { %v3084_v62 = vadd.f32 %v3083_v33, %v6469_v9  ;;  %v3155_v16 = vadd.f32 %v3154_v6, %v3124_v4 }
 0x254   : > { %v3085_v1 = vadd.f32 %v3084_v62, %v6461_v12  ;;  %v3156_v53 = vadd.f32 %v3155_v16, %v3125_v34 }
 0x256   : > { %v3086_v13 = vadd.f32 %v3085_v1, %v6483_v35  ;;  %v3157_v30 = vadd.f32 %v3156_v53, %v3126_v8 }
 0x258   : > { %v3087_v48 = vadd.f32 %v3086_v13, %v6477_v31  ;;  %v3158_v58 = vadd.f32 %v3157_v30, %v3127_v60  ;;  %v3132_v31 = vmul.f32 %v6499_v44, %v6499_v44 }
 0x25a   : > { %v3088_v49 = vadd.f32 %v3087_v48, %v6494_v20  ;;  %v3159_v27 = vadd.f32 %v3158_v58, %v3128_v3 }
 0x25c   : > { %v3089_v11 = vadd.f32 %v3088_v49, %v6489_v57  ;;  %v3160_v43 = vadd.f32 %v3159_v27, %v3129_v37  ;;  %v3060_v57 = vld [vmem:[%s6630_s4] sm:$0x1] }
 0x25e   : > { %v3090_v9 = vadd.f32 %v3089_v11, %v6504_v25  ;;  %v3161_v42 = vadd.f32 %v3160_v43, %v3130_v56 }
 0x260   : > { %v3091_v12 = vadd.f32 %v3090_v9, %v6499_v44  ;;  %v3162_v15 = vadd.f32 %v3161_v42, %v3131_v36 }
 0x262   : > { %v3092_v35 = vrot.slane %v3091_v12, 4  ;;  %v3163_v29 = vadd.f32 %v3162_v15, %v3132_v31 }
 0x264   : > { %v3093_v23 = vadd.f32 %v3092_v35, %v3091_v12  ;;  %v3164_v17 = vrot.slane %v3163_v29, 4 }
 0x266   : > { %v3094_v51 = vrot.slane %v3093_v23, 2  ;;  %v3165_v18 = vadd.f32 %v3164_v17, %v3163_v29 }
 0x268   : > { %v3095_v20 = vadd.f32 %v3094_v51, %v3093_v23  ;;  %v3166_v25 = vrot.slane %v3165_v18, 2 }
 0x26a   : > { %v3096_v40 = vrot.slane %v3095_v20, 1  ;;  %v3167_v44 = vadd.f32 %v3166_v25, %v3165_v18 }
 0x26c   : > { %v3097_v19 = vadd.f32 %v3096_v40, %v3095_v20  ;;  %v3168_v50 = vrot.slane %v3167_v44, 1 }
 0x26e   : > { %v3098_v32 = vadd.f32 %v3097_v19, %v3060_v57  ;;  %v3169_v45 = vadd.f32 %v3168_v50, %v3167_v44 }
 0x270   : > { %3099 = vst [vmem:[%s6630_s4] sm:$0x1] %v3098_v32  ;;  %v3170_v59 = vadd.f32 %v3169_v45, %v3100_v2 }
 0x272   : > { %3171 = vst [vmem:[%s6631_s5] sm:$0x1] %v3170_v59 }
 0x273 PF: > { %s16_s18 = sadd.s32 1, %s4608_s18  }
 0x274   : > { %p13_p5 = scmp.ge.s32.totalorder %s16_s18, 4  }
 0x276   :  { %15 = sbr.rel (!%p13_p5) target bundleno = 1 (0x1), region = 90 }

</bundles_post_ra>
